<compile_context>
chip_gen: v7x
topology: tpu7x:2x2x1
jax: 0.10.0
libtpu: 0.0.40
codegen_flags: <defaults>
</compile_context>

<pallas_src>
import functools

import numpy as np
import jax
import jax.numpy as jnp
from jax.experimental import pallas as pl
from jax.experimental.pallas import tpu as pltpu

BN_EPS = 1e-5
LANE = 128
_VMEM_LIMIT_BYTES = 32 * 1024 * 1024     # explicit scoped-VMEM limit (fits v7x 64 MiB too)
_TILE_BUDGET_BYTES = 12 * 1024 * 1024    # per-step footprint budget for tile sizing


def _round_up(x, m):
    return (x + m - 1) // m * m


def _pick_tile_m(M, Kpad, Cpad):
    """Rows per grid step: double-buffered bf16 patches + f32 out under the VMEM budget."""
    resident = 2 * Kpad * Cpad * 2 + 2 * 8 * Cpad * 4          # weights + stats buffers
    per_row = 2 * (Kpad * 2) + 2 * (Cpad * 4)                  # dbl-buffered patch + out row
    tm = (_TILE_BUDGET_BYTES - resident) // per_row
    tm = max(16, min(2048, (tm // 16) * 16))                   # multiple of 16 (bf16 sublanes)
    tm = min(tm, _round_up(M, 16))
    return int(tm)


# ---------------------------------------------------------------------------
# Pallas kernels
# ---------------------------------------------------------------------------
def _matmul_kernel(p_ref, w_ref, o_ref):
    o_ref[...] = jnp.dot(p_ref[...], w_ref[...], preferred_element_type=jnp.float32)


def _matmul_stats_kernel(p_ref, w_ref, o_ref, s_ref):
    """Conv matmul tile + accumulation of per-channel sum / sum-of-squares (BN pass 1)."""
    acc = jnp.dot(p_ref[...], w_ref[...], preferred_element_type=jnp.float32)
    o_ref[...] = acc

    @pl.when(pl.program_id(0) == 0)
    def _():
        s_ref[...] = jnp.zeros_like(s_ref)

    upd = jnp.concatenate(
        [jnp.sum(acc, axis=0, keepdims=True),
         jnp.sum(acc * acc, axis=0, keepdims=True),
         jnp.zeros((6, acc.shape[1]), jnp.float32)], axis=0)
    s_ref[...] = s_ref[...] + upd


def _make_affine_kernel(act, with_res):
    """BN/bias affine + optional residual + activation (BN pass 2), tiled over rows."""
    def kernel(*refs):
        if with_res:
            x_ref, sc_ref, sh_ref, r_ref, o_ref = refs
        else:
            x_ref, sc_ref, sh_ref, o_ref = refs
        y = x_ref[...] * sc_ref[...] + sh_ref[...]
        if with_res:
            y = y + r_ref[...]
        if act == "relu":
            y = jnp.maximum(y, 0.0)
        elif act == "tanh01":                        # fused tanh(x)/2 + 0.5 (final layer)
            y = jnp.tanh(y) * 0.5 + 0.5
        o_ref[...] = y.astype(o_ref.dtype)
    return kernel


# ---------------------------------------------------------------------------
# pallas_call wrappers
# ---------------------------------------------------------------------------
def _conv_matmul(patches, wmat, tm, with_stats):
    Mpad, Kpad = patches.shape
    Cpad = wmat.shape[1]
    grid = (Mpad // tm,)
    in_specs = [pl.BlockSpec((tm, Kpad), lambda i: (i, 0)),
                pl.BlockSpec((Kpad, Cpad), lambda i: (0, 0))]
    flops = 2 * Mpad * Kpad * Cpad
    bytes_accessed = Mpad * Kpad * 2 + Kpad * Cpad * 2 + Mpad * Cpad * 4 + 8 * Cpad * 4

    if with_stats:
        out_shape = (jax.ShapeDtypeStruct((Mpad, Cpad), jnp.float32),
                     jax.ShapeDtypeStruct((8, Cpad), jnp.float32))
        out_specs = (pl.BlockSpec((tm, Cpad), lambda i: (i, 0)),
                     pl.BlockSpec((8, Cpad), lambda i: (0, 0)))
        kernel = _matmul_stats_kernel
        semantics = ("arbitrary",)        # stats accumulator is revisited across M tiles
    else:
        out_shape = jax.ShapeDtypeStruct((Mpad, Cpad), jnp.float32)
        out_specs = pl.BlockSpec((tm, Cpad), lambda i: (i, 0))
        kernel = _matmul_kernel
        semantics = ("parallel",)

    return pl.pallas_call(
        kernel,
        out_shape=out_shape,
        grid=grid,
        in_specs=in_specs,
        out_specs=out_specs,
        compiler_params=pltpu.CompilerParams(
            dimension_semantics=semantics, vmem_limit_bytes=_VMEM_LIMIT_BYTES),
        cost_estimate=pl.CostEstimate(flops=flops, transcendentals=0,
                                      bytes_accessed=bytes_accessed),
    )(patches, wmat)


def _affine_apply(x2d, scale, shift, residual, act, tm):
    Mpad, Cpad = x2d.shape
    grid = (Mpad // tm,)
    with_res = residual is not None
    inputs = [x2d,
              scale.reshape(1, Cpad).astype(jnp.float32),
              shift.reshape(1, Cpad).astype(jnp.float32)]
    in_specs = [pl.BlockSpec((tm, Cpad), lambda i: (i, 0)),
                pl.BlockSpec((1, Cpad), lambda i: (0, 0)),
                pl.BlockSpec((1, Cpad), lambda i: (0, 0))]
    if with_res:
        inputs.append(residual)
        in_specs.append(pl.BlockSpec((tm, Cpad), lambda i: (i, 0)))

    transcend = Mpad * Cpad if act == "tanh01" else 0
    bytes_accessed = (2 + int(with_res)) * Mpad * Cpad * 4 + 2 * Cpad * 4
    return pl.pallas_call(
        _make_affine_kernel(act, with_res),
        out_shape=jax.ShapeDtypeStruct((Mpad, Cpad), jnp.float32),
        grid=grid,
        in_specs=in_specs,
        out_specs=pl.BlockSpec((tm, Cpad), lambda i: (i, 0)),
        compiler_params=pltpu.CompilerParams(
            dimension_semantics=("parallel",), vmem_limit_bytes=_VMEM_LIMIT_BYTES),
        cost_estimate=pl.CostEstimate(flops=4 * Mpad * Cpad, transcendentals=transcend,
                                      bytes_accessed=bytes_accessed),
    )(*inputs)


# ---------------------------------------------------------------------------
# im2col builders (layout glue; contraction / BN / activation run in Pallas)
# ---------------------------------------------------------------------------
def _im2col(x, KH, KW, stride, pad, pad_mode):
    N, H, W, C = x.shape
    x = x.astype(jnp.bfloat16)
    if pad > 0:
        mode = "reflect" if pad_mode == "reflect" else "constant"
        xp = jnp.pad(x, ((0, 0), (pad, pad), (pad, pad), (0, 0)), mode=mode)
    else:
        xp = x
    Hp, Wp = H + 2 * pad, W + 2 * pad
    Ho = (Hp - KH) // stride + 1
    Wo = (Wp - KW) // stride + 1
    cols = []
    for kh in range(KH):
        for kw in range(KW):
            cols.append(xp[:, kh:kh + (Ho - 1) * stride + 1:stride,
                            kw:kw + (Wo - 1) * stride + 1:stride, :])
    patches = jnp.stack(cols, axis=3).reshape(N * Ho * Wo, KH * KW * C)
    return patches, Ho, Wo


def _im2col_upsample2x(x, KH, KW):
    """im2col of (nearest 2x upsample -> zero-pad 1 -> 3x3 conv) taken directly from the
    small tensor: the 4x upsampled activation is never materialized in HBM."""
    N, H, W, C = x.shape
    xp = jnp.pad(x.astype(jnp.bfloat16), ((0, 0), (1, 1), (1, 1), (0, 0)))
    Ho, Wo = 2 * H, 2 * W
    oh = np.arange(Ho)
    ow = np.arange(Wo)
    cols = []
    for kh in range(KH):
        hidx = (oh + kh + 1) // 2          # padded-x row feeding upsampled-padded row oh+kh
        for kw in range(KW):
            widx = (ow + kw + 1) // 2
            cols.append(xp[:, hidx][:, :, widx])
    patches = jnp.stack(cols, axis=3).reshape(N * Ho * Wo, KH * KW * C)
    return patches, Ho, Wo


# ---------------------------------------------------------------------------
# One conv layer: conv (pass 1) + BN-stats -> affine/residual/activation (pass 2)
# ---------------------------------------------------------------------------
def conv_layer(x, w_oihw, *, stride=1, pad=0, pad_mode="zero", bias=None,
               gamma=None, beta=None, bn=True, act="relu", residual=None,
               upsample=False):
    N, H, W, Cin = x.shape
    Cout, _, KH, KW = w_oihw.shape

    if upsample:
        patches, Ho, Wo = _im2col_upsample2x(x, KH, KW)
    else:
        patches, Ho, Wo = _im2col(x, KH, KW, stride, pad, pad_mode)
    M, K = patches.shape
    Kpad = _round_up(K, LANE)
    Cpad = _round_up(Cout, LANE)
    tm = _pick_tile_m(M, Kpad, Cpad)
    Mpad = _round_up(M, tm)

    patches = jnp.pad(patches, ((0, Mpad - M), (0, Kpad - K)))
    wmat = jnp.transpose(w_oihw, (2, 3, 1, 0)).reshape(K, Cout)
    wmat = jnp.pad(wmat, ((0, Kpad - K), (0, Cpad - Cout))).astype(jnp.bfloat16)

    if bn:
        # NOTE: conv bias (if any) is intentionally dropped here: it is exactly
        # cancelled by the train-mode BatchNorm mean subtraction (and the PyTorch
        # module uses bias=False for BatchNorm-normalized convs).
        conv2d, stats = _conv_matmul(patches, wmat, tm, with_stats=True)
        mean = stats[0] / M                                   # real M, padded rows are 0
        var = jnp.maximum(stats[1] / M - mean * mean, 0.0)    # biased var (train-mode BN)
        inv = jax.lax.rsqrt(var + BN_EPS)
        gamma_p = jnp.pad(gamma.astype(jnp.float32), (0, Cpad - Cout))
        beta_p = jnp.pad(beta.astype(jnp.float32), (0, Cpad - Cout))
        scale = gamma_p * inv
        shift = beta_p - mean * scale
    else:
        conv2d = _conv_matmul(patches, wmat, tm, with_stats=False)
        scale = jnp.ones((Cpad,), jnp.float32)
        if bias is not None:
            shift = jnp.pad(bias.astype(jnp.float32), (0, Cpad - Cout))
        else:
            shift = jnp.zeros((Cpad,), jnp.float32)

    res2d = None
    if residual is not None:
        res2d = jnp.pad(residual.reshape(M, Cout).astype(jnp.float32),
                        ((0, Mpad - M), (0, Cpad - Cout)))

    out2d = _affine_apply(conv2d, scale, shift, res2d, act, tm)
    return out2d[:M, :Cout].reshape(N, Ho, Wo, Cout)


# ---------------------------------------------------------------------------
# Parameter construction (deterministic, synthetic — mirrors module __init__ shapes)
# ---------------------------------------------------------------------------
def init_params(key, input_nc=3, output_nc=3, ngf=8, n_blocks=2):
    params = {}
    keys = iter(jax.random.split(key, 64))

    def conv_w(cout, cin, k):
        return 0.02 * jax.random.normal(next(keys), (cout, cin, k, k), jnp.float32)

    # stem: ReflectionPad(3) + Conv7x7 (bias=False, BN) + BN + ReLU
    params["stem_w"] = conv_w(ngf, input_nc, 7)
    params["stem_g"] = jnp.ones((ngf,), jnp.float32)
    params["stem_be"] = jnp.zeros((ngf,), jnp.float32)

    ch = ngf
    for i in range(2):  # downsampling
        params[f"down{i}_w"] = conv_w(ch * 2, ch, 3)
        params[f"down{i}_g"] = jnp.ones((ch * 2,), jnp.float32)
        params[f"down{i}_be"] = jnp.zeros((ch * 2,), jnp.float32)
        ch *= 2

    for b in range(n_blocks):  # resnet blocks
        for j in (1, 2):
            params[f"blk{b}_w{j}"] = conv_w(ch, ch, 3)
            params[f"blk{b}_g{j}"] = jnp.ones((ch,), jnp.float32)
            params[f"blk{b}_be{j}"] = jnp.zeros((ch,), jnp.float32)

    for i in range(2):  # upsampling
        params[f"up{i}_w"] = conv_w(ch // 2, ch, 3)
        params[f"up{i}_g"] = jnp.ones((ch // 2,), jnp.float32)
        params[f"up{i}_be"] = jnp.zeros((ch // 2,), jnp.float32)
        ch //= 2

    # final: ReflectionPad(3) + Conv7x7 (bias=True, default) + Tanh
    params["final_w"] = conv_w(output_nc, ngf, 7)
    params["final_b"] = 0.02 * jax.random.normal(next(keys), (output_nc,), jnp.float32)
    return params


# ---------------------------------------------------------------------------
# Full forward pass (Albedo_ResnetGenerator.forward)
# ---------------------------------------------------------------------------
def albedo_resnet_generator(x_nchw, params, *, ngf=8, n_blocks=2):
    x = jnp.transpose(x_nchw, (0, 2, 3, 1)).astype(jnp.float32)  # NCHW -> NHWC

    # stem: ReflectionPad(3) + Conv7x7 + BN + ReLU
    x = conv_layer(x, params["stem_w"], stride=1, pad=3, pad_mode="reflect",
                   gamma=params["stem_g"], beta=params["stem_be"], bn=True, act="relu")

    # downsampling: Conv3x3 stride 2, zero pad 1, BN, ReLU
    for i in range(2):
        x = conv_layer(x, params[f"down{i}_w"], stride=2, pad=1, pad_mode="zero",
                       gamma=params[f"down{i}_g"], beta=params[f"down{i}_be"],
                       bn=True, act="relu")

    # resnet blocks (reflection pad 1, no dropout since use_dropout=False)
    for b in range(n_blocks):
        y = conv_layer(x, params[f"blk{b}_w1"], stride=1, pad=1, pad_mode="reflect",
                       gamma=params[f"blk{b}_g1"], beta=params[f"blk{b}_be1"],
                       bn=True, act="relu")
        x = conv_layer(y, params[f"blk{b}_w2"], stride=1, pad=1, pad_mode="reflect",
                       gamma=params[f"blk{b}_g2"], beta=params[f"blk{b}_be2"],
                       bn=True, act=None, residual=x)        # out = x + conv_block(x)

    # upsampling: nearest x2 fused into the conv's im2col, + BN + ReLU
    for i in range(2):
        x = conv_layer(x, params[f"up{i}_w"], upsample=True,
                       gamma=params[f"up{i}_g"], beta=params[f"up{i}_be"],
                       bn=True, act="relu")

    # final: ReflectionPad(3) + Conv7x7 (bias) + tanh, with /2 + 0.5 fused in the kernel
    albedo = conv_layer(x, params["final_w"], stride=1, pad=3, pad_mode="reflect",
                        bias=params["final_b"], bn=False, act="tanh01")

    return jnp.transpose(albedo, (0, 3, 1, 2))  # back to NCHW


if __name__ == "__main__":
    key = jax.random.PRNGKey(0)
    kx, kp = jax.random.split(key)

    N, C, H, W = 2, 3, 16, 16          # small shapes (input_nc=3)
    ngf, n_blocks = 8, 2               # scaled-down ngf / n_blocks (same architecture)

    x = jax.random.normal(kx, (N, C, H, W), jnp.float32)
    params = init_params(kp, input_nc=C, output_nc=3, ngf=ngf, n_blocks=n_blocks)

    fwd = jax.jit(functools.partial(albedo_resnet_generator, ngf=ngf, n_blocks=n_blocks))
    out = fwd(x, params)
    jax.block_until_ready(out)

    assert out.shape == (N, 3, H, W), out.shape
    assert bool(jnp.all(jnp.isfinite(out)))
    print("KERNEL_OK")
</pallas_src>

<mosaic_0001>
module attributes {stable_mosaic.version = 11 : i64} {
  func.func @_matmul_stats_kernel(%arg0: i32, %arg1: memref<512x256xbf16, #tpu.memory_space<vmem>>, %arg2: memref<256x128xbf16, #tpu.memory_space<vmem>>, %arg3: memref<512x128xf32, #tpu.memory_space<vmem>>, %arg4: memref<8x128xf32, #tpu.memory_space<vmem>>) attributes {dimension_semantics = [#tpu.dimension_semantics<arbitrary>], iteration_bounds = array<i64: 1>, scalar_prefetch = 0 : i64, scratch_operands = 0 : i64, tpu.core_type = #tpu.core_type<tc>, window_params = [{transform_indices = @transform_0, window_bounds = array<i64: 512, 256>}, {pipeline_mode = #tpu.pipeline_mode<synchronous>, transform_indices = @transform_1, window_bounds = array<i64: 256, 128>}, {transform_indices = @transform_2, window_bounds = array<i64: 512, 128>}, {pipeline_mode = #tpu.pipeline_mode<synchronous>, transform_indices = @transform_3, window_bounds = array<i64: 8, 128>}]} {
    %c0 = arith.constant 0 : index
    %c0_0 = arith.constant 0 : index
    %0 = vector.load %arg1[%c0, %c0_0] : memref<512x256xbf16, #tpu.memory_space<vmem>>, vector<512x256xbf16>
    %c0_1 = arith.constant 0 : index
    %c0_2 = arith.constant 0 : index
    %1 = vector.load %arg2[%c0_1, %c0_2] : memref<256x128xbf16, #tpu.memory_space<vmem>>, vector<256x128xbf16>
    %cst = arith.constant dense<0.000000e+00> : vector<512x128xf32>
    %2 = tpu.matmul %0, %1, %cst {dimension_numbers = #tpu.dot_dimension_numbers<[1], [0], [0], [1], [0, 0, 1, 1], [], []>} : vector<512x256xbf16>, vector<256x128xbf16>, vector<512x128xf32> -> vector<512x128xf32>
    %c0_3 = arith.constant 0 : index
    %c0_4 = arith.constant 0 : index
    %3 = vector.load %arg3[%c0_3, %c0_4] : memref<512x128xf32, #tpu.memory_space<vmem>>, vector<512x128xf32>
    tpu.vector_store %arg3[%c0_3, %c0_4], %2 {strides = array<i32>} : memref<512x128xf32, #tpu.memory_space<vmem>>, vector<512x128xf32>,
    %c0_i32 = arith.constant 0 : i32
    %4 = arith.cmpi eq, %arg0, %c0_i32 : i32
    %5 = arith.extui %4 : i1 to i32
    %c0_i32_5 = arith.constant 0 : i32
    %6 = arith.cmpi ne, %5, %c0_i32_5 : i32
    scf.if %6 {
      %cst_13 = arith.constant 0.000000e+00 : f32
      %17 = vector.broadcast %cst_13 : f32 to vector<8x128xf32>
      %c0_14 = arith.constant 0 : index
      %c0_15 = arith.constant 0 : index
      %18 = vector.load %arg4[%c0_14, %c0_15] : memref<8x128xf32, #tpu.memory_space<vmem>>, vector<8x128xf32>
      tpu.vector_store %arg4[%c0_14, %c0_15], %17 {strides = array<i32>} : memref<8x128xf32, #tpu.memory_space<vmem>>, vector<8x128xf32>,
    } else {
    }
    %cst_6 = arith.constant dense<0.000000e+00> : vector<128xf32>
    %7 = vector.multi_reduction <add>, %2, %cst_6 [0] : vector<512x128xf32> to vector<128xf32>
    %8 = vector.shape_cast %7 : vector<128xf32> to vector<1x128xf32>
    %9 = arith.mulf %2, %2 : vector<512x128xf32>
    %cst_7 = arith.constant dense<0.000000e+00> : vector<128xf32>
    %10 = vector.multi_reduction <add>, %9, %cst_7 [0] : vector<512x128xf32> to vector<128xf32>
    %11 = vector.shape_cast %10 : vector<128xf32> to vector<1x128xf32>
    %cst_8 = arith.constant 0.000000e+00 : f32
    %12 = vector.broadcast %cst_8 : f32 to vector<6x128xf32>
    %13 = tpu.concatenate %8, %11, %12 in 0 : vector<1x128xf32>, vector<1x128xf32>, vector<6x128xf32> -> vector<8x128xf32>
    %c0_9 = arith.constant 0 : index
    %c0_10 = arith.constant 0 : index
    %14 = vector.load %arg4[%c0_9, %c0_10] : memref<8x128xf32, #tpu.memory_space<vmem>>, vector<8x128xf32>
    %15 = arith.addf %14, %13 : vector<8x128xf32>
    %c0_11 = arith.constant 0 : index
    %c0_12 = arith.constant 0 : index
    %16 = vector.load %arg4[%c0_11, %c0_12] : memref<8x128xf32, #tpu.memory_space<vmem>>, vector<8x128xf32>
    tpu.vector_store %arg4[%c0_11, %c0_12], %15 {strides = array<i32>} : memref<8x128xf32, #tpu.memory_space<vmem>>, vector<8x128xf32>,
    return
  }
  func.func @transform_0(%arg0: i32) -> (i32, i32) {
    %c0_i32 = arith.constant 0 : i32
    %c0_i32_0 = arith.constant 0 : i32
    return %arg0, %c0_i32 : i32, i32
  }
  func.func @transform_1(%arg0: i32) -> (i32, i32) {
    %c0_i32 = arith.constant 0 : i32
    %c0_i32_0 = arith.constant 0 : i32
    %c0_i32_1 = arith.constant 0 : i32
    return %c0_i32, %c0_i32_0 : i32, i32
  }
  func.func @transform_2(%arg0: i32) -> (i32, i32) {
    %c0_i32 = arith.constant 0 : i32
    %c0_i32_0 = arith.constant 0 : i32
    return %arg0, %c0_i32 : i32, i32
  }
  func.func @transform_3(%arg0: i32) -> (i32, i32) {
    %c0_i32 = arith.constant 0 : i32
    %c0_i32_0 = arith.constant 0 : i32
    %c0_i32_1 = arith.constant 0 : i32
    return %c0_i32, %c0_i32_0 : i32, i32
  }
}

module attributes {stable_mosaic.version = 11 : i64} {
  func.func @kernel(%arg0: i32, %arg1: memref<512x128xf32, #tpu.memory_space<vmem>>, %arg2: memref<1x128xf32, #tpu.memory_space<vmem>>, %arg3: memref<1x128xf32, #tpu.memory_space<vmem>>, %arg4: memref<512x128xf32, #tpu.memory_space<vmem>>) attributes {dimension_semantics = [#tpu.dimension_semantics<parallel>], iteration_bounds = array<i64: 1>, scalar_prefetch = 0 : i64, scratch_operands = 0 : i64, tpu.core_type = #tpu.core_type<tc>, window_params = [{transform_indices = @transform_0, window_bounds = array<i64: 512, 128>}, {pipeline_mode = #tpu.pipeline_mode<synchronous>, transform_indices = @transform_1, window_bounds = array<i64: 1, 128>}, {pipeline_mode = #tpu.pipeline_mode<synchronous>, transform_indices = @transform_2, window_bounds = array<i64: 1, 128>}, {transform_indices = @transform_3, window_bounds = array<i64: 512, 128>}]} {
    %c0 = arith.constant 0 : index
    %c0_0 = arith.constant 0 : index
    %0 = vector.load %arg1[%c0, %c0_0] : memref<512x128xf32, #tpu.memory_space<vmem>>, vector<512x128xf32>
    %c0_1 = arith.constant 0 : index
    %c0_2 = arith.constant 0 : index
    %1 = vector.load %arg2[%c0_1, %c0_2] : memref<1x128xf32, #tpu.memory_space<vmem>>, vector<1x128xf32>
    %2 = vector.broadcast %1 : vector<1x128xf32> to vector<512x128xf32>
    %3 = arith.mulf %0, %2 : vector<512x128xf32>
    %c0_3 = arith.constant 0 : index
    %c0_4 = arith.constant 0 : index
    %4 = vector.load %arg3[%c0_3, %c0_4] : memref<1x128xf32, #tpu.memory_space<vmem>>, vector<1x128xf32>
    %5 = vector.broadcast %4 : vector<1x128xf32> to vector<512x128xf32>
    %6 = arith.addf %3, %5 : vector<512x128xf32>
    %cst = arith.constant 0.000000e+00 : f32
    %7 = vector.broadcast %cst : f32 to vector<512x128xf32>
    %8 = arith.maximumf %6, %7 : vector<512x128xf32>
    %c0_5 = arith.constant 0 : index
    %c0_6 = arith.constant 0 : index
    %9 = vector.load %arg4[%c0_5, %c0_6] : memref<512x128xf32, #tpu.memory_space<vmem>>, vector<512x128xf32>
    tpu.vector_store %arg4[%c0_5, %c0_6], %8 {strides = array<i32>} : memref<512x128xf32, #tpu.memory_space<vmem>>, vector<512x128xf32>,
    return
  }
  func.func @transform_0(%arg0: i32) -> (i32, i32) {
    %c0_i32 = arith.constant 0 : i32
    %c0_i32_0 = arith.constant 0 : i32
    return %arg0, %c0_i32 : i32, i32
  }
  func.func @transform_1(%arg0: i32) -> (i32, i32) {
    %c0_i32 = arith.constant 0 : i32
    %c0_i32_0 = arith.constant 0 : i32
    %c0_i32_1 = arith.constant 0 : i32
    return %c0_i32, %c0_i32_0 : i32, i32
  }
  func.func @transform_2(%arg0: i32) -> (i32, i32) {
    %c0_i32 = arith.constant 0 : i32
    %c0_i32_0 = arith.constant 0 : i32
    %c0_i32_1 = arith.constant 0 : i32
    return %c0_i32, %c0_i32_0 : i32, i32
  }
  func.func @transform_3(%arg0: i32) -> (i32, i32) {
    %c0_i32 = arith.constant 0 : i32
    %c0_i32_0 = arith.constant 0 : i32
    return %arg0, %c0_i32 : i32, i32
  }
}

module attributes {stable_mosaic.version = 11 : i64} {
  func.func @_matmul_stats_kernel(%arg0: i32, %arg1: memref<128x128xbf16, #tpu.memory_space<vmem>>, %arg2: memref<128x128xbf16, #tpu.memory_space<vmem>>, %arg3: memref<128x128xf32, #tpu.memory_space<vmem>>, %arg4: memref<8x128xf32, #tpu.memory_space<vmem>>) attributes {dimension_semantics = [#tpu.dimension_semantics<arbitrary>], iteration_bounds = array<i64: 1>, scalar_prefetch = 0 : i64, scratch_operands = 0 : i64, tpu.core_type = #tpu.core_type<tc>, window_params = [{transform_indices = @transform_0, window_bounds = array<i64: 128, 128>}, {pipeline_mode = #tpu.pipeline_mode<synchronous>, transform_indices = @transform_1, window_bounds = array<i64: 128, 128>}, {transform_indices = @transform_2, window_bounds = array<i64: 128, 128>}, {pipeline_mode = #tpu.pipeline_mode<synchronous>, transform_indices = @transform_3, window_bounds = array<i64: 8, 128>}]} {
    %c0 = arith.constant 0 : index
    %c0_0 = arith.constant 0 : index
    %0 = vector.load %arg1[%c0, %c0_0] : memref<128x128xbf16, #tpu.memory_space<vmem>>, vector<128x128xbf16>
    %c0_1 = arith.constant 0 : index
    %c0_2 = arith.constant 0 : index
    %1 = vector.load %arg2[%c0_1, %c0_2] : memref<128x128xbf16, #tpu.memory_space<vmem>>, vector<128x128xbf16>
    %cst = arith.constant dense<0.000000e+00> : vector<128x128xf32>
    %2 = tpu.matmul %0, %1, %cst {dimension_numbers = #tpu.dot_dimension_numbers<[1], [0], [0], [1], [0, 0, 1, 1], [], []>} : vector<128x128xbf16>, vector<128x128xbf16>, vector<128x128xf32> -> vector<128x128xf32>
    %c0_3 = arith.constant 0 : index
    %c0_4 = arith.constant 0 : index
    %3 = vector.load %arg3[%c0_3, %c0_4] : memref<128x128xf32, #tpu.memory_space<vmem>>, vector<128x128xf32>
    tpu.vector_store %arg3[%c0_3, %c0_4], %2 {strides = array<i32>} : memref<128x128xf32, #tpu.memory_space<vmem>>, vector<128x128xf32>,
    %c0_i32 = arith.constant 0 : i32
    %4 = arith.cmpi eq, %arg0, %c0_i32 : i32
    %5 = arith.extui %4 : i1 to i32
    %c0_i32_5 = arith.constant 0 : i32
    %6 = arith.cmpi ne, %5, %c0_i32_5 : i32
    scf.if %6 {
      %cst_13 = arith.constant 0.000000e+00 : f32
      %17 = vector.broadcast %cst_13 : f32 to vector<8x128xf32>
      %c0_14 = arith.constant 0 : index
      %c0_15 = arith.constant 0 : index
      %18 = vector.load %arg4[%c0_14, %c0_15] : memref<8x128xf32, #tpu.memory_space<vmem>>, vector<8x128xf32>
      tpu.vector_store %arg4[%c0_14, %c0_15], %17 {strides = array<i32>} : memref<8x128xf32, #tpu.memory_space<vmem>>, vector<8x128xf32>,
    } else {
    }
    %cst_6 = arith.constant dense<0.000000e+00> : vector<128xf32>
    %7 = vector.multi_reduction <add>, %2, %cst_6 [0] : vector<128x128xf32> to vector<128xf32>
    %8 = vector.shape_cast %7 : vector<128xf32> to vector<1x128xf32>
    %9 = arith.mulf %2, %2 : vector<128x128xf32>
    %cst_7 = arith.constant dense<0.000000e+00> : vector<128xf32>
    %10 = vector.multi_reduction <add>, %9, %cst_7 [0] : vector<128x128xf32> to vector<128xf32>
    %11 = vector.shape_cast %10 : vector<128xf32> to vector<1x128xf32>
    %cst_8 = arith.constant 0.000000e+00 : f32
    %12 = vector.broadcast %cst_8 : f32 to vector<6x128xf32>
    %13 = tpu.concatenate %8, %11, %12 in 0 : vector<1x128xf32>, vector<1x128xf32>, vector<6x128xf32> -> vector<8x128xf32>
    %c0_9 = arith.constant 0 : index
    %c0_10 = arith.constant 0 : index
    %14 = vector.load %arg4[%c0_9, %c0_10] : memref<8x128xf32, #tpu.memory_space<vmem>>, vector<8x128xf32>
    %15 = arith.addf %14, %13 : vector<8x128xf32>
    %c0_11 = arith.constant 0 : index
    %c0_12 = arith.constant 0 : index
    %16 = vector.load %arg4[%c0_11, %c0_12] : memref<8x128xf32, #tpu.memory_space<vmem>>, vector<8x128xf32>
    tpu.vector_store %arg4[%c0_11, %c0_12], %15 {strides = array<i32>} : memref<8x128xf32, #tpu.memory_space<vmem>>, vector<8x128xf32>,
    return
  }
  func.func @transform_0(%arg0: i32) -> (i32, i32) {
    %c0_i32 = arith.constant 0 : i32
    %c0_i32_0 = arith.constant 0 : i32
    return %arg0, %c0_i32 : i32, i32
  }
  func.func @transform_1(%arg0: i32) -> (i32, i32) {
    %c0_i32 = arith.constant 0 : i32
    %c0_i32_0 = arith.constant 0 : i32
    %c0_i32_1 = arith.constant 0 : i32
    return %c0_i32, %c0_i32_0 : i32, i32
  }
  func.func @transform_2(%arg0: i32) -> (i32, i32) {
    %c0_i32 = arith.constant 0 : i32
    %c0_i32_0 = arith.constant 0 : i32
    return %arg0, %c0_i32 : i32, i32
  }
  func.func @transform_3(%arg0: i32) -> (i32, i32) {
    %c0_i32 = arith.constant 0 : i32
    %c0_i32_0 = arith.constant 0 : i32
    %c0_i32_1 = arith.constant 0 : i32
    return %c0_i32, %c0_i32_0 : i32, i32
  }
}

module attributes {stable_mosaic.version = 11 : i64} {
  func.func @kernel(%arg0: i32, %arg1: memref<128x128xf32, #tpu.memory_space<vmem>>, %arg2: memref<1x128xf32, #tpu.memory_space<vmem>>, %arg3: memref<1x128xf32, #tpu.memory_space<vmem>>, %arg4: memref<128x128xf32, #tpu.memory_space<vmem>>) attributes {dimension_semantics = [#tpu.dimension_semantics<parallel>], iteration_bounds = array<i64: 1>, scalar_prefetch = 0 : i64, scratch_operands = 0 : i64, tpu.core_type = #tpu.core_type<tc>, window_params = [{transform_indices = @transform_0, window_bounds = array<i64: 128, 128>}, {pipeline_mode = #tpu.pipeline_mode<synchronous>, transform_indices = @transform_1, window_bounds = array<i64: 1, 128>}, {pipeline_mode = #tpu.pipeline_mode<synchronous>, transform_indices = @transform_2, window_bounds = array<i64: 1, 128>}, {transform_indices = @transform_3, window_bounds = array<i64: 128, 128>}]} {
    %c0 = arith.constant 0 : index
    %c0_0 = arith.constant 0 : index
    %0 = vector.load %arg1[%c0, %c0_0] : memref<128x128xf32, #tpu.memory_space<vmem>>, vector<128x128xf32>
    %c0_1 = arith.constant 0 : index
    %c0_2 = arith.constant 0 : index
    %1 = vector.load %arg2[%c0_1, %c0_2] : memref<1x128xf32, #tpu.memory_space<vmem>>, vector<1x128xf32>
    %2 = vector.broadcast %1 : vector<1x128xf32> to vector<128x128xf32>
    %3 = arith.mulf %0, %2 : vector<128x128xf32>
    %c0_3 = arith.constant 0 : index
    %c0_4 = arith.constant 0 : index
    %4 = vector.load %arg3[%c0_3, %c0_4] : memref<1x128xf32, #tpu.memory_space<vmem>>, vector<1x128xf32>
    %5 = vector.broadcast %4 : vector<1x128xf32> to vector<128x128xf32>
    %6 = arith.addf %3, %5 : vector<128x128xf32>
    %cst = arith.constant 0.000000e+00 : f32
    %7 = vector.broadcast %cst : f32 to vector<128x128xf32>
    %8 = arith.maximumf %6, %7 : vector<128x128xf32>
    %c0_5 = arith.constant 0 : index
    %c0_6 = arith.constant 0 : index
    %9 = vector.load %arg4[%c0_5, %c0_6] : memref<128x128xf32, #tpu.memory_space<vmem>>, vector<128x128xf32>
    tpu.vector_store %arg4[%c0_5, %c0_6], %8 {strides = array<i32>} : memref<128x128xf32, #tpu.memory_space<vmem>>, vector<128x128xf32>,
    return
  }
  func.func @transform_0(%arg0: i32) -> (i32, i32) {
    %c0_i32 = arith.constant 0 : i32
    %c0_i32_0 = arith.constant 0 : i32
    return %arg0, %c0_i32 : i32, i32
  }
  func.func @transform_1(%arg0: i32) -> (i32, i32) {
    %c0_i32 = arith.constant 0 : i32
    %c0_i32_0 = arith.constant 0 : i32
    %c0_i32_1 = arith.constant 0 : i32
    return %c0_i32, %c0_i32_0 : i32, i32
  }
  func.func @transform_2(%arg0: i32) -> (i32, i32) {
    %c0_i32 = arith.constant 0 : i32
    %c0_i32_0 = arith.constant 0 : i32
    %c0_i32_1 = arith.constant 0 : i32
    return %c0_i32, %c0_i32_0 : i32, i32
  }
  func.func @transform_3(%arg0: i32) -> (i32, i32) {
    %c0_i32 = arith.constant 0 : i32
    %c0_i32_0 = arith.constant 0 : i32
    return %arg0, %c0_i32 : i32, i32
  }
}

module attributes {stable_mosaic.version = 11 : i64} {
  func.func @_matmul_stats_kernel(%arg0: i32, %arg1: memref<32x256xbf16, #tpu.memory_space<vmem>>, %arg2: memref<256x128xbf16, #tpu.memory_space<vmem>>, %arg3: memref<32x128xf32, #tpu.memory_space<vmem>>, %arg4: memref<8x128xf32, #tpu.memory_space<vmem>>) attributes {dimension_semantics = [#tpu.dimension_semantics<arbitrary>], iteration_bounds = array<i64: 1>, scalar_prefetch = 0 : i64, scratch_operands = 0 : i64, tpu.core_type = #tpu.core_type<tc>, window_params = [{transform_indices = @transform_0, window_bounds = array<i64: 32, 256>}, {pipeline_mode = #tpu.pipeline_mode<synchronous>, transform_indices = @transform_1, window_bounds = array<i64: 256, 128>}, {transform_indices = @transform_2, window_bounds = array<i64: 32, 128>}, {pipeline_mode = #tpu.pipeline_mode<synchronous>, transform_indices = @transform_3, window_bounds = array<i64: 8, 128>}]} {
    %c0 = arith.constant 0 : index
    %c0_0 = arith.constant 0 : index
    %0 = vector.load %arg1[%c0, %c0_0] : memref<32x256xbf16, #tpu.memory_space<vmem>>, vector<32x256xbf16>
    %c0_1 = arith.constant 0 : index
    %c0_2 = arith.constant 0 : index
    %1 = vector.load %arg2[%c0_1, %c0_2] : memref<256x128xbf16, #tpu.memory_space<vmem>>, vector<256x128xbf16>
    %cst = arith.constant dense<0.000000e+00> : vector<32x128xf32>
    %2 = tpu.matmul %0, %1, %cst {dimension_numbers = #tpu.dot_dimension_numbers<[1], [0], [0], [1], [0, 0, 1, 1], [], []>} : vector<32x256xbf16>, vector<256x128xbf16>, vector<32x128xf32> -> vector<32x128xf32>
    %c0_3 = arith.constant 0 : index
    %c0_4 = arith.constant 0 : index
    %3 = vector.load %arg3[%c0_3, %c0_4] : memref<32x128xf32, #tpu.memory_space<vmem>>, vector<32x128xf32>
    tpu.vector_store %arg3[%c0_3, %c0_4], %2 {strides = array<i32>} : memref<32x128xf32, #tpu.memory_space<vmem>>, vector<32x128xf32>,
    %c0_i32 = arith.constant 0 : i32
    %4 = arith.cmpi eq, %arg0, %c0_i32 : i32
    %5 = arith.extui %4 : i1 to i32
    %c0_i32_5 = arith.constant 0 : i32
    %6 = arith.cmpi ne, %5, %c0_i32_5 : i32
    scf.if %6 {
      %cst_13 = arith.constant 0.000000e+00 : f32
      %17 = vector.broadcast %cst_13 : f32 to vector<8x128xf32>
      %c0_14 = arith.constant 0 : index
      %c0_15 = arith.constant 0 : index
      %18 = vector.load %arg4[%c0_14, %c0_15] : memref<8x128xf32, #tpu.memory_space<vmem>>, vector<8x128xf32>
      tpu.vector_store %arg4[%c0_14, %c0_15], %17 {strides = array<i32>} : memref<8x128xf32, #tpu.memory_space<vmem>>, vector<8x128xf32>,
    } else {
    }
    %cst_6 = arith.constant dense<0.000000e+00> : vector<128xf32>
    %7 = vector.multi_reduction <add>, %2, %cst_6 [0] : vector<32x128xf32> to vector<128xf32>
    %8 = vector.shape_cast %7 : vector<128xf32> to vector<1x128xf32>
    %9 = arith.mulf %2, %2 : vector<32x128xf32>
    %cst_7 = arith.constant dense<0.000000e+00> : vector<128xf32>
    %10 = vector.multi_reduction <add>, %9, %cst_7 [0] : vector<32x128xf32> to vector<128xf32>
    %11 = vector.shape_cast %10 : vector<128xf32> to vector<1x128xf32>
    %cst_8 = arith.constant 0.000000e+00 : f32
    %12 = vector.broadcast %cst_8 : f32 to vector<6x128xf32>
    %13 = tpu.concatenate %8, %11, %12 in 0 : vector<1x128xf32>, vector<1x128xf32>, vector<6x128xf32> -> vector<8x128xf32>
    %c0_9 = arith.constant 0 : index
    %c0_10 = arith.constant 0 : index
    %14 = vector.load %arg4[%c0_9, %c0_10] : memref<8x128xf32, #tpu.memory_space<vmem>>, vector<8x128xf32>
    %15 = arith.addf %14, %13 : vector<8x128xf32>
    %c0_11 = arith.constant 0 : index
    %c0_12 = arith.constant 0 : index
    %16 = vector.load %arg4[%c0_11, %c0_12] : memref<8x128xf32, #tpu.memory_space<vmem>>, vector<8x128xf32>
    tpu.vector_store %arg4[%c0_11, %c0_12], %15 {strides = array<i32>} : memref<8x128xf32, #tpu.memory_space<vmem>>, vector<8x128xf32>,
    return
  }
  func.func @transform_0(%arg0: i32) -> (i32, i32) {
    %c0_i32 = arith.constant 0 : i32
    %c0_i32_0 = arith.constant 0 : i32
    return %arg0, %c0_i32 : i32, i32
  }
  func.func @transform_1(%arg0: i32) -> (i32, i32) {
    %c0_i32 = arith.constant 0 : i32
    %c0_i32_0 = arith.constant 0 : i32
    %c0_i32_1 = arith.constant 0 : i32
    return %c0_i32, %c0_i32_0 : i32, i32
  }
  func.func @transform_2(%arg0: i32) -> (i32, i32) {
    %c0_i32 = arith.constant 0 : i32
    %c0_i32_0 = arith.constant 0 : i32
    return %arg0, %c0_i32 : i32, i32
  }
  func.func @transform_3(%arg0: i32) -> (i32, i32) {
    %c0_i32 = arith.constant 0 : i32
    %c0_i32_0 = arith.constant 0 : i32
    %c0_i32_1 = arith.constant 0 : i32
    return %c0_i32, %c0_i32_0 : i32, i32
  }
}

module attributes {stable_mosaic.version = 11 : i64} {
  func.func @kernel(%arg0: i32, %arg1: memref<32x128xf32, #tpu.memory_space<vmem>>, %arg2: memref<1x128xf32, #tpu.memory_space<vmem>>, %arg3: memref<1x128xf32, #tpu.memory_space<vmem>>, %arg4: memref<32x128xf32, #tpu.memory_space<vmem>>) attributes {dimension_semantics = [#tpu.dimension_semantics<parallel>], iteration_bounds = array<i64: 1>, scalar_prefetch = 0 : i64, scratch_operands = 0 : i64, tpu.core_type = #tpu.core_type<tc>, window_params = [{transform_indices = @transform_0, window_bounds = array<i64: 32, 128>}, {pipeline_mode = #tpu.pipeline_mode<synchronous>, transform_indices = @transform_1, window_bounds = array<i64: 1, 128>}, {pipeline_mode = #tpu.pipeline_mode<synchronous>, transform_indices = @transform_2, window_bounds = array<i64: 1, 128>}, {transform_indices = @transform_3, window_bounds = array<i64: 32, 128>}]} {
    %c0 = arith.constant 0 : index
    %c0_0 = arith.constant 0 : index
    %0 = vector.load %arg1[%c0, %c0_0] : memref<32x128xf32, #tpu.memory_space<vmem>>, vector<32x128xf32>
    %c0_1 = arith.constant 0 : index
    %c0_2 = arith.constant 0 : index
    %1 = vector.load %arg2[%c0_1, %c0_2] : memref<1x128xf32, #tpu.memory_space<vmem>>, vector<1x128xf32>
    %2 = vector.broadcast %1 : vector<1x128xf32> to vector<32x128xf32>
    %3 = arith.mulf %0, %2 : vector<32x128xf32>
    %c0_3 = arith.constant 0 : index
    %c0_4 = arith.constant 0 : index
    %4 = vector.load %arg3[%c0_3, %c0_4] : memref<1x128xf32, #tpu.memory_space<vmem>>, vector<1x128xf32>
    %5 = vector.broadcast %4 : vector<1x128xf32> to vector<32x128xf32>
    %6 = arith.addf %3, %5 : vector<32x128xf32>
    %cst = arith.constant 0.000000e+00 : f32
    %7 = vector.broadcast %cst : f32 to vector<32x128xf32>
    %8 = arith.maximumf %6, %7 : vector<32x128xf32>
    %c0_5 = arith.constant 0 : index
    %c0_6 = arith.constant 0 : index
    %9 = vector.load %arg4[%c0_5, %c0_6] : memref<32x128xf32, #tpu.memory_space<vmem>>, vector<32x128xf32>
    tpu.vector_store %arg4[%c0_5, %c0_6], %8 {strides = array<i32>} : memref<32x128xf32, #tpu.memory_space<vmem>>, vector<32x128xf32>,
    return
  }
  func.func @transform_0(%arg0: i32) -> (i32, i32) {
    %c0_i32 = arith.constant 0 : i32
    %c0_i32_0 = arith.constant 0 : i32
    return %arg0, %c0_i32 : i32, i32
  }
  func.func @transform_1(%arg0: i32) -> (i32, i32) {
    %c0_i32 = arith.constant 0 : i32
    %c0_i32_0 = arith.constant 0 : i32
    %c0_i32_1 = arith.constant 0 : i32
    return %c0_i32, %c0_i32_0 : i32, i32
  }
  func.func @transform_2(%arg0: i32) -> (i32, i32) {
    %c0_i32 = arith.constant 0 : i32
    %c0_i32_0 = arith.constant 0 : i32
    %c0_i32_1 = arith.constant 0 : i32
    return %c0_i32, %c0_i32_0 : i32, i32
  }
  func.func @transform_3(%arg0: i32) -> (i32, i32) {
    %c0_i32 = arith.constant 0 : i32
    %c0_i32_0 = arith.constant 0 : i32
    return %arg0, %c0_i32 : i32, i32
  }
}

module attributes {stable_mosaic.version = 11 : i64} {
  func.func @_matmul_stats_kernel(%arg0: i32, %arg1: memref<32x384xbf16, #tpu.memory_space<vmem>>, %arg2: memref<384x128xbf16, #tpu.memory_space<vmem>>, %arg3: memref<32x128xf32, #tpu.memory_space<vmem>>, %arg4: memref<8x128xf32, #tpu.memory_space<vmem>>) attributes {dimension_semantics = [#tpu.dimension_semantics<arbitrary>], iteration_bounds = array<i64: 1>, scalar_prefetch = 0 : i64, scratch_operands = 0 : i64, tpu.core_type = #tpu.core_type<tc>, window_params = [{transform_indices = @transform_0, window_bounds = array<i64: 32, 384>}, {pipeline_mode = #tpu.pipeline_mode<synchronous>, transform_indices = @transform_1, window_bounds = array<i64: 384, 128>}, {transform_indices = @transform_2, window_bounds = array<i64: 32, 128>}, {pipeline_mode = #tpu.pipeline_mode<synchronous>, transform_indices = @transform_3, window_bounds = array<i64: 8, 128>}]} {
    %c0 = arith.constant 0 : index
    %c0_0 = arith.constant 0 : index
    %0 = vector.load %arg1[%c0, %c0_0] : memref<32x384xbf16, #tpu.memory_space<vmem>>, vector<32x384xbf16>
    %c0_1 = arith.constant 0 : index
    %c0_2 = arith.constant 0 : index
    %1 = vector.load %arg2[%c0_1, %c0_2] : memref<384x128xbf16, #tpu.memory_space<vmem>>, vector<384x128xbf16>
    %cst = arith.constant dense<0.000000e+00> : vector<32x128xf32>
    %2 = tpu.matmul %0, %1, %cst {dimension_numbers = #tpu.dot_dimension_numbers<[1], [0], [0], [1], [0, 0, 1, 1], [], []>} : vector<32x384xbf16>, vector<384x128xbf16>, vector<32x128xf32> -> vector<32x128xf32>
    %c0_3 = arith.constant 0 : index
    %c0_4 = arith.constant 0 : index
    %3 = vector.load %arg3[%c0_3, %c0_4] : memref<32x128xf32, #tpu.memory_space<vmem>>, vector<32x128xf32>
    tpu.vector_store %arg3[%c0_3, %c0_4], %2 {strides = array<i32>} : memref<32x128xf32, #tpu.memory_space<vmem>>, vector<32x128xf32>,
    %c0_i32 = arith.constant 0 : i32
    %4 = arith.cmpi eq, %arg0, %c0_i32 : i32
    %5 = arith.extui %4 : i1 to i32
    %c0_i32_5 = arith.constant 0 : i32
    %6 = arith.cmpi ne, %5, %c0_i32_5 : i32
    scf.if %6 {
      %cst_13 = arith.constant 0.000000e+00 : f32
      %17 = vector.broadcast %cst_13 : f32 to vector<8x128xf32>
      %c0_14 = arith.constant 0 : index
      %c0_15 = arith.constant 0 : index
      %18 = vector.load %arg4[%c0_14, %c0_15] : memref<8x128xf32, #tpu.memory_space<vmem>>, vector<8x128xf32>
      tpu.vector_store %arg4[%c0_14, %c0_15], %17 {strides = array<i32>} : memref<8x128xf32, #tpu.memory_space<vmem>>, vector<8x128xf32>,
    } else {
    }
    %cst_6 = arith.constant dense<0.000000e+00> : vector<128xf32>
    %7 = vector.multi_reduction <add>, %2, %cst_6 [0] : vector<32x128xf32> to vector<128xf32>
    %8 = vector.shape_cast %7 : vector<128xf32> to vector<1x128xf32>
    %9 = arith.mulf %2, %2 : vector<32x128xf32>
    %cst_7 = arith.constant dense<0.000000e+00> : vector<128xf32>
    %10 = vector.multi_reduction <add>, %9, %cst_7 [0] : vector<32x128xf32> to vector<128xf32>
    %11 = vector.shape_cast %10 : vector<128xf32> to vector<1x128xf32>
    %cst_8 = arith.constant 0.000000e+00 : f32
    %12 = vector.broadcast %cst_8 : f32 to vector<6x128xf32>
    %13 = tpu.concatenate %8, %11, %12 in 0 : vector<1x128xf32>, vector<1x128xf32>, vector<6x128xf32> -> vector<8x128xf32>
    %c0_9 = arith.constant 0 : index
    %c0_10 = arith.constant 0 : index
    %14 = vector.load %arg4[%c0_9, %c0_10] : memref<8x128xf32, #tpu.memory_space<vmem>>, vector<8x128xf32>
    %15 = arith.addf %14, %13 : vector<8x128xf32>
    %c0_11 = arith.constant 0 : index
    %c0_12 = arith.constant 0 : index
    %16 = vector.load %arg4[%c0_11, %c0_12] : memref<8x128xf32, #tpu.memory_space<vmem>>, vector<8x128xf32>
    tpu.vector_store %arg4[%c0_11, %c0_12], %15 {strides = array<i32>} : memref<8x128xf32, #tpu.memory_space<vmem>>, vector<8x128xf32>,
    return
  }
  func.func @transform_0(%arg0: i32) -> (i32, i32) {
    %c0_i32 = arith.constant 0 : i32
    %c0_i32_0 = arith.constant 0 : i32
    return %arg0, %c0_i32 : i32, i32
  }
  func.func @transform_1(%arg0: i32) -> (i32, i32) {
    %c0_i32 = arith.constant 0 : i32
    %c0_i32_0 = arith.constant 0 : i32
    %c0_i32_1 = arith.constant 0 : i32
    return %c0_i32, %c0_i32_0 : i32, i32
  }
  func.func @transform_2(%arg0: i32) -> (i32, i32) {
    %c0_i32 = arith.constant 0 : i32
    %c0_i32_0 = arith.constant 0 : i32
    return %arg0, %c0_i32 : i32, i32
  }
  func.func @transform_3(%arg0: i32) -> (i32, i32) {
    %c0_i32 = arith.constant 0 : i32
    %c0_i32_0 = arith.constant 0 : i32
    %c0_i32_1 = arith.constant 0 : i32
    return %c0_i32, %c0_i32_0 : i32, i32
  }
}

module attributes {stable_mosaic.version = 11 : i64} {
  func.func @kernel(%arg0: i32, %arg1: memref<32x128xf32, #tpu.memory_space<vmem>>, %arg2: memref<1x128xf32, #tpu.memory_space<vmem>>, %arg3: memref<1x128xf32, #tpu.memory_space<vmem>>, %arg4: memref<32x128xf32, #tpu.memory_space<vmem>>, %arg5: memref<32x128xf32, #tpu.memory_space<vmem>>) attributes {dimension_semantics = [#tpu.dimension_semantics<parallel>], iteration_bounds = array<i64: 1>, scalar_prefetch = 0 : i64, scratch_operands = 0 : i64, tpu.core_type = #tpu.core_type<tc>, window_params = [{transform_indices = @transform_0, window_bounds = array<i64: 32, 128>}, {pipeline_mode = #tpu.pipeline_mode<synchronous>, transform_indices = @transform_1, window_bounds = array<i64: 1, 128>}, {pipeline_mode = #tpu.pipeline_mode<synchronous>, transform_indices = @transform_2, window_bounds = array<i64: 1, 128>}, {transform_indices = @transform_3, window_bounds = array<i64: 32, 128>}, {transform_indices = @transform_4, window_bounds = array<i64: 32, 128>}]} {
    %c0 = arith.constant 0 : index
    %c0_0 = arith.constant 0 : index
    %0 = vector.load %arg1[%c0, %c0_0] : memref<32x128xf32, #tpu.memory_space<vmem>>, vector<32x128xf32>
    %c0_1 = arith.constant 0 : index
    %c0_2 = arith.constant 0 : index
    %1 = vector.load %arg2[%c0_1, %c0_2] : memref<1x128xf32, #tpu.memory_space<vmem>>, vector<1x128xf32>
    %2 = vector.broadcast %1 : vector<1x128xf32> to vector<32x128xf32>
    %3 = arith.mulf %0, %2 : vector<32x128xf32>
    %c0_3 = arith.constant 0 : index
    %c0_4 = arith.constant 0 : index
    %4 = vector.load %arg3[%c0_3, %c0_4] : memref<1x128xf32, #tpu.memory_space<vmem>>, vector<1x128xf32>
    %5 = vector.broadcast %4 : vector<1x128xf32> to vector<32x128xf32>
    %6 = arith.addf %3, %5 : vector<32x128xf32>
    %c0_5 = arith.constant 0 : index
    %c0_6 = arith.constant 0 : index
    %7 = vector.load %arg4[%c0_5, %c0_6] : memref<32x128xf32, #tpu.memory_space<vmem>>, vector<32x128xf32>
    %8 = arith.addf %6, %7 : vector<32x128xf32>
    %c0_7 = arith.constant 0 : index
    %c0_8 = arith.constant 0 : index
    %9 = vector.load %arg5[%c0_7, %c0_8] : memref<32x128xf32, #tpu.memory_space<vmem>>, vector<32x128xf32>
    tpu.vector_store %arg5[%c0_7, %c0_8], %8 {strides = array<i32>} : memref<32x128xf32, #tpu.memory_space<vmem>>, vector<32x128xf32>,
    return
  }
  func.func @transform_0(%arg0: i32) -> (i32, i32) {
    %c0_i32 = arith.constant 0 : i32
    %c0_i32_0 = arith.constant 0 : i32
    return %arg0, %c0_i32 : i32, i32
  }
  func.func @transform_1(%arg0: i32) -> (i32, i32) {
    %c0_i32 = arith.constant 0 : i32
    %c0_i32_0 = arith.constant 0 : i32
    %c0_i32_1 = arith.constant 0 : i32
    return %c0_i32, %c0_i32_0 : i32, i32
  }
  func.func @transform_2(%arg0: i32) -> (i32, i32) {
    %c0_i32 = arith.constant 0 : i32
    %c0_i32_0 = arith.constant 0 : i32
    %c0_i32_1 = arith.constant 0 : i32
    return %c0_i32, %c0_i32_0 : i32, i32
  }
  func.func @transform_3(%arg0: i32) -> (i32, i32) {
    %c0_i32 = arith.constant 0 : i32
    %c0_i32_0 = arith.constant 0 : i32
    return %arg0, %c0_i32 : i32, i32
  }
  func.func @transform_4(%arg0: i32) -> (i32, i32) {
    %c0_i32 = arith.constant 0 : i32
    %c0_i32_0 = arith.constant 0 : i32
    return %arg0, %c0_i32 : i32, i32
  }
}

module attributes {stable_mosaic.version = 11 : i64} {
  func.func @_matmul_stats_kernel(%arg0: i32, %arg1: memref<128x384xbf16, #tpu.memory_space<vmem>>, %arg2: memref<384x128xbf16, #tpu.memory_space<vmem>>, %arg3: memref<128x128xf32, #tpu.memory_space<vmem>>, %arg4: memref<8x128xf32, #tpu.memory_space<vmem>>) attributes {dimension_semantics = [#tpu.dimension_semantics<arbitrary>], iteration_bounds = array<i64: 1>, scalar_prefetch = 0 : i64, scratch_operands = 0 : i64, tpu.core_type = #tpu.core_type<tc>, window_params = [{transform_indices = @transform_0, window_bounds = array<i64: 128, 384>}, {pipeline_mode = #tpu.pipeline_mode<synchronous>, transform_indices = @transform_1, window_bounds = array<i64: 384, 128>}, {transform_indices = @transform_2, window_bounds = array<i64: 128, 128>}, {pipeline_mode = #tpu.pipeline_mode<synchronous>, transform_indices = @transform_3, window_bounds = array<i64: 8, 128>}]} {
    %c0 = arith.constant 0 : index
    %c0_0 = arith.constant 0 : index
    %0 = vector.load %arg1[%c0, %c0_0] : memref<128x384xbf16, #tpu.memory_space<vmem>>, vector<128x384xbf16>
    %c0_1 = arith.constant 0 : index
    %c0_2 = arith.constant 0 : index
    %1 = vector.load %arg2[%c0_1, %c0_2] : memref<384x128xbf16, #tpu.memory_space<vmem>>, vector<384x128xbf16>
    %cst = arith.constant dense<0.000000e+00> : vector<128x128xf32>
    %2 = tpu.matmul %0, %1, %cst {dimension_numbers = #tpu.dot_dimension_numbers<[1], [0], [0], [1], [0, 0, 1, 1], [], []>} : vector<128x384xbf16>, vector<384x128xbf16>, vector<128x128xf32> -> vector<128x128xf32>
    %c0_3 = arith.constant 0 : index
    %c0_4 = arith.constant 0 : index
    %3 = vector.load %arg3[%c0_3, %c0_4] : memref<128x128xf32, #tpu.memory_space<vmem>>, vector<128x128xf32>
    tpu.vector_store %arg3[%c0_3, %c0_4], %2 {strides = array<i32>} : memref<128x128xf32, #tpu.memory_space<vmem>>, vector<128x128xf32>,
    %c0_i32 = arith.constant 0 : i32
    %4 = arith.cmpi eq, %arg0, %c0_i32 : i32
    %5 = arith.extui %4 : i1 to i32
    %c0_i32_5 = arith.constant 0 : i32
    %6 = arith.cmpi ne, %5, %c0_i32_5 : i32
    scf.if %6 {
      %cst_13 = arith.constant 0.000000e+00 : f32
      %17 = vector.broadcast %cst_13 : f32 to vector<8x128xf32>
      %c0_14 = arith.constant 0 : index
      %c0_15 = arith.constant 0 : index
      %18 = vector.load %arg4[%c0_14, %c0_15] : memref<8x128xf32, #tpu.memory_space<vmem>>, vector<8x128xf32>
      tpu.vector_store %arg4[%c0_14, %c0_15], %17 {strides = array<i32>} : memref<8x128xf32, #tpu.memory_space<vmem>>, vector<8x128xf32>,
    } else {
    }
    %cst_6 = arith.constant dense<0.000000e+00> : vector<128xf32>
    %7 = vector.multi_reduction <add>, %2, %cst_6 [0] : vector<128x128xf32> to vector<128xf32>
    %8 = vector.shape_cast %7 : vector<128xf32> to vector<1x128xf32>
    %9 = arith.mulf %2, %2 : vector<128x128xf32>
    %cst_7 = arith.constant dense<0.000000e+00> : vector<128xf32>
    %10 = vector.multi_reduction <add>, %9, %cst_7 [0] : vector<128x128xf32> to vector<128xf32>
    %11 = vector.shape_cast %10 : vector<128xf32> to vector<1x128xf32>
    %cst_8 = arith.constant 0.000000e+00 : f32
    %12 = vector.broadcast %cst_8 : f32 to vector<6x128xf32>
    %13 = tpu.concatenate %8, %11, %12 in 0 : vector<1x128xf32>, vector<1x128xf32>, vector<6x128xf32> -> vector<8x128xf32>
    %c0_9 = arith.constant 0 : index
    %c0_10 = arith.constant 0 : index
    %14 = vector.load %arg4[%c0_9, %c0_10] : memref<8x128xf32, #tpu.memory_space<vmem>>, vector<8x128xf32>
    %15 = arith.addf %14, %13 : vector<8x128xf32>
    %c0_11 = arith.constant 0 : index
    %c0_12 = arith.constant 0 : index
    %16 = vector.load %arg4[%c0_11, %c0_12] : memref<8x128xf32, #tpu.memory_space<vmem>>, vector<8x128xf32>
    tpu.vector_store %arg4[%c0_11, %c0_12], %15 {strides = array<i32>} : memref<8x128xf32, #tpu.memory_space<vmem>>, vector<8x128xf32>,
    return
  }
  func.func @transform_0(%arg0: i32) -> (i32, i32) {
    %c0_i32 = arith.constant 0 : i32
    %c0_i32_0 = arith.constant 0 : i32
    return %arg0, %c0_i32 : i32, i32
  }
  func.func @transform_1(%arg0: i32) -> (i32, i32) {
    %c0_i32 = arith.constant 0 : i32
    %c0_i32_0 = arith.constant 0 : i32
    %c0_i32_1 = arith.constant 0 : i32
    return %c0_i32, %c0_i32_0 : i32, i32
  }
  func.func @transform_2(%arg0: i32) -> (i32, i32) {
    %c0_i32 = arith.constant 0 : i32
    %c0_i32_0 = arith.constant 0 : i32
    return %arg0, %c0_i32 : i32, i32
  }
  func.func @transform_3(%arg0: i32) -> (i32, i32) {
    %c0_i32 = arith.constant 0 : i32
    %c0_i32_0 = arith.constant 0 : i32
    %c0_i32_1 = arith.constant 0 : i32
    return %c0_i32, %c0_i32_0 : i32, i32
  }
}

module attributes {stable_mosaic.version = 11 : i64} {
  func.func @_matmul_kernel(%arg0: i32, %arg1: memref<512x512xbf16, #tpu.memory_space<vmem>>, %arg2: memref<512x128xbf16, #tpu.memory_space<vmem>>, %arg3: memref<512x128xf32, #tpu.memory_space<vmem>>) attributes {dimension_semantics = [#tpu.dimension_semantics<parallel>], iteration_bounds = array<i64: 1>, scalar_prefetch = 0 : i64, scratch_operands = 0 : i64, tpu.core_type = #tpu.core_type<tc>, window_params = [{transform_indices = @transform_0, window_bounds = array<i64: 512, 512>}, {pipeline_mode = #tpu.pipeline_mode<synchronous>, transform_indices = @transform_1, window_bounds = array<i64: 512, 128>}, {transform_indices = @transform_2, window_bounds = array<i64: 512, 128>}]} {
    %c0 = arith.constant 0 : index
    %c0_0 = arith.constant 0 : index
    %0 = vector.load %arg1[%c0, %c0_0] : memref<512x512xbf16, #tpu.memory_space<vmem>>, vector<512x512xbf16>
    %c0_1 = arith.constant 0 : index
    %c0_2 = arith.constant 0 : index
    %1 = vector.load %arg2[%c0_1, %c0_2] : memref<512x128xbf16, #tpu.memory_space<vmem>>, vector<512x128xbf16>
    %cst = arith.constant dense<0.000000e+00> : vector<512x128xf32>
    %2 = tpu.matmul %0, %1, %cst {dimension_numbers = #tpu.dot_dimension_numbers<[1], [0], [0], [1], [0, 0, 1, 1], [], []>} : vector<512x512xbf16>, vector<512x128xbf16>, vector<512x128xf32> -> vector<512x128xf32>
    %c0_3 = arith.constant 0 : index
    %c0_4 = arith.constant 0 : index
    %3 = vector.load %arg3[%c0_3, %c0_4] : memref<512x128xf32, #tpu.memory_space<vmem>>, vector<512x128xf32>
    tpu.vector_store %arg3[%c0_3, %c0_4], %2 {strides = array<i32>} : memref<512x128xf32, #tpu.memory_space<vmem>>, vector<512x128xf32>,
    return
  }
  func.func @transform_0(%arg0: i32) -> (i32, i32) {
    %c0_i32 = arith.constant 0 : i32
    %c0_i32_0 = arith.constant 0 : i32
    return %arg0, %c0_i32 : i32, i32
  }
  func.func @transform_1(%arg0: i32) -> (i32, i32) {
    %c0_i32 = arith.constant 0 : i32
    %c0_i32_0 = arith.constant 0 : i32
    %c0_i32_1 = arith.constant 0 : i32
    return %c0_i32, %c0_i32_0 : i32, i32
  }
  func.func @transform_2(%arg0: i32) -> (i32, i32) {
    %c0_i32 = arith.constant 0 : i32
    %c0_i32_0 = arith.constant 0 : i32
    return %arg0, %c0_i32 : i32, i32
  }
}

module attributes {stable_mosaic.version = 11 : i64} {
  func.func @kernel(%arg0: i32, %arg1: memref<512x128xf32, #tpu.memory_space<vmem>>, %arg2: memref<1x128xf32, #tpu.memory_space<vmem>>, %arg3: memref<1x128xf32, #tpu.memory_space<vmem>>, %arg4: memref<512x128xf32, #tpu.memory_space<vmem>>) attributes {dimension_semantics = [#tpu.dimension_semantics<parallel>], iteration_bounds = array<i64: 1>, scalar_prefetch = 0 : i64, scratch_operands = 0 : i64, tpu.core_type = #tpu.core_type<tc>, window_params = [{transform_indices = @transform_0, window_bounds = array<i64: 512, 128>}, {pipeline_mode = #tpu.pipeline_mode<synchronous>, transform_indices = @transform_1, window_bounds = array<i64: 1, 128>}, {pipeline_mode = #tpu.pipeline_mode<synchronous>, transform_indices = @transform_2, window_bounds = array<i64: 1, 128>}, {transform_indices = @transform_3, window_bounds = array<i64: 512, 128>}]} {
    %c0 = arith.constant 0 : index
    %c0_0 = arith.constant 0 : index
    %0 = vector.load %arg1[%c0, %c0_0] : memref<512x128xf32, #tpu.memory_space<vmem>>, vector<512x128xf32>
    %c0_1 = arith.constant 0 : index
    %c0_2 = arith.constant 0 : index
    %1 = vector.load %arg2[%c0_1, %c0_2] : memref<1x128xf32, #tpu.memory_space<vmem>>, vector<1x128xf32>
    %2 = vector.broadcast %1 : vector<1x128xf32> to vector<512x128xf32>
    %3 = arith.mulf %0, %2 : vector<512x128xf32>
    %c0_3 = arith.constant 0 : index
    %c0_4 = arith.constant 0 : index
    %4 = vector.load %arg3[%c0_3, %c0_4] : memref<1x128xf32, #tpu.memory_space<vmem>>, vector<1x128xf32>
    %5 = vector.broadcast %4 : vector<1x128xf32> to vector<512x128xf32>
    %6 = arith.addf %3, %5 : vector<512x128xf32>
    %7 = math.tanh %6 : vector<512x128xf32>
    %cst = arith.constant 5.000000e-01 : f32
    %8 = vector.broadcast %cst : f32 to vector<512x128xf32>
    %9 = arith.mulf %7, %8 : vector<512x128xf32>
    %cst_5 = arith.constant 5.000000e-01 : f32
    %10 = vector.broadcast %cst_5 : f32 to vector<512x128xf32>
    %11 = arith.addf %9, %10 : vector<512x128xf32>
    %c0_6 = arith.constant 0 : index
    %c0_7 = arith.constant 0 : index
    %12 = vector.load %arg4[%c0_6, %c0_7] : memref<512x128xf32, #tpu.memory_space<vmem>>, vector<512x128xf32>
    tpu.vector_store %arg4[%c0_6, %c0_7], %11 {strides = array<i32>} : memref<512x128xf32, #tpu.memory_space<vmem>>, vector<512x128xf32>,
    return
  }
  func.func @transform_0(%arg0: i32) -> (i32, i32) {
    %c0_i32 = arith.constant 0 : i32
    %c0_i32_0 = arith.constant 0 : i32
    return %arg0, %c0_i32 : i32, i32
  }
  func.func @transform_1(%arg0: i32) -> (i32, i32) {
    %c0_i32 = arith.constant 0 : i32
    %c0_i32_0 = arith.constant 0 : i32
    %c0_i32_1 = arith.constant 0 : i32
    return %c0_i32, %c0_i32_0 : i32, i32
  }
  func.func @transform_2(%arg0: i32) -> (i32, i32) {
    %c0_i32 = arith.constant 0 : i32
    %c0_i32_0 = arith.constant 0 : i32
    %c0_i32_1 = arith.constant 0 : i32
    return %c0_i32, %c0_i32_0 : i32, i32
  }
  func.func @transform_3(%arg0: i32) -> (i32, i32) {
    %c0_i32 = arith.constant 0 : i32
    %c0_i32_0 = arith.constant 0 : i32
    return %arg0, %c0_i32 : i32, i32
  }
}

</mosaic_0001>

<bundles_post_ra>
// kernel: albedo_resnet_generator.21
= control target key start
LH: loop header
LB: loop body
LE: loop exit
PB: predicated region body
PF: predicated region fallthrough
CT: control target
= control target key end

     0   :  { %s896_s0 = inlined_call_operand.vmem [shape: f32[512,128], index: 0, kind: input, shape index: {}]   ;;  %s897_s1 = inlined_call_operand.vmem [shape: f32[1,128], index: 1, kind: input, shape index: {}]   ;;  %s898_s2 = inlined_call_operand.vmem [shape: f32[1,128], index: 2, kind: input, shape index: {}]   ;;  %s899_s3 = inlined_call_operand.vmem [shape: f32[512,128], index: 3, kind: output, shape index: {}]  }
   0x1   :  { %v14_v0 = vld [vmem:[%s896_s0] sm:$0xff]  ;;  %v15_v4 = vld [vmem:[%s896_s0 + $0x8] sm:$0xff]  ;;  %v16_v5 = vld [vmem:[%s896_s0 + $0x10] sm:$0xff] }
   0x2   :  { %v380_v1 = vld [vmem:[%s897_s1] ss:$0 sm:$0xff]  ;;  %v17_v6 = vld [vmem:[%s896_s0 + $0x18] sm:$0xff]  ;;  %v19_v11 = vld [vmem:[%s896_s0 + $0x28] sm:$0xff] }
   0x3   :  { %v385_v2 = vld [vmem:[%s898_s2] ss:$0 sm:$0xff]  ;;  %v85_v3 = vmul.f32 %v380_v1, %v14_v0  ;;  %v86_v7 = vmul.f32 %v380_v1, %v15_v4  ;;  %v87_v8 = vmul.f32 %v380_v1, %v16_v5  ;;  %v88_v9 = vmul.f32 %v380_v1, %v17_v6  ;;  %v20_v12 = vld [vmem:[%s896_s0 + $0x30] sm:$0xff]  ;;  %v21_v17 = vld [vmem:[%s896_s0 + $0x38] sm:$0xff] }
   0x4   :  { %v18_v10 = vld [vmem:[%s896_s0 + $0x20] sm:$0xff]  ;;  %v90_v15 = vmul.f32 %v380_v1, %v19_v11  ;;  %v91_v16 = vmul.f32 %v380_v1, %v20_v12  ;;  %v92_v21 = vmul.f32 %v380_v1, %v21_v17  ;;  %v23_v27 = vld [vmem:[%s896_s0 + $0x48] sm:$0xff]  ;;  %v24_v28 = vld [vmem:[%s896_s0 + $0x50] sm:$0xff] }
   0x5   :  { %v156_v13 = vadd.f32 %v385_v2, %v85_v3  ;;  %v89_v14 = vmul.f32 %v380_v1, %v18_v10  ;;  %v157_v18 = vadd.f32 %v385_v2, %v86_v7  ;;  %v158_v19 = vadd.f32 %v385_v2, %v87_v8  ;;  %v22_v22 = vld [vmem:[%s896_s0 + $0x40] sm:$0xff]  ;;  %v25_v29 = vld [vmem:[%s896_s0 + $0x58] sm:$0xff]  ;;  %v27_v35 = vld [vmem:[%s896_s0 + $0x68] sm:$0xff] }
   0x6   :  { %v159_v20 = vadd.f32 %v385_v2, %v88_v9  ;;  %v161_v25 = vadd.f32 %v385_v2, %v90_v15  ;;  %v162_v26 = vadd.f32 %v385_v2, %v91_v16  ;;  %v163_v33 = vadd.f32 %v385_v2, %v92_v21  ;;  %v26_v34 = vld [vmem:[%s896_s0 + $0x60] sm:$0xff]  ;;  %v28_v36 = vld [vmem:[%s896_s0 + $0x70] sm:$0xff]  ;;  %v29_v41 = vld [vmem:[%s896_s0 + $0x78] sm:$0xff] }
   0x7   :  { %v220_v23 = vmax.f32 %v156_v13, 0.0  ;;  %v160_v24 = vadd.f32 %v385_v2, %v89_v14  ;;  %v221_v30 = vmax.f32 %v157_v18, 0.0  ;;  %v222_v31 = vmax.f32 %v158_v19, 0.0  ;;  %v30_v54 = vld [vmem:[%s896_s0 + $0x80] sm:$0xff]  ;;  %v31_v59 = vld [vmem:[%s896_s0 + $0x88] sm:$0xff]  ;;  %v32_v60 = vld [vmem:[%s896_s0 + $0x90] sm:$0xff] }
   0x8   :  { %v223_v32 = vmax.f32 %v159_v20, 0.0  ;;  %v225_v38 = vmax.f32 %v161_v25, 0.0  ;;  %v226_v39 = vmax.f32 %v162_v26, 0.0  ;;  %v93_v40 = vmul.f32 %v380_v1, %v22_v22  ;;  %v33_v61 = vld [vmem:[%s896_s0 + $0x98] sm:$0xff]  ;;  %v34_v4 = vld [vmem:[%s896_s0 + $0xa0] sm:$0xff]  ;;  %v35_v5 = vld [vmem:[%s896_s0 + $0xa8] sm:$0xff] }
   0x9   :  { %284 = vst [vmem:[%s899_s3] sm:$0xff] %v220_v23  ;;  %v224_v37 = vmax.f32 %v160_v24, 0.0  ;;  %285 = vst [vmem:[%s899_s3 + $0x8] sm:$0xff] %v221_v30  ;;  %v227_v42 = vmax.f32 %v163_v33, 0.0  ;;  %v94_v43 = vmul.f32 %v380_v1, %v23_v27  ;;  %v95_v44 = vmul.f32 %v380_v1, %v24_v28  ;;  %v36_v6 = vld [vmem:[%s896_s0 + $0xb0] sm:$0xff]  ;;  %v37_v11 = vld [vmem:[%s896_s0 + $0xb8] sm:$0xff] }
   0xa   :  { %286 = vst [vmem:[%s899_s3 + $0x10] sm:$0xff] %v222_v31  ;;  %287 = vst [vmem:[%s899_s3 + $0x18] sm:$0xff] %v223_v32  ;;  %v96_v45 = vmul.f32 %v380_v1, %v25_v29  ;;  %v164_v46 = vadd.f32 %v385_v2, %v93_v40  ;;  %v97_v47 = vmul.f32 %v380_v1, %v26_v34  ;;  %v38_v24 = vld [vmem:[%s896_s0 + $0xc0] sm:$0xff]  ;;  %v39_v29 = vld [vmem:[%s896_s0 + $0xc8] sm:$0xff] }
   0xb   :  { %288 = vst [vmem:[%s899_s3 + $0x20] sm:$0xff] %v224_v37  ;;  %289 = vst [vmem:[%s899_s3 + $0x28] sm:$0xff] %v225_v38  ;;  %v98_v48 = vmul.f32 %v380_v1, %v27_v35  ;;  %v99_v49 = vmul.f32 %v380_v1, %v28_v36  ;;  %v165_v50 = vadd.f32 %v385_v2, %v94_v43  ;;  %v40_v30 = vld [vmem:[%s896_s0 + $0xd0] sm:$0xff]  ;;  %v41_v31 = vld [vmem:[%s896_s0 + $0xd8] sm:$0xff] }
   0xc   :  { %290 = vst [vmem:[%s899_s3 + $0x30] sm:$0xff] %v226_v39  ;;  %291 = vst [vmem:[%s899_s3 + $0x38] sm:$0xff] %v227_v42  ;;  %v166_v51 = vadd.f32 %v385_v2, %v95_v44  ;;  %v167_v52 = vadd.f32 %v385_v2, %v96_v45  ;;  %v100_v53 = vmul.f32 %v380_v1, %v29_v41  ;;  %v228_v55 = vmax.f32 %v164_v46, 0.0  ;;  %v42_v36 = vld [vmem:[%s896_s0 + $0xe0] sm:$0xff]  ;;  %v43_v37 = vld [vmem:[%s896_s0 + $0xe8] sm:$0xff] }
   0xd   :  { %v168_v56 = vadd.f32 %v385_v2, %v97_v47  ;;  %v169_v57 = vadd.f32 %v385_v2, %v98_v48  ;;  %v170_v58 = vadd.f32 %v385_v2, %v99_v49  ;;  %v229_v62 = vmax.f32 %v165_v50, 0.0  ;;  %v44_v38 = vld [vmem:[%s896_s0 + $0xf0] sm:$0xff]  ;;  %v45_v43 = vld [vmem:[%s896_s0 + $0xf8] sm:$0xff] }
   0xe   :  { %v230_v63 = vmax.f32 %v166_v51, 0.0  ;;  %v231_v0 = vmax.f32 %v167_v52, 0.0  ;;  %v171_v3 = vadd.f32 %v385_v2, %v100_v53  ;;  %292 = vst [vmem:[%s899_s3 + $0x40] sm:$0xff] %v228_v55  ;;  %v101_v10 = vmul.f32 %v380_v1, %v30_v54 }
   0xf   :  { %v232_v7 = vmax.f32 %v168_v56, 0.0  ;;  %v233_v8 = vmax.f32 %v169_v57, 0.0  ;;  %v234_v9 = vmax.f32 %v170_v58, 0.0  ;;  %293 = vst [vmem:[%s899_s3 + $0x48] sm:$0xff] %v229_v62  ;;  %v102_v13 = vmul.f32 %v380_v1, %v31_v59  ;;  %v46_v56 = vld [vmem:[%s896_s0 + $0x100] sm:$0xff]  ;;  %v48_v62 = vld [vmem:[%s896_s0 + $0x110] sm:$0xff] }
  0x10   :  { %294 = vst [vmem:[%s899_s3 + $0x50] sm:$0xff] %v230_v63  ;;  %295 = vst [vmem:[%s899_s3 + $0x58] sm:$0xff] %v231_v0  ;;  %v235_v12 = vmax.f32 %v171_v3, 0.0  ;;  %v103_v14 = vmul.f32 %v380_v1, %v32_v60  ;;  %v104_v15 = vmul.f32 %v380_v1, %v33_v61  ;;  %v172_v16 = vadd.f32 %v385_v2, %v101_v10  ;;  %v47_v61 = vld [vmem:[%s896_s0 + $0x108] sm:$0xff]  ;;  %v49_v63 = vld [vmem:[%s896_s0 + $0x118] sm:$0xff] }
  0x11   :  { %296 = vst [vmem:[%s899_s3 + $0x60] sm:$0xff] %v232_v7  ;;  %297 = vst [vmem:[%s899_s3 + $0x68] sm:$0xff] %v233_v8  ;;  %v105_v17 = vmul.f32 %v380_v1, %v34_v4  ;;  %v106_v18 = vmul.f32 %v380_v1, %v35_v5  ;;  %v107_v19 = vmul.f32 %v380_v1, %v36_v6  ;;  %v50_v6 = vld [vmem:[%s896_s0 + $0x120] sm:$0xff]  ;;  %v51_v7 = vld [vmem:[%s896_s0 + $0x128] sm:$0xff] }
  0x12   :  { %298 = vst [vmem:[%s899_s3 + $0x70] sm:$0xff] %v234_v9  ;;  %299 = vst [vmem:[%s899_s3 + $0x78] sm:$0xff] %v235_v12  ;;  %v173_v20 = vadd.f32 %v385_v2, %v102_v13  ;;  %v174_v21 = vadd.f32 %v385_v2, %v103_v14  ;;  %v175_v22 = vadd.f32 %v385_v2, %v104_v15  ;;  %v236_v25 = vmax.f32 %v172_v16, 0.0  ;;  %v52_v8 = vld [vmem:[%s896_s0 + $0x130] sm:$0xff]  ;;  %v53_v13 = vld [vmem:[%s896_s0 + $0x138] sm:$0xff] }
  0x13   :  { %v108_v23 = vmul.f32 %v380_v1, %v37_v11  ;;  %v176_v26 = vadd.f32 %v385_v2, %v105_v17  ;;  %v177_v27 = vadd.f32 %v385_v2, %v106_v18  ;;  %v178_v28 = vadd.f32 %v385_v2, %v107_v19 }
  0x14   :  { %v237_v32 = vmax.f32 %v173_v20, 0.0  ;;  %v238_v33 = vmax.f32 %v174_v21, 0.0  ;;  %v239_v34 = vmax.f32 %v175_v22, 0.0  ;;  %300 = vst [vmem:[%s899_s3 + $0x80] sm:$0xff] %v236_v25  ;;  %v109_v42 = vmul.f32 %v380_v1, %v38_v24 }
  0x15   :  { %v179_v35 = vadd.f32 %v385_v2, %v108_v23  ;;  %v240_v39 = vmax.f32 %v176_v26, 0.0  ;;  %v241_v40 = vmax.f32 %v177_v27, 0.0  ;;  %v242_v41 = vmax.f32 %v178_v28, 0.0  ;;  %v54_v26 = vld [vmem:[%s896_s0 + $0x140] sm:$0xff] }
  0x16   :  { %301 = vst [vmem:[%s899_s3 + $0x88] sm:$0xff] %v237_v32  ;;  %302 = vst [vmem:[%s899_s3 + $0x90] sm:$0xff] %v238_v33  ;;  %v110_v45 = vmul.f32 %v380_v1, %v39_v29  ;;  %v111_v46 = vmul.f32 %v380_v1, %v40_v30  ;;  %v112_v47 = vmul.f32 %v380_v1, %v41_v31  ;;  %v55_v31 = vld [vmem:[%s896_s0 + $0x148] sm:$0xff]  ;;  %v56_v32 = vld [vmem:[%s896_s0 + $0x150] sm:$0xff] }
  0x17   :  { %303 = vst [vmem:[%s899_s3 + $0x98] sm:$0xff] %v239_v34  ;;  %v243_v44 = vmax.f32 %v179_v35, 0.0  ;;  %304 = vst [vmem:[%s899_s3 + $0xa0] sm:$0xff] %v240_v39  ;;  %v180_v48 = vadd.f32 %v385_v2, %v109_v42  ;;  %v113_v49 = vmul.f32 %v380_v1, %v42_v36  ;;  %v114_v50 = vmul.f32 %v380_v1, %v43_v37  ;;  %v57_v33 = vld [vmem:[%s896_s0 + $0x158] sm:$0xff]  ;;  %v59_v39 = vld [vmem:[%s896_s0 + $0x168] sm:$0xff] }
  0x18   :  { %305 = vst [vmem:[%s899_s3 + $0xa8] sm:$0xff] %v241_v40  ;;  %306 = vst [vmem:[%s899_s3 + $0xb0] sm:$0xff] %v242_v41  ;;  %v115_v51 = vmul.f32 %v380_v1, %v44_v38  ;;  %v181_v52 = vadd.f32 %v385_v2, %v110_v45  ;;  %v182_v53 = vadd.f32 %v385_v2, %v111_v46  ;;  %v58_v38 = vld [vmem:[%s896_s0 + $0x160] sm:$0xff]  ;;  %v60_v40 = vld [vmem:[%s896_s0 + $0x170] sm:$0xff] }
  0x19   :  { %307 = vst [vmem:[%s899_s3 + $0xb8] sm:$0xff] %v243_v44  ;;  %v183_v54 = vadd.f32 %v385_v2, %v112_v47  ;;  %v116_v55 = vmul.f32 %v380_v1, %v45_v43  ;;  %v244_v57 = vmax.f32 %v180_v48, 0.0  ;;  %v184_v58 = vadd.f32 %v385_v2, %v113_v49  ;;  %v61_v45 = vld [vmem:[%s896_s0 + $0x178] sm:$0xff] }
  0x1a   :  { %v185_v59 = vadd.f32 %v385_v2, %v114_v50  ;;  %v186_v60 = vadd.f32 %v385_v2, %v115_v51  ;;  %v245_v0 = vmax.f32 %v181_v52, 0.0  ;;  %v246_v3 = vmax.f32 %v182_v53, 0.0 }
  0x1b   :  { %v247_v4 = vmax.f32 %v183_v54, 0.0  ;;  %v187_v5 = vadd.f32 %v385_v2, %v116_v55  ;;  %308 = vst [vmem:[%s899_s3 + $0xc0] sm:$0xff] %v244_v57  ;;  %v248_v9 = vmax.f32 %v184_v58, 0.0  ;;  %v117_v12 = vmul.f32 %v380_v1, %v46_v56  ;;  %v62_v58 = vld [vmem:[%s896_s0 + $0x180] sm:$0xff] }
  0x1c   :  { %v249_v10 = vmax.f32 %v185_v59, 0.0  ;;  %v250_v11 = vmax.f32 %v186_v60, 0.0  ;;  %309 = vst [vmem:[%s899_s3 + $0xc8] sm:$0xff] %v245_v0  ;;  %310 = vst [vmem:[%s899_s3 + $0xd0] sm:$0xff] %v246_v3  ;;  %v118_v15 = vmul.f32 %v380_v1, %v47_v61  ;;  %v119_v16 = vmul.f32 %v380_v1, %v48_v62  ;;  %v64_v0 = vld [vmem:[%s896_s0 + $0x190] sm:$0xff]  ;;  %v65_v3 = vld [vmem:[%s896_s0 + $0x198] sm:$0xff] }
  0x1d   :  { %311 = vst [vmem:[%s899_s3 + $0xd8] sm:$0xff] %v247_v4  ;;  %v251_v14 = vmax.f32 %v187_v5, 0.0  ;;  %v120_v17 = vmul.f32 %v380_v1, %v49_v63  ;;  %312 = vst [vmem:[%s899_s3 + $0xe0] sm:$0xff] %v248_v9  ;;  %v188_v18 = vadd.f32 %v385_v2, %v117_v12  ;;  %v121_v19 = vmul.f32 %v380_v1, %v50_v6  ;;  %v63_v63 = vld [vmem:[%s896_s0 + $0x188] sm:$0xff] }
  0x1e   :  { %313 = vst [vmem:[%s899_s3 + $0xe8] sm:$0xff] %v249_v10  ;;  %314 = vst [vmem:[%s899_s3 + $0xf0] sm:$0xff] %v250_v11  ;;  %v122_v20 = vmul.f32 %v380_v1, %v51_v7  ;;  %v123_v21 = vmul.f32 %v380_v1, %v52_v8  ;;  %v189_v22 = vadd.f32 %v385_v2, %v118_v15  ;;  %v66_v8 = vld [vmem:[%s896_s0 + $0x1a0] sm:$0xff]  ;;  %v67_v9 = vld [vmem:[%s896_s0 + $0x1a8] sm:$0xff] }
  0x1f   :  { %315 = vst [vmem:[%s899_s3 + $0xf8] sm:$0xff] %v251_v14  ;;  %v190_v23 = vadd.f32 %v385_v2, %v119_v16  ;;  %v191_v24 = vadd.f32 %v385_v2, %v120_v17  ;;  %v124_v25 = vmul.f32 %v380_v1, %v53_v13  ;;  %v252_v27 = vmax.f32 %v188_v18, 0.0  ;;  %v68_v10 = vld [vmem:[%s896_s0 + $0x1b0] sm:$0xff]  ;;  %v69_v15 = vld [vmem:[%s896_s0 + $0x1b8] sm:$0xff] }
  0x20   :  { %v192_v28 = vadd.f32 %v385_v2, %v121_v19  ;;  %v193_v29 = vadd.f32 %v385_v2, %v122_v20  ;;  %v194_v30 = vadd.f32 %v385_v2, %v123_v21  ;;  %v253_v34 = vmax.f32 %v189_v22, 0.0 }
  0x21   :  { %v254_v35 = vmax.f32 %v190_v23, 0.0  ;;  %v255_v36 = vmax.f32 %v191_v24, 0.0  ;;  %v195_v37 = vadd.f32 %v385_v2, %v124_v25  ;;  %316 = vst [vmem:[%s899_s3 + $0x100] sm:$0xff] %v252_v27  ;;  %v125_v44 = vmul.f32 %v380_v1, %v54_v26 }
  0x22   :  { %v256_v41 = vmax.f32 %v192_v28, 0.0  ;;  %v257_v42 = vmax.f32 %v193_v29, 0.0  ;;  %v258_v43 = vmax.f32 %v194_v30, 0.0  ;;  %317 = vst [vmem:[%s899_s3 + $0x108] sm:$0xff] %v253_v34  ;;  %v126_v47 = vmul.f32 %v380_v1, %v55_v31  ;;  %v70_v28 = vld [vmem:[%s896_s0 + $0x1c0] sm:$0xff]  ;;  %v72_v34 = vld [vmem:[%s896_s0 + $0x1d0] sm:$0xff] }
  0x23   :  { %318 = vst [vmem:[%s899_s3 + $0x110] sm:$0xff] %v254_v35  ;;  %319 = vst [vmem:[%s899_s3 + $0x118] sm:$0xff] %v255_v36  ;;  %v259_v46 = vmax.f32 %v195_v37, 0.0  ;;  %v127_v48 = vmul.f32 %v380_v1, %v56_v32  ;;  %v128_v49 = vmul.f32 %v380_v1, %v57_v33  ;;  %v196_v50 = vadd.f32 %v385_v2, %v125_v44  ;;  %v71_v33 = vld [vmem:[%s896_s0 + $0x1c8] sm:$0xff]  ;;  %v73_v35 = vld [vmem:[%s896_s0 + $0x1d8] sm:$0xff] }
  0x24   :  { %320 = vst [vmem:[%s899_s3 + $0x120] sm:$0xff] %v256_v41  ;;  %321 = vst [vmem:[%s899_s3 + $0x128] sm:$0xff] %v257_v42  ;;  %v129_v51 = vmul.f32 %v380_v1, %v58_v38  ;;  %v130_v52 = vmul.f32 %v380_v1, %v59_v39  ;;  %v131_v53 = vmul.f32 %v380_v1, %v60_v40  ;;  %v74_v40 = vld [vmem:[%s896_s0 + $0x1e0] sm:$0xff]  ;;  %v75_v41 = vld [vmem:[%s896_s0 + $0x1e8] sm:$0xff] }
  0x25   :  { %322 = vst [vmem:[%s899_s3 + $0x130] sm:$0xff] %v258_v43  ;;  %323 = vst [vmem:[%s899_s3 + $0x138] sm:$0xff] %v259_v46  ;;  %v197_v54 = vadd.f32 %v385_v2, %v126_v47  ;;  %v198_v55 = vadd.f32 %v385_v2, %v127_v48  ;;  %v199_v56 = vadd.f32 %v385_v2, %v128_v49  ;;  %v260_v59 = vmax.f32 %v196_v50, 0.0  ;;  %v76_v42 = vld [vmem:[%s896_s0 + $0x1f0] sm:$0xff]  ;;  %v77_v47 = vld [vmem:[%s896_s0 + $0x1f8] sm:$0xff] }
  0x26   :  { %v132_v57 = vmul.f32 %v380_v1, %v61_v45  ;;  %v200_v60 = vadd.f32 %v385_v2, %v129_v51  ;;  %v201_v61 = vadd.f32 %v385_v2, %v130_v52  ;;  %v202_v62 = vadd.f32 %v385_v2, %v131_v53 }
  0x27   :  { %v261_v4 = vmax.f32 %v197_v54, 0.0  ;;  %v262_v5 = vmax.f32 %v198_v55, 0.0  ;;  %v263_v6 = vmax.f32 %v199_v56, 0.0  ;;  %324 = vst [vmem:[%s899_s3 + $0x140] sm:$0xff] %v260_v59  ;;  %v133_v14 = vmul.f32 %v380_v1, %v62_v58 }
  0x28   :  { %v203_v7 = vadd.f32 %v385_v2, %v132_v57  ;;  %v264_v11 = vmax.f32 %v200_v60, 0.0  ;;  %v265_v12 = vmax.f32 %v201_v61, 0.0  ;;  %v266_v13 = vmax.f32 %v202_v62, 0.0 }
  0x29   :  { %325 = vst [vmem:[%s899_s3 + $0x148] sm:$0xff] %v261_v4  ;;  %326 = vst [vmem:[%s899_s3 + $0x150] sm:$0xff] %v262_v5  ;;  %v134_v17 = vmul.f32 %v380_v1, %v63_v63  ;;  %v135_v18 = vmul.f32 %v380_v1, %v64_v0  ;;  %v136_v19 = vmul.f32 %v380_v1, %v65_v3 }
  0x2a   :  { %327 = vst [vmem:[%s899_s3 + $0x158] sm:$0xff] %v263_v6  ;;  %v267_v16 = vmax.f32 %v203_v7, 0.0  ;;  %328 = vst [vmem:[%s899_s3 + $0x160] sm:$0xff] %v264_v11  ;;  %v204_v20 = vadd.f32 %v385_v2, %v133_v14  ;;  %v137_v21 = vmul.f32 %v380_v1, %v66_v8  ;;  %v138_v22 = vmul.f32 %v380_v1, %v67_v9 }
  0x2b   :  { %329 = vst [vmem:[%s899_s3 + $0x168] sm:$0xff] %v265_v12  ;;  %330 = vst [vmem:[%s899_s3 + $0x170] sm:$0xff] %v266_v13  ;;  %v139_v23 = vmul.f32 %v380_v1, %v68_v10  ;;  %v205_v24 = vadd.f32 %v385_v2, %v134_v17  ;;  %v206_v25 = vadd.f32 %v385_v2, %v135_v18 }
  0x2c   :  { %331 = vst [vmem:[%s899_s3 + $0x178] sm:$0xff] %v267_v16  ;;  %v207_v26 = vadd.f32 %v385_v2, %v136_v19  ;;  %v140_v27 = vmul.f32 %v380_v1, %v69_v15  ;;  %v268_v29 = vmax.f32 %v204_v20, 0.0  ;;  %v208_v30 = vadd.f32 %v385_v2, %v137_v21 }
  0x2d   :  { %v209_v31 = vadd.f32 %v385_v2, %v138_v22  ;;  %v210_v32 = vadd.f32 %v385_v2, %v139_v23  ;;  %v269_v36 = vmax.f32 %v205_v24, 0.0  ;;  %v270_v37 = vmax.f32 %v206_v25, 0.0 }
  0x2e   :  { %v271_v38 = vmax.f32 %v207_v26, 0.0  ;;  %v211_v39 = vadd.f32 %v385_v2, %v140_v27  ;;  %332 = vst [vmem:[%s899_s3 + $0x180] sm:$0xff] %v268_v29  ;;  %v272_v43 = vmax.f32 %v208_v30, 0.0  ;;  %v141_v46 = vmul.f32 %v380_v1, %v70_v28 }
  0x2f   :  { %v273_v44 = vmax.f32 %v209_v31, 0.0  ;;  %v274_v45 = vmax.f32 %v210_v32, 0.0  ;;  %333 = vst [vmem:[%s899_s3 + $0x188] sm:$0xff] %v269_v36  ;;  %334 = vst [vmem:[%s899_s3 + $0x190] sm:$0xff] %v270_v37  ;;  %v142_v49 = vmul.f32 %v380_v1, %v71_v33  ;;  %v143_v50 = vmul.f32 %v380_v1, %v72_v34 }
  0x30   :  { %335 = vst [vmem:[%s899_s3 + $0x198] sm:$0xff] %v271_v38  ;;  %v275_v48 = vmax.f32 %v211_v39, 0.0  ;;  %v144_v51 = vmul.f32 %v380_v1, %v73_v35  ;;  %336 = vst [vmem:[%s899_s3 + $0x1a0] sm:$0xff] %v272_v43  ;;  %v212_v52 = vadd.f32 %v385_v2, %v141_v46  ;;  %v145_v53 = vmul.f32 %v380_v1, %v74_v40 }
  0x31   :  { %337 = vst [vmem:[%s899_s3 + $0x1a8] sm:$0xff] %v273_v44  ;;  %338 = vst [vmem:[%s899_s3 + $0x1b0] sm:$0xff] %v274_v45  ;;  %v146_v54 = vmul.f32 %v380_v1, %v75_v41  ;;  %v147_v55 = vmul.f32 %v380_v1, %v76_v42  ;;  %v213_v56 = vadd.f32 %v385_v2, %v142_v49 }
  0x32   :  { %339 = vst [vmem:[%s899_s3 + $0x1b8] sm:$0xff] %v275_v48  ;;  %v214_v57 = vadd.f32 %v385_v2, %v143_v50  ;;  %v215_v58 = vadd.f32 %v385_v2, %v144_v51  ;;  %v148_v59 = vmul.f32 %v380_v1, %v77_v47  ;;  %v276_v60 = vmax.f32 %v212_v52, 0.0 }
  0x33   :  { %v216_v61 = vadd.f32 %v385_v2, %v145_v53  ;;  %v217_v62 = vadd.f32 %v385_v2, %v146_v54  ;;  %v218_v63 = vadd.f32 %v385_v2, %v147_v55  ;;  %v277_v0 = vmax.f32 %v213_v56, 0.0 }
  0x34   :  { %v278_v3 = vmax.f32 %v214_v57, 0.0  ;;  %v279_v4 = vmax.f32 %v215_v58, 0.0  ;;  %v219_v5 = vadd.f32 %v385_v2, %v148_v59  ;;  %340 = vst [vmem:[%s899_s3 + $0x1c0] sm:$0xff] %v276_v60 }
  0x35   :  { %v280_v6 = vmax.f32 %v216_v61, 0.0  ;;  %v281_v7 = vmax.f32 %v217_v62, 0.0  ;;  %v282_v8 = vmax.f32 %v218_v63, 0.0  ;;  %341 = vst [vmem:[%s899_s3 + $0x1c8] sm:$0xff] %v277_v0 }
  0x36   :  { %342 = vst [vmem:[%s899_s3 + $0x1d0] sm:$0xff] %v278_v3  ;;  %343 = vst [vmem:[%s899_s3 + $0x1d8] sm:$0xff] %v279_v4  ;;  %v283_v1 = vmax.f32 %v219_v5, 0.0 }
  0x37   :  { %344 = vst [vmem:[%s899_s3 + $0x1e0] sm:$0xff] %v280_v6  ;;  %345 = vst [vmem:[%s899_s3 + $0x1e8] sm:$0xff] %v281_v7 }
  0x38   :  { %346 = vst [vmem:[%s899_s3 + $0x1f0] sm:$0xff] %v282_v8  ;;  %347 = vst [vmem:[%s899_s3 + $0x1f8] sm:$0xff] %v283_v1 }

// kernel: albedo_resnet_generator.20
= control target key start
LH: loop header
LB: loop body
LE: loop exit
PB: predicated region body
PF: predicated region fallthrough
CT: control target
= control target key end

     0   :  { %v1327_v0 = vmov 0   ;;  %vm1086_vm0 = vcmask 1040384   ;;  %vm1088_vm1 = vcmask 1041408   ;;  %s2007_s1 = inlined_call_operand.vmem [shape: bf16[256,128], index: 1, kind: input, shape index: {}]   ;;  %s2008_s0 = inlined_call_operand.vmem [shape: bf16[512,256], index: 0, kind: input, shape index: {}]   ;;  %s2009_s2 = inlined_call_operand.vmem [shape: f32[512,128], index: 2, kind: output, shape index: {0}]   ;;  %s2010_s3 = inlined_call_operand.vmem [shape: f32[8,128], index: 3, kind: output, shape index: {1}]  }
   0x1   :  { %526 = vmatprep.subr.bf16.mxu0 %v1327_v0  ;;  %v1215_v1 = vld [vmem:[%s2007_s1] sm:$0xff]   ;;  %1181 = vmatprep.subr.bf16.mxu1 %v1327_v0  ;;  %v1216_v2 = vld [vmem:[%s2007_s1 + $0x8] sm:$0xff]   ;;  %v1217_v3 = vld [vmem:[%s2007_s1 + $0x10] sm:$0xff]  }
   0x2   :  { %527 = vmatpush1.bf16.msra.mxu0 %v1215_v1  ;;  %1197 = vmatpush1.bf16.msra.mxu1 %v1215_v1  ;;  %v1218_v4 = vld [vmem:[%s2007_s1 + $0x18] sm:$0xff]   ;;  %v1219_v5 = vld [vmem:[%s2007_s1 + $0x20] sm:$0xff]   ;;  %v1220_v7 = vld [vmem:[%s2007_s1 + $0x28] sm:$0xff]  }
   0x3   :  { %528 = vmatprep.subr.bf16.mxu0 %v1327_v0  ;;  %1182 = vmatprep.subr.bf16.mxu1 %v1327_v0  ;;  %v1233_v6 = vld [vmem:[%s2008_s0 + $0x4] ss:$8 sps:$4 sm:$0xff]   ;;  %v1221_v8 = vld [vmem:[%s2007_s1 + $0x30] sm:$0xff]   ;;  %v1222_v9 = vld [vmem:[%s2007_s1 + $0x38] sm:$0xff]  }
   0x4   :  { %558 = vmatprep.mubr.bf16.mxu0 %v1233_v6  ;;  %v1257_v10 = vld [vmem:[%s2008_s0 + $0x104] ss:$8 sps:$4 sm:$0xff]   ;;  %v1225_v13 = vld [vmem:[%s2007_s1 + $0x50] sm:$0xff]   ;;  %v1226_v14 = vld [vmem:[%s2007_s1 + $0x58] sm:$0xff]  }
   0x5   :  { %686 = vmatprep.mubr.bf16.mxu1 %v1257_v10  ;;  %v1223_v11 = vld [vmem:[%s2007_s1 + $0x40] sm:$0xff]   ;;  %v1224_v12 = vld [vmem:[%s2007_s1 + $0x48] sm:$0xff]   ;;  %v1229_v17 = vld [vmem:[%s2007_s1 + $0x70] sm:$0xff]  }
   0x6   :  { %529 = vmatpush1.bf16.msra.mxu0 %v1216_v2  ;;  %1198 = vmatpush1.bf16.msra.mxu1 %v1216_v2  ;;  %v1227_v15 = vld [vmem:[%s2007_s1 + $0x60] sm:$0xff]   ;;  %v1228_v16 = vld [vmem:[%s2007_s1 + $0x68] sm:$0xff]   ;;  %v1230_v18 = vld [vmem:[%s2007_s1 + $0x78] sm:$0xff]  }
   0x7   :  { %530 = vmatprep.subr.bf16.mxu0 %v1327_v0  ;;  %1183 = vmatprep.subr.bf16.mxu1 %v1327_v0  ;;  %v1231_v19 = vld [vmem:[%s2008_s0] ss:$8 sps:$4 sm:$0xff]   ;;  %v1234_v21 = vld [vmem:[%s2008_s0 + $0x14] ss:$8 sps:$4 sm:$0xff]   ;;  %v1236_v23 = vld [vmem:[%s2008_s0 + $0x10] ss:$8 sps:$4 sm:$0xff]  }
   0x8   :  { %v1255_v20 = vld [vmem:[%s2008_s0 + $0x100] ss:$8 sps:$4 sm:$0xff]   ;;  %v1261_v22 = vld [vmem:[%s2008_s0 + $0x114] ss:$8 sps:$4 sm:$0xff]   ;;  %v1263_v24 = vld [vmem:[%s2008_s0 + $0x110] ss:$8 sps:$4 sm:$0xff]  }
   0x9   :  { %v1237_v25 = vld [vmem:[%s2008_s0 + $0x24] ss:$8 sps:$4 sm:$0xff]   ;;  %v1239_v27 = vld [vmem:[%s2008_s0 + $0x20] ss:$8 sps:$4 sm:$0xff]   ;;  %v1240_v29 = vld [vmem:[%s2008_s0 + $0x34] ss:$8 sps:$4 sm:$0xff]  }
   0xa   :  { %531 = vmatpush1.bf16.msra.mxu0 %v1217_v3  ;;  %1199 = vmatpush1.bf16.msra.mxu1 %v1217_v3  ;;  %v1267_v26 = vld [vmem:[%s2008_s0 + $0x124] ss:$8 sps:$4 sm:$0xff]   ;;  %v1269_v28 = vld [vmem:[%s2008_s0 + $0x120] ss:$8 sps:$4 sm:$0xff]   ;;  %v1273_v30 = vld [vmem:[%s2008_s0 + $0x134] ss:$8 sps:$4 sm:$0xff]  }
   0xb   :  { %532 = vmatprep.subr.bf16.mxu0 %v1327_v0  ;;  %1184 = vmatprep.subr.bf16.mxu1 %v1327_v0  ;;  %v1242_v31 = vld [vmem:[%s2008_s0 + $0x30] ss:$8 sps:$4 sm:$0xff]   ;;  %v1243_v33 = vld [vmem:[%s2008_s0 + $0x44] ss:$8 sps:$4 sm:$0xff]   ;;  %v1245_v35 = vld [vmem:[%s2008_s0 + $0x40] ss:$8 sps:$4 sm:$0xff]  }
   0xc   :  { %v1275_v32 = vld [vmem:[%s2008_s0 + $0x130] ss:$8 sps:$4 sm:$0xff]   ;;  %v1279_v34 = vld [vmem:[%s2008_s0 + $0x144] ss:$8 sps:$4 sm:$0xff]   ;;  %v1281_v36 = vld [vmem:[%s2008_s0 + $0x140] ss:$8 sps:$4 sm:$0xff]  }
   0xd   :  { %v1246_v37 = vld [vmem:[%s2008_s0 + $0x54] ss:$8 sps:$4 sm:$0xff]   ;;  %v1248_v39 = vld [vmem:[%s2008_s0 + $0x50] ss:$8 sps:$4 sm:$0xff]   ;;  %v1249_v41 = vld [vmem:[%s2008_s0 + $0x64] ss:$8 sps:$4 sm:$0xff]  }
   0xe   :  { %533 = vmatpush1.bf16.msra.mxu0 %v1218_v4  ;;  %1200 = vmatpush1.bf16.msra.mxu1 %v1218_v4  ;;  %v1285_v38 = vld [vmem:[%s2008_s0 + $0x154] ss:$8 sps:$4 sm:$0xff]   ;;  %v1287_v40 = vld [vmem:[%s2008_s0 + $0x150] ss:$8 sps:$4 sm:$0xff]   ;;  %v1291_v42 = vld [vmem:[%s2008_s0 + $0x164] ss:$8 sps:$4 sm:$0xff]  }
   0xf   :  { %534 = vmatprep.subr.bf16.mxu0 %v1327_v0  ;;  %1185 = vmatprep.subr.bf16.mxu1 %v1327_v0  ;;  %v1251_v43 = vld [vmem:[%s2008_s0 + $0x60] ss:$8 sps:$4 sm:$0xff]   ;;  %v1252_v45 = vld [vmem:[%s2008_s0 + $0x74] ss:$8 sps:$4 sm:$0xff]   ;;  %v1254_v47 = vld [vmem:[%s2008_s0 + $0x70] ss:$8 sps:$4 sm:$0xff]  }
  0x10   :  { %v1293_v44 = vld [vmem:[%s2008_s0 + $0x160] ss:$8 sps:$4 sm:$0xff]   ;;  %v1297_v46 = vld [vmem:[%s2008_s0 + $0x174] ss:$8 sps:$4 sm:$0xff]   ;;  %v1299_v48 = vld [vmem:[%s2008_s0 + $0x170] ss:$8 sps:$4 sm:$0xff]  }
  0x11   :  { %v1258_v49 = vld [vmem:[%s2008_s0 + $0x84] ss:$8 sps:$4 sm:$0xff]   ;;  %v1260_v51 = vld [vmem:[%s2008_s0 + $0x80] ss:$8 sps:$4 sm:$0xff]   ;;  %v1264_v53 = vld [vmem:[%s2008_s0 + $0x94] ss:$8 sps:$4 sm:$0xff]  }
  0x12   :  { %535 = vmatpush1.bf16.msra.mxu0 %v1219_v5  ;;  %1201 = vmatpush1.bf16.msra.mxu1 %v1219_v5  ;;  %v1303_v50 = vld [vmem:[%s2008_s0 + $0x184] ss:$8 sps:$4 sm:$0xff]   ;;  %v1305_v52 = vld [vmem:[%s2008_s0 + $0x180] ss:$8 sps:$4 sm:$0xff]   ;;  %v1306_v54 = vld [vmem:[%s2008_s0 + $0x194] ss:$8 sps:$4 sm:$0xff]  }
  0x13   :  { %536 = vmatprep.subr.bf16.mxu0 %v1327_v0  ;;  %1186 = vmatprep.subr.bf16.mxu1 %v1327_v0  ;;  %v1266_v55 = vld [vmem:[%s2008_s0 + $0x90] ss:$8 sps:$4 sm:$0xff]   ;;  %v1270_v57 = vld [vmem:[%s2008_s0 + $0xa4] ss:$8 sps:$4 sm:$0xff]   ;;  %v1272_v59 = vld [vmem:[%s2008_s0 + $0xa0] ss:$8 sps:$4 sm:$0xff]  }
  0x14   :  { %v1308_v56 = vld [vmem:[%s2008_s0 + $0x190] ss:$8 sps:$4 sm:$0xff]   ;;  %v1309_v58 = vld [vmem:[%s2008_s0 + $0x1a4] ss:$8 sps:$4 sm:$0xff]   ;;  %v1311_v60 = vld [vmem:[%s2008_s0 + $0x1a0] ss:$8 sps:$4 sm:$0xff]  }
  0x15   :  { %v1276_v61 = vld [vmem:[%s2008_s0 + $0xb4] ss:$8 sps:$4 sm:$0xff]   ;;  %v1278_v63 = vld [vmem:[%s2008_s0 + $0xb0] ss:$8 sps:$4 sm:$0xff]   ;;  %v1282_v1 = vld [vmem:[%s2008_s0 + $0xc4] ss:$8 sps:$4 sm:$0xff]  }
  0x16   :  { %537 = vmatpush1.bf16.msra.mxu0 %v1220_v7  ;;  %1202 = vmatpush1.bf16.msra.mxu1 %v1220_v7  ;;  %v1312_v62 = vld [vmem:[%s2008_s0 + $0x1b4] ss:$8 sps:$4 sm:$0xff]   ;;  %v1315_v2 = vld [vmem:[%s2008_s0 + $0x1c4] ss:$8 sps:$4 sm:$0xff]   ;;  %v1284_v3 = vld [vmem:[%s2008_s0 + $0xc0] ss:$8 sps:$4 sm:$0xff]  }
  0x17   :  { %538 = vmatprep.subr.bf16.mxu0 %v1327_v0  ;;  %1187 = vmatprep.subr.bf16.mxu1 %v1327_v0  ;;  %v1317_v4 = vld [vmem:[%s2008_s0 + $0x1c0] ss:$8 sps:$4 sm:$0xff]   ;;  %v1288_v5 = vld [vmem:[%s2008_s0 + $0xd4] ss:$8 sps:$4 sm:$0xff]   ;;  %v1290_v7 = vld [vmem:[%s2008_s0 + $0xd0] ss:$8 sps:$4 sm:$0xff]  }
  0x18   :  { %v1318_v6 = vld [vmem:[%s2008_s0 + $0x1d4] ss:$8 sps:$4 sm:$0xff]   ;;  %v1321_v10 = vld [vmem:[%s2008_s0 + $0x1e4] ss:$8 sps:$4 sm:$0xff]  }
  0x1a   :  { %539 = vmatpush1.bf16.msra.mxu0 %v1221_v8  ;;  %1203 = vmatpush1.bf16.msra.mxu1 %v1221_v8  ;;  %v1320_v8 = vld [vmem:[%s2008_s0 + $0x1d0] ss:$8 sps:$4 sm:$0xff]  }
  0x1b   :  { %540 = vmatprep.subr.bf16.mxu0 %v1327_v0  ;;  %1188 = vmatprep.subr.bf16.mxu1 %v1327_v0 }
  0x1e   :  { %541 = vmatpush1.bf16.msra.mxu0 %v1222_v9  ;;  %1204 = vmatpush1.bf16.msra.mxu1 %v1222_v9  ;;  %v1294_v9 = vld [vmem:[%s2008_s0 + $0xe4] ss:$8 sps:$4 sm:$0xff]  }
  0x1f   :  { %542 = vmatprep.subr.bf16.mxu0 %v1327_v0  ;;  %1189 = vmatprep.subr.bf16.mxu1 %v1327_v0 }
  0x22   :  { %543 = vmatpush1.bf16.msra.mxu0 %v1223_v11  ;;  %1205 = vmatpush1.bf16.msra.mxu1 %v1223_v11  ;;  %v1296_v11 = vld [vmem:[%s2008_s0 + $0xe0] ss:$8 sps:$4 sm:$0xff]  }
  0x23   :  { %544 = vmatprep.subr.bf16.mxu0 %v1327_v0  ;;  %1190 = vmatprep.subr.bf16.mxu1 %v1327_v0 }
  0x26   :  { %545 = vmatpush1.bf16.msra.mxu0 %v1224_v12  ;;  %1206 = vmatpush1.bf16.msra.mxu1 %v1224_v12  ;;  %v1323_v12 = vld [vmem:[%s2008_s0 + $0x1e0] ss:$8 sps:$4 sm:$0xff]  }
  0x27   :  { %546 = vmatprep.subr.bf16.mxu0 %v1327_v0  ;;  %1191 = vmatprep.subr.bf16.mxu1 %v1327_v0 }
  0x2a   :  { %547 = vmatpush1.bf16.msra.mxu0 %v1225_v13  ;;  %1207 = vmatpush1.bf16.msra.mxu1 %v1225_v13  ;;  %v1300_v13 = vld [vmem:[%s2008_s0 + $0xf4] ss:$8 sps:$4 sm:$0xff]  }
  0x2b   :  { %548 = vmatprep.subr.bf16.mxu0 %v1327_v0  ;;  %1192 = vmatprep.subr.bf16.mxu1 %v1327_v0 }
  0x2e   :  { %549 = vmatpush1.bf16.msra.mxu0 %v1226_v14  ;;  %1208 = vmatpush1.bf16.msra.mxu1 %v1226_v14  ;;  %v1324_v14 = vld [vmem:[%s2008_s0 + $0x1f4] ss:$8 sps:$4 sm:$0xff]  }
  0x2f   :  { %550 = vmatprep.subr.bf16.mxu0 %v1327_v0  ;;  %1193 = vmatprep.subr.bf16.mxu1 %v1327_v0 }
  0x32   :  { %551 = vmatpush1.bf16.msra.mxu0 %v1227_v15  ;;  %1209 = vmatpush1.bf16.msra.mxu1 %v1227_v15  ;;  %v1302_v15 = vld [vmem:[%s2008_s0 + $0xf0] ss:$8 sps:$4 sm:$0xff]  }
  0x33   :  { %552 = vmatprep.subr.bf16.mxu0 %v1327_v0  ;;  %1194 = vmatprep.subr.bf16.mxu1 %v1327_v0 }
  0x36   :  { %553 = vmatpush1.bf16.msra.mxu0 %v1228_v16  ;;  %1210 = vmatpush1.bf16.msra.mxu1 %v1228_v16  ;;  %v1326_v16 = vld [vmem:[%s2008_s0 + $0x1f0] ss:$8 sps:$4 sm:$0xff]  }
  0x37   :  { %554 = vmatprep.subr.bf16.mxu0 %v1327_v0  ;;  %1195 = vmatprep.subr.bf16.mxu1 %v1327_v0 }
  0x3a   :  { %555 = vmatpush1.bf16.msra.mxu0 %v1229_v17  ;;  %1211 = vmatpush1.bf16.msra.mxu1 %v1229_v17 }
  0x3b   :  { %556 = vmatprep.subr.bf16.mxu0 %v1327_v0  ;;  %1196 = vmatprep.subr.bf16.mxu1 %v1327_v0  ;;  %v1314_v0 = vld [vmem:[%s2008_s0 + $0x1b0] ss:$8 sps:$4 sm:$0xff]  }
  0x3e   :  { %557 = vmatpush1.bf16.msra.mxu0 %v1230_v18  ;;  %1212 = vmatpush1.bf16.msra.mxu1 %v1230_v18 }
  0x41   :  { %559 = vmatmul.mubr.bf16.vlgmr.msra.gmra.mrb[0].mxu0 %v1231_v19  ;;  %687 = vmatmul.mubr.bf16.vlgmr.msra.gmra.mrb[0].mxu1 %v1255_v20 }
  0x42   :  { %566 = vmatprep.mubr.bf16.mxu0 %v1234_v21  ;;  %694 = vmatprep.mubr.bf16.mxu1 %v1261_v22 }
  0x49   :  { %567 = vmatmul.mubr.bf16.gmra.mrb[4].mxu0 %v1236_v23  ;;  %695 = vmatmul.mubr.bf16.gmra.mrb[4].mxu1 %v1263_v24 }
  0x4a   :  { %574 = vmatprep.mubr.bf16.mxu0 %v1237_v25  ;;  %702 = vmatprep.mubr.bf16.mxu1 %v1267_v26 }
  0x51   :  { %575 = vmatmul.mubr.bf16.gmra.mrb[8].mxu0 %v1239_v27  ;;  %703 = vmatmul.mubr.bf16.gmra.mrb[8].mxu1 %v1269_v28 }
  0x52   :  { %582 = vmatprep.mubr.bf16.mxu0 %v1240_v29  ;;  %710 = vmatprep.mubr.bf16.mxu1 %v1273_v30 }
  0x59   :  { %583 = vmatmul.mubr.bf16.gmra.mrb[12].mxu0 %v1242_v31  ;;  %711 = vmatmul.mubr.bf16.gmra.mrb[12].mxu1 %v1275_v32 }
  0x5a   :  { %590 = vmatprep.mubr.bf16.mxu0 %v1243_v33  ;;  %718 = vmatprep.mubr.bf16.mxu1 %v1279_v34 }
  0x61   :  { %591 = vmatmul.mubr.bf16.gmra.mrb[16].mxu0 %v1245_v35  ;;  %719 = vmatmul.mubr.bf16.gmra.mrb[16].mxu1 %v1281_v36 }
  0x62   :  { %598 = vmatprep.mubr.bf16.mxu0 %v1246_v37  ;;  %726 = vmatprep.mubr.bf16.mxu1 %v1285_v38 }
  0x69   :  { %599 = vmatmul.mubr.bf16.gmra.mrb[20].mxu0 %v1248_v39  ;;  %727 = vmatmul.mubr.bf16.gmra.mrb[20].mxu1 %v1287_v40 }
  0x6a   :  { %606 = vmatprep.mubr.bf16.mxu0 %v1249_v41  ;;  %734 = vmatprep.mubr.bf16.mxu1 %v1291_v42 }
  0x71   :  { %607 = vmatmul.mubr.bf16.gmra.mrb[24].mxu0 %v1251_v43  ;;  %735 = vmatmul.mubr.bf16.gmra.mrb[24].mxu1 %v1293_v44 }
  0x72   :  { %614 = vmatprep.mubr.bf16.mxu0 %v1252_v45  ;;  %742 = vmatprep.mubr.bf16.mxu1 %v1297_v46 }
  0x79   :  { %615 = vmatmul.mubr.bf16.gmra.mrb[28].mxu0 %v1254_v47  ;;  %743 = vmatmul.mubr.bf16.gmra.mrb[28].mxu1 %v1299_v48 }
  0x7a   :  { %622 = vmatprep.mubr.bf16.mxu0 %v1258_v49  ;;  %750 = vmatprep.mubr.bf16.mxu1 %v1303_v50 }
  0x81   :  { %623 = vmatmul.mubr.bf16.gmra.mrb[32].mxu0 %v1260_v51  ;;  %751 = vmatmul.mubr.bf16.gmra.mrb[32].mxu1 %v1305_v52 }
  0x82   :  { %630 = vmatprep.mubr.bf16.mxu0 %v1264_v53  ;;  %758 = vmatprep.mubr.bf16.mxu1 %v1306_v54 }
  0x89   :  { %631 = vmatmul.mubr.bf16.gmra.mrb[36].mxu0 %v1266_v55  ;;  %759 = vmatmul.mubr.bf16.gmra.mrb[36].mxu1 %v1308_v56 }
  0x8a   :  { %638 = vmatprep.mubr.bf16.mxu0 %v1270_v57  ;;  %766 = vmatprep.mubr.bf16.mxu1 %v1309_v58 }
  0x91   :  { %639 = vmatmul.mubr.bf16.gmra.mrb[40].mxu0 %v1272_v59  ;;  %767 = vmatmul.mubr.bf16.gmra.mrb[40].mxu1 %v1311_v60 }
  0x92   :  { %646 = vmatprep.mubr.bf16.mxu0 %v1276_v61  ;;  %774 = vmatprep.mubr.bf16.mxu1 %v1312_v62 }
  0x99   :  { %647 = vmatmul.mubr.bf16.gmra.mrb[44].mxu0 %v1278_v63  ;;  %775 = vmatmul.mubr.bf16.gmra.mrb[44].mxu1 %v1314_v0 }
  0x9a   :  { %654 = vmatprep.mubr.bf16.mxu0 %v1282_v1  ;;  %782 = vmatprep.mubr.bf16.mxu1 %v1315_v2 }
  0xa1   :  { %655 = vmatmul.mubr.bf16.gmra.mrb[48].mxu0 %v1284_v3  ;;  %783 = vmatmul.mubr.bf16.gmra.mrb[48].mxu1 %v1317_v4 }
  0xa2   :  { %662 = vmatprep.mubr.bf16.mxu0 %v1288_v5  ;;  %790 = vmatprep.mubr.bf16.mxu1 %v1318_v6 }
  0xa9   :  { %663 = vmatmul.mubr.bf16.gmra.mrb[52].mxu0 %v1290_v7  ;;  %791 = vmatmul.mubr.bf16.gmra.mrb[52].mxu1 %v1320_v8 }
  0xaa   :  { %670 = vmatprep.mubr.bf16.mxu0 %v1294_v9  ;;  %798 = vmatprep.mubr.bf16.mxu1 %v1321_v10 }
  0xb1   :  { %671 = vmatmul.mubr.bf16.gmra.mrb[56].mxu0 %v1296_v11  ;;  %799 = vmatmul.mubr.bf16.gmra.mrb[56].mxu1 %v1323_v12 }
  0xb2   :  { %678 = vmatprep.mubr.bf16.mxu0 %v1300_v13  ;;  %806 = vmatprep.mubr.bf16.mxu1 %v1324_v14 }
  0xb9   :  { %679 = vmatmul.mubr.bf16.gmra.mrb[60].mxu0 %v1302_v15  ;;  %807 = vmatmul.mubr.bf16.gmra.mrb[60].mxu1 %v1326_v16 }
 0x114   :  { %v560_v17 = vpop.f32.mrb[0].mxu0  ;;  %v1620_v18 = vpop.f32.mrb[0].mxu1 }
 0x115   :  { %815 = vst [vmem:[%s2009_s2] sm:$0xff] %v560_v17  ;;  %v562_v19 = vpop.f32.mrb[1].mxu0  ;;  %847 = vst [vmem:[%s2009_s2 + $0x100] sm:$0xff] %v1620_v18  ;;  %v690_v20 = vpop.f32.mrb[1].mxu1  ;;  %v953_v23 = vmul.f32 %v560_v17, %v560_v17 }
 0x116   :  { %v563_v21 = vpop.f32.mrb[2].mxu0  ;;  %v1629_v22 = vpop.f32.mrb[2].mxu1 }
 0x117   :  { %816 = vst [vmem:[%s2009_s2 + $0x8] sm:$0xff] %v563_v21  ;;  %v884_v24 = vadd.f32 %v563_v21, %v560_v17  ;;  %v954_v25 = vmul.f32 %v563_v21, %v563_v21  ;;  %v565_v26 = vpop.f32.mrb[3].mxu0  ;;  %848 = vst [vmem:[%s2009_s2 + $0x108] sm:$0xff] %v1629_v22  ;;  %v693_v27 = vpop.f32.mrb[3].mxu1 }
 0x119   :  { %v1017_v28 = vadd.f32 %v954_v25, %v953_v23 }
 0x11c   :  { %v568_v29 = vpop.f32.mrb[4].mxu0  ;;  %v1638_v30 = vpop.f32.mrb[4].mxu1 }
 0x11d   :  { %817 = vst [vmem:[%s2009_s2 + $0x10] sm:$0xff] %v568_v29  ;;  %v885_v31 = vadd.f32 %v884_v24, %v568_v29  ;;  %v955_v32 = vmul.f32 %v568_v29, %v568_v29  ;;  %v570_v33 = vpop.f32.mrb[5].mxu0  ;;  %849 = vst [vmem:[%s2009_s2 + $0x110] sm:$0xff] %v1638_v30  ;;  %v698_v34 = vpop.f32.mrb[5].mxu1 }
 0x11e   :  { %v571_v35 = vpop.f32.mrb[6].mxu0  ;;  %v1647_v36 = vpop.f32.mrb[6].mxu1 }
 0x11f   :  { %v1018_v37 = vadd.f32 %v1017_v28, %v955_v32  ;;  %818 = vst [vmem:[%s2009_s2 + $0x18] sm:$0xff] %v571_v35  ;;  %v886_v38 = vadd.f32 %v885_v31, %v571_v35  ;;  %v956_v39 = vmul.f32 %v571_v35, %v571_v35  ;;  %v573_v40 = vpop.f32.mrb[7].mxu0  ;;  %850 = vst [vmem:[%s2009_s2 + $0x118] sm:$0xff] %v1647_v36  ;;  %v701_v41 = vpop.f32.mrb[7].mxu1 }
 0x121   :  { %v1019_v42 = vadd.f32 %v1018_v37, %v956_v39 }
 0x124   :  { %v576_v43 = vpop.f32.mrb[8].mxu0  ;;  %v1656_v44 = vpop.f32.mrb[8].mxu1 }
 0x125   :  { %819 = vst [vmem:[%s2009_s2 + $0x20] sm:$0xff] %v576_v43  ;;  %v887_v45 = vadd.f32 %v886_v38, %v576_v43  ;;  %v957_v46 = vmul.f32 %v576_v43, %v576_v43  ;;  %v578_v47 = vpop.f32.mrb[9].mxu0  ;;  %851 = vst [vmem:[%s2009_s2 + $0x120] sm:$0xff] %v1656_v44  ;;  %v706_v48 = vpop.f32.mrb[9].mxu1 }
 0x126   :  { %v579_v49 = vpop.f32.mrb[10].mxu0  ;;  %v1665_v50 = vpop.f32.mrb[10].mxu1 }
 0x127   :  { %v1020_v51 = vadd.f32 %v1019_v42, %v957_v46  ;;  %820 = vst [vmem:[%s2009_s2 + $0x28] sm:$0xff] %v579_v49  ;;  %v888_v52 = vadd.f32 %v887_v45, %v579_v49  ;;  %v958_v53 = vmul.f32 %v579_v49, %v579_v49  ;;  %v581_v54 = vpop.f32.mrb[11].mxu0  ;;  %852 = vst [vmem:[%s2009_s2 + $0x128] sm:$0xff] %v1665_v50  ;;  %v709_v55 = vpop.f32.mrb[11].mxu1 }
 0x129   :  { %v1021_v56 = vadd.f32 %v1020_v51, %v958_v53 }
 0x12c   :  { %v584_v57 = vpop.f32.mrb[12].mxu0  ;;  %v1674_v58 = vpop.f32.mrb[12].mxu1 }
 0x12d   :  { %821 = vst [vmem:[%s2009_s2 + $0x30] sm:$0xff] %v584_v57  ;;  %v889_v59 = vadd.f32 %v888_v52, %v584_v57  ;;  %v959_v60 = vmul.f32 %v584_v57, %v584_v57  ;;  %v586_v61 = vpop.f32.mrb[13].mxu0  ;;  %853 = vst [vmem:[%s2009_s2 + $0x130] sm:$0xff] %v1674_v58  ;;  %v714_v62 = vpop.f32.mrb[13].mxu1 }
 0x12e   :  { %v587_v63 = vpop.f32.mrb[14].mxu0  ;;  %v1683_v0 = vpop.f32.mrb[14].mxu1 }
 0x12f   :  { %v1022_v1 = vadd.f32 %v1021_v56, %v959_v60  ;;  %822 = vst [vmem:[%s2009_s2 + $0x38] sm:$0xff] %v587_v63  ;;  %v890_v2 = vadd.f32 %v889_v59, %v587_v63  ;;  %v960_v3 = vmul.f32 %v587_v63, %v587_v63  ;;  %v589_v4 = vpop.f32.mrb[15].mxu0  ;;  %854 = vst [vmem:[%s2009_s2 + $0x138] sm:$0xff] %v1683_v0  ;;  %v717_v5 = vpop.f32.mrb[15].mxu1 }
 0x131   :  { %v1023_v6 = vadd.f32 %v1022_v1, %v960_v3 }
 0x134   :  { %v592_v7 = vpop.f32.mrb[16].mxu0  ;;  %v1692_v8 = vpop.f32.mrb[16].mxu1 }
 0x135   :  { %823 = vst [vmem:[%s2009_s2 + $0x40] sm:$0xff] %v592_v7  ;;  %v891_v9 = vadd.f32 %v890_v2, %v592_v7  ;;  %v961_v10 = vmul.f32 %v592_v7, %v592_v7  ;;  %v594_v11 = vpop.f32.mrb[17].mxu0  ;;  %855 = vst [vmem:[%s2009_s2 + $0x140] sm:$0xff] %v1692_v8  ;;  %v722_v12 = vpop.f32.mrb[17].mxu1 }
 0x136   :  { %v595_v13 = vpop.f32.mrb[18].mxu0  ;;  %v1701_v14 = vpop.f32.mrb[18].mxu1 }
 0x137   :  { %v1024_v15 = vadd.f32 %v1023_v6, %v961_v10  ;;  %824 = vst [vmem:[%s2009_s2 + $0x48] sm:$0xff] %v595_v13  ;;  %v892_v16 = vadd.f32 %v891_v9, %v595_v13  ;;  %v962_v17 = vmul.f32 %v595_v13, %v595_v13  ;;  %v597_v19 = vpop.f32.mrb[19].mxu0  ;;  %856 = vst [vmem:[%s2009_s2 + $0x148] sm:$0xff] %v1701_v14  ;;  %v725_v20 = vpop.f32.mrb[19].mxu1 }
 0x139   :  { %v1025_v21 = vadd.f32 %v1024_v15, %v962_v17 }
 0x13c   :  { %v600_v23 = vpop.f32.mrb[20].mxu0  ;;  %v1710_v24 = vpop.f32.mrb[20].mxu1 }
 0x13d   :  { %825 = vst [vmem:[%s2009_s2 + $0x50] sm:$0xff] %v600_v23  ;;  %v893_v25 = vadd.f32 %v892_v16, %v600_v23  ;;  %v963_v26 = vmul.f32 %v600_v23, %v600_v23  ;;  %v602_v27 = vpop.f32.mrb[21].mxu0  ;;  %857 = vst [vmem:[%s2009_s2 + $0x150] sm:$0xff] %v1710_v24  ;;  %v730_v28 = vpop.f32.mrb[21].mxu1 }
 0x13e   :  { %v603_v29 = vpop.f32.mrb[22].mxu0  ;;  %v1719_v31 = vpop.f32.mrb[22].mxu1 }
 0x13f   :  { %v1026_v32 = vadd.f32 %v1025_v21, %v963_v26  ;;  %826 = vst [vmem:[%s2009_s2 + $0x58] sm:$0xff] %v603_v29  ;;  %v894_v33 = vadd.f32 %v893_v25, %v603_v29  ;;  %v964_v34 = vmul.f32 %v603_v29, %v603_v29  ;;  %v605_v35 = vpop.f32.mrb[23].mxu0  ;;  %858 = vst [vmem:[%s2009_s2 + $0x158] sm:$0xff] %v1719_v31  ;;  %v733_v37 = vpop.f32.mrb[23].mxu1 }
 0x141   :  { %v1027_v38 = vadd.f32 %v1026_v32, %v964_v34 }
 0x144   :  { %v608_v39 = vpop.f32.mrb[24].mxu0  ;;  %v1728_v40 = vpop.f32.mrb[24].mxu1 }
 0x145   :  { %827 = vst [vmem:[%s2009_s2 + $0x60] sm:$0xff] %v608_v39  ;;  %v895_v41 = vadd.f32 %v894_v33, %v608_v39  ;;  %v965_v42 = vmul.f32 %v608_v39, %v608_v39  ;;  %v610_v43 = vpop.f32.mrb[25].mxu0  ;;  %859 = vst [vmem:[%s2009_s2 + $0x160] sm:$0xff] %v1728_v40  ;;  %v738_v45 = vpop.f32.mrb[25].mxu1 }
 0x146   :  { %v611_v46 = vpop.f32.mrb[26].mxu0  ;;  %v1737_v47 = vpop.f32.mrb[26].mxu1 }
 0x147   :  { %v1028_v48 = vadd.f32 %v1027_v38, %v965_v42  ;;  %828 = vst [vmem:[%s2009_s2 + $0x68] sm:$0xff] %v611_v46  ;;  %v896_v49 = vadd.f32 %v895_v41, %v611_v46  ;;  %v966_v51 = vmul.f32 %v611_v46, %v611_v46  ;;  %v613_v52 = vpop.f32.mrb[27].mxu0  ;;  %860 = vst [vmem:[%s2009_s2 + $0x168] sm:$0xff] %v1737_v47  ;;  %v741_v53 = vpop.f32.mrb[27].mxu1 }
 0x149   :  { %v1029_v54 = vadd.f32 %v1028_v48, %v966_v51 }
 0x14c   :  { %v616_v55 = vpop.f32.mrb[28].mxu0  ;;  %v1746_v56 = vpop.f32.mrb[28].mxu1 }
 0x14d   :  { %829 = vst [vmem:[%s2009_s2 + $0x70] sm:$0xff] %v616_v55  ;;  %v897_v57 = vadd.f32 %v896_v49, %v616_v55  ;;  %v967_v59 = vmul.f32 %v616_v55, %v616_v55  ;;  %v618_v60 = vpop.f32.mrb[29].mxu0  ;;  %861 = vst [vmem:[%s2009_s2 + $0x170] sm:$0xff] %v1746_v56  ;;  %v746_v61 = vpop.f32.mrb[29].mxu1 }
 0x14e   :  { %v619_v62 = vpop.f32.mrb[30].mxu0  ;;  %v1755_v63 = vpop.f32.mrb[30].mxu1 }
 0x14f   :  { %v1030_v1 = vadd.f32 %v1029_v54, %v967_v59  ;;  %830 = vst [vmem:[%s2009_s2 + $0x78] sm:$0xff] %v619_v62  ;;  %v898_v2 = vadd.f32 %v897_v57, %v619_v62  ;;  %v968_v3 = vmul.f32 %v619_v62, %v619_v62  ;;  %v621_v4 = vpop.f32.mrb[31].mxu0  ;;  %862 = vst [vmem:[%s2009_s2 + $0x178] sm:$0xff] %v1755_v63  ;;  %v749_v5 = vpop.f32.mrb[31].mxu1 }
 0x151   :  { %v1031_v6 = vadd.f32 %v1030_v1, %v968_v3 }
 0x154   :  { %v624_v7 = vpop.f32.mrb[32].mxu0  ;;  %v1764_v9 = vpop.f32.mrb[32].mxu1 }
 0x155   :  { %831 = vst [vmem:[%s2009_s2 + $0x80] sm:$0xff] %v624_v7  ;;  %v899_v10 = vadd.f32 %v898_v2, %v624_v7  ;;  %v969_v11 = vmul.f32 %v624_v7, %v624_v7  ;;  %v626_v12 = vpop.f32.mrb[33].mxu0  ;;  %863 = vst [vmem:[%s2009_s2 + $0x180] sm:$0xff] %v1764_v9  ;;  %v754_v13 = vpop.f32.mrb[33].mxu1 }
 0x156   :  { %v627_v15 = vpop.f32.mrb[34].mxu0  ;;  %v1773_v16 = vpop.f32.mrb[34].mxu1 }
 0x157   :  { %v1032_v17 = vadd.f32 %v1031_v6, %v969_v11  ;;  %832 = vst [vmem:[%s2009_s2 + $0x88] sm:$0xff] %v627_v15  ;;  %v900_v19 = vadd.f32 %v899_v10, %v627_v15  ;;  %v970_v20 = vmul.f32 %v627_v15, %v627_v15  ;;  %v629_v21 = vpop.f32.mrb[35].mxu0  ;;  %864 = vst [vmem:[%s2009_s2 + $0x188] sm:$0xff] %v1773_v16  ;;  %v757_v23 = vpop.f32.mrb[35].mxu1 }
 0x159   :  { %v1033_v25 = vadd.f32 %v1032_v17, %v970_v20 }
 0x15c   :  { %v632_v26 = vpop.f32.mrb[36].mxu0  ;;  %v1782_v27 = vpop.f32.mrb[36].mxu1 }
 0x15d   :  { %833 = vst [vmem:[%s2009_s2 + $0x90] sm:$0xff] %v632_v26  ;;  %v901_v28 = vadd.f32 %v900_v19, %v632_v26  ;;  %v971_v29 = vmul.f32 %v632_v26, %v632_v26  ;;  %v634_v32 = vpop.f32.mrb[37].mxu0  ;;  %865 = vst [vmem:[%s2009_s2 + $0x190] sm:$0xff] %v1782_v27  ;;  %v762_v33 = vpop.f32.mrb[37].mxu1 }
 0x15e   :  { %v635_v34 = vpop.f32.mrb[38].mxu0  ;;  %v1791_v35 = vpop.f32.mrb[38].mxu1 }
 0x15f   :  { %v1034_v37 = vadd.f32 %v1033_v25, %v971_v29  ;;  %834 = vst [vmem:[%s2009_s2 + $0x98] sm:$0xff] %v635_v34  ;;  %v902_v38 = vadd.f32 %v901_v28, %v635_v34  ;;  %v972_v39 = vmul.f32 %v635_v34, %v635_v34  ;;  %v637_v41 = vpop.f32.mrb[39].mxu0  ;;  %866 = vst [vmem:[%s2009_s2 + $0x198] sm:$0xff] %v1791_v35  ;;  %v765_v42 = vpop.f32.mrb[39].mxu1 }
 0x161   :  { %v1035_v43 = vadd.f32 %v1034_v37, %v972_v39 }
 0x164   :  { %v640_v45 = vpop.f32.mrb[40].mxu0  ;;  %v1800_v46 = vpop.f32.mrb[40].mxu1 }
 0x165   :  { %835 = vst [vmem:[%s2009_s2 + $0xa0] sm:$0xff] %v640_v45  ;;  %v903_v48 = vadd.f32 %v902_v38, %v640_v45  ;;  %v973_v49 = vmul.f32 %v640_v45, %v640_v45  ;;  %v642_v51 = vpop.f32.mrb[41].mxu0  ;;  %867 = vst [vmem:[%s2009_s2 + $0x1a0] sm:$0xff] %v1800_v46  ;;  %v770_v52 = vpop.f32.mrb[41].mxu1 }
 0x166   :  { %v643_v53 = vpop.f32.mrb[42].mxu0  ;;  %v1809_v54 = vpop.f32.mrb[42].mxu1 }
 0x167   :  { %v1036_v55 = vadd.f32 %v1035_v43, %v973_v49  ;;  %836 = vst [vmem:[%s2009_s2 + $0xa8] sm:$0xff] %v643_v53  ;;  %v904_v57 = vadd.f32 %v903_v48, %v643_v53  ;;  %v974_v59 = vmul.f32 %v643_v53, %v643_v53  ;;  %v645_v60 = vpop.f32.mrb[43].mxu0  ;;  %868 = vst [vmem:[%s2009_s2 + $0x1a8] sm:$0xff] %v1809_v54  ;;  %v773_v61 = vpop.f32.mrb[43].mxu1 }
 0x169   :  { %v1037_v62 = vadd.f32 %v1036_v55, %v974_v59 }
 0x16c   :  { %v648_v1 = vpop.f32.mrb[44].mxu0  ;;  %v1818_v2 = vpop.f32.mrb[44].mxu1 }
 0x16d   :  { %837 = vst [vmem:[%s2009_s2 + $0xb0] sm:$0xff] %v648_v1  ;;  %v905_v3 = vadd.f32 %v904_v57, %v648_v1  ;;  %v975_v4 = vmul.f32 %v648_v1, %v648_v1  ;;  %v650_v5 = vpop.f32.mrb[45].mxu0  ;;  %869 = vst [vmem:[%s2009_s2 + $0x1b0] sm:$0xff] %v1818_v2  ;;  %v778_v6 = vpop.f32.mrb[45].mxu1 }
 0x16e   :  { %v651_v7 = vpop.f32.mrb[46].mxu0  ;;  %v1827_v10 = vpop.f32.mrb[46].mxu1 }
 0x16f   :  { %v1038_v11 = vadd.f32 %v1037_v62, %v975_v4  ;;  %838 = vst [vmem:[%s2009_s2 + $0xb8] sm:$0xff] %v651_v7  ;;  %v906_v12 = vadd.f32 %v905_v3, %v651_v7  ;;  %v976_v13 = vmul.f32 %v651_v7, %v651_v7  ;;  %v653_v15 = vpop.f32.mrb[47].mxu0  ;;  %870 = vst [vmem:[%s2009_s2 + $0x1b8] sm:$0xff] %v1827_v10  ;;  %v781_v17 = vpop.f32.mrb[47].mxu1 }
 0x171   :  { %v1039_v19 = vadd.f32 %v1038_v11, %v976_v13 }
 0x174   :  { %v656_v20 = vpop.f32.mrb[48].mxu0  ;;  %v1836_v21 = vpop.f32.mrb[48].mxu1 }
 0x175   :  { %839 = vst [vmem:[%s2009_s2 + $0xc0] sm:$0xff] %v656_v20  ;;  %v907_v23 = vadd.f32 %v906_v12, %v656_v20  ;;  %v977_v25 = vmul.f32 %v656_v20, %v656_v20  ;;  %v658_v26 = vpop.f32.mrb[49].mxu0  ;;  %871 = vst [vmem:[%s2009_s2 + $0x1c0] sm:$0xff] %v1836_v21  ;;  %v786_v28 = vpop.f32.mrb[49].mxu1 }
 0x176   :  { %v659_v29 = vpop.f32.mrb[50].mxu0  ;;  %v1845_v32 = vpop.f32.mrb[50].mxu1 }
 0x177   :  { %v1040_v33 = vadd.f32 %v1039_v19, %v977_v25  ;;  %840 = vst [vmem:[%s2009_s2 + $0xc8] sm:$0xff] %v659_v29  ;;  %v908_v34 = vadd.f32 %v907_v23, %v659_v29  ;;  %v978_v37 = vmul.f32 %v659_v29, %v659_v29  ;;  %v661_v38 = vpop.f32.mrb[51].mxu0  ;;  %872 = vst [vmem:[%s2009_s2 + $0x1c8] sm:$0xff] %v1845_v32  ;;  %v789_v39 = vpop.f32.mrb[51].mxu1 }
 0x179   :  { %v1041_v41 = vadd.f32 %v1040_v33, %v978_v37 }
 0x17c   :  { %v664_v42 = vpop.f32.mrb[52].mxu0  ;;  %v1854_v43 = vpop.f32.mrb[52].mxu1 }
 0x17d   :  { %841 = vst [vmem:[%s2009_s2 + $0xd0] sm:$0xff] %v664_v42  ;;  %v909_v45 = vadd.f32 %v908_v34, %v664_v42  ;;  %v979_v48 = vmul.f32 %v664_v42, %v664_v42  ;;  %v666_v49 = vpop.f32.mrb[53].mxu0  ;;  %873 = vst [vmem:[%s2009_s2 + $0x1d0] sm:$0xff] %v1854_v43  ;;  %v794_v51 = vpop.f32.mrb[53].mxu1 }
 0x17e   :  { %v667_v52 = vpop.f32.mrb[54].mxu0  ;;  %v1863_v53 = vpop.f32.mrb[54].mxu1  ;;  %v985_v49 = vmul.f32 %v1620_v18, %v1620_v18 }
 0x17f   :  { %v1042_v55 = vadd.f32 %v1041_v41, %v979_v48  ;;  %842 = vst [vmem:[%s2009_s2 + $0xd8] sm:$0xff] %v667_v52  ;;  %v910_v57 = vadd.f32 %v909_v45, %v667_v52  ;;  %v980_v59 = vmul.f32 %v667_v52, %v667_v52  ;;  %v669_v60 = vpop.f32.mrb[55].mxu0  ;;  %874 = vst [vmem:[%s2009_s2 + $0x1d8] sm:$0xff] %v1863_v53  ;;  %v797_v61 = vpop.f32.mrb[55].mxu1 }
 0x180   :  { %v987_v60 = vmul.f32 %v1638_v30, %v1638_v30 }
 0x181   :  { %v1043_v62 = vadd.f32 %v1042_v55, %v980_v59  ;;  %v986_v55 = vmul.f32 %v1629_v22, %v1629_v22 }
 0x184   :  { %v672_v1 = vpop.f32.mrb[56].mxu0  ;;  %v1872_v3 = vpop.f32.mrb[56].mxu1 }
 0x185   :  { %843 = vst [vmem:[%s2009_s2 + $0xe0] sm:$0xff] %v672_v1  ;;  %v911_v4 = vadd.f32 %v910_v57, %v672_v1  ;;  %v981_v5 = vmul.f32 %v672_v1, %v672_v1  ;;  %v674_v6 = vpop.f32.mrb[57].mxu0  ;;  %875 = vst [vmem:[%s2009_s2 + $0x1e0] sm:$0xff] %v1872_v3  ;;  %v802_v7 = vpop.f32.mrb[57].mxu1  ;;  %v988_v1 = vmul.f32 %v1647_v36, %v1647_v36 }
 0x186   :  { %v675_v11 = vpop.f32.mrb[58].mxu0  ;;  %v1881_v12 = vpop.f32.mrb[58].mxu1 }
 0x187   :  { %v1044_v13 = vadd.f32 %v1043_v62, %v981_v5  ;;  %844 = vst [vmem:[%s2009_s2 + $0xe8] sm:$0xff] %v675_v11  ;;  %v912_v15 = vadd.f32 %v911_v4, %v675_v11  ;;  %v982_v17 = vmul.f32 %v675_v11, %v675_v11  ;;  %v677_v19 = vpop.f32.mrb[59].mxu0  ;;  %876 = vst [vmem:[%s2009_s2 + $0x1e8] sm:$0xff] %v1881_v12  ;;  %v805_v20 = vpop.f32.mrb[59].mxu1 }
 0x189   :  { %v1045_v23 = vadd.f32 %v1044_v13, %v982_v17 }
 0x18c   :  { %v680_v25 = vpop.f32.mrb[60].mxu0  ;;  %v1890_v26 = vpop.f32.mrb[60].mxu1 }
 0x18d   :  { %845 = vst [vmem:[%s2009_s2 + $0xf0] sm:$0xff] %v680_v25  ;;  %v913_v28 = vadd.f32 %v912_v15, %v680_v25  ;;  %v983_v29 = vmul.f32 %v680_v25, %v680_v25  ;;  %v682_v33 = vpop.f32.mrb[61].mxu0  ;;  %877 = vst [vmem:[%s2009_s2 + $0x1f0] sm:$0xff] %v1890_v26  ;;  %v810_v34 = vpop.f32.mrb[61].mxu1 }
 0x18e   :  { %v683_v37 = vpop.f32.mrb[62].mxu0  ;;  %v1899_v38 = vpop.f32.mrb[62].mxu1 }
 0x18f   :  { %v1046_v39 = vadd.f32 %v1045_v23, %v983_v29  ;;  %846 = vst [vmem:[%s2009_s2 + $0xf8] sm:$0xff] %v683_v37  ;;  %v914_v41 = vadd.f32 %v913_v28, %v683_v37  ;;  %v984_v42 = vmul.f32 %v683_v37, %v683_v37  ;;  %v685_v45 = vpop.f32.mrb[63].mxu0  ;;  %878 = vst [vmem:[%s2009_s2 + $0x1f8] sm:$0xff] %v1899_v38  ;;  %v813_v48 = vpop.f32.mrb[63].mxu1 }
 0x191   :  { %v915_v51 = vadd.f32 %v914_v41, %v1620_v18  ;;  %v1047_v52 = vadd.f32 %v1046_v39, %v984_v42  ;;  %v989_v18 = vmul.f32 %v1656_v44, %v1656_v44 }
 0x193   :  { %v916_v57 = vadd.f32 %v915_v51, %v1629_v22  ;;  %v1048_v59 = vadd.f32 %v1047_v52, %v985_v49  ;;  %v990_v22 = vmul.f32 %v1665_v50, %v1665_v50 }
 0x195   :  { %v917_v61 = vadd.f32 %v916_v57, %v1638_v30  ;;  %v1049_v62 = vadd.f32 %v1048_v59, %v986_v55  ;;  %v991_v30 = vmul.f32 %v1674_v58, %v1674_v58  ;;  %v1001_v57 = vmul.f32 %v1764_v9, %v1764_v9 }
 0x197   :  { %v918_v4 = vadd.f32 %v917_v61, %v1647_v36  ;;  %v1050_v5 = vadd.f32 %v1049_v62, %v987_v60  ;;  %v992_v36 = vmul.f32 %v1683_v0, %v1683_v0  ;;  %v1002_v61 = vmul.f32 %v1773_v16, %v1773_v16 }
 0x199   :  { %v919_v6 = vadd.f32 %v918_v4, %v1656_v44  ;;  %v1051_v7 = vadd.f32 %v1050_v5, %v988_v1  ;;  %v993_v44 = vmul.f32 %v1692_v8, %v1692_v8  ;;  %v1003_v1 = vmul.f32 %v1782_v27, %v1782_v27 }
 0x19a   :  { %v1004_v5 = vmul.f32 %v1791_v35, %v1791_v35 }
 0x19b   :  { %v920_v11 = vadd.f32 %v919_v6, %v1665_v50  ;;  %v1052_v13 = vadd.f32 %v1051_v7, %v989_v18  ;;  %v994_v50 = vmul.f32 %v1701_v14, %v1701_v14  ;;  %v1005_v6 = vmul.f32 %v1800_v46, %v1800_v46 }
 0x19d   :  { %v921_v15 = vadd.f32 %v920_v11, %v1674_v58  ;;  %v1053_v17 = vadd.f32 %v1052_v13, %v990_v22  ;;  %v995_v58 = vmul.f32 %v1710_v24, %v1710_v24  ;;  %v1006_v22 = vmul.f32 %v1809_v54, %v1809_v54 }
 0x19e   :  { %v1007_v13 = vmul.f32 %v1818_v2, %v1818_v2 }
 0x19f   :  { %v922_v19 = vadd.f32 %v921_v15, %v1683_v0  ;;  %v1054_v20 = vadd.f32 %v1053_v17, %v991_v30  ;;  %v996_v0 = vmul.f32 %v1719_v31, %v1719_v31  ;;  %v1008_v15 = vmul.f32 %v1827_v10, %v1827_v10 }
 0x1a1   :  { %v1055_v23 = vadd.f32 %v1054_v20, %v992_v36  ;;  %v923_v25 = vadd.f32 %v922_v19, %v1692_v8  ;;  %v997_v8 = vmul.f32 %v1728_v40, %v1728_v40  ;;  %v1009_v36 = vmul.f32 %v1836_v21, %v1836_v21 }
 0x1a2   :  { %v1010_v20 = vmul.f32 %v1845_v32, %v1845_v32 }
 0x1a3   :  { %v924_v28 = vadd.f32 %v923_v25, %v1701_v14  ;;  %v1056_v29 = vadd.f32 %v1055_v23, %v993_v44  ;;  %v998_v14 = vmul.f32 %v1737_v47, %v1737_v47  ;;  %v1011_v23 = vmul.f32 %v1854_v43, %v1854_v43 }
 0x1a5   :  { %v925_v33 = vadd.f32 %v924_v28, %v1710_v24  ;;  %v1057_v34 = vadd.f32 %v1056_v29, %v994_v50  ;;  %v999_v24 = vmul.f32 %v1746_v56, %v1746_v56  ;;  %v1012_v50 = vmul.f32 %v1863_v53, %v1863_v53 }
 0x1a6   :  { %v1013_v29 = vmul.f32 %v1872_v3, %v1872_v3 }
 0x1a7   :  { %v926_v37 = vadd.f32 %v925_v33, %v1719_v31  ;;  %v1058_v39 = vadd.f32 %v1057_v34, %v995_v58  ;;  %v1000_v31 = vmul.f32 %v1755_v63, %v1755_v63  ;;  %v1014_v33 = vmul.f32 %v1881_v12, %v1881_v12 }
 0x1a9   :  { %v927_v41 = vadd.f32 %v926_v37, %v1728_v40  ;;  %v1059_v42 = vadd.f32 %v1058_v39, %v996_v0  ;;  %v1016_v39 = vmul.f32 %v1899_v38, %v1899_v38 }
 0x1ab   :  { %v928_v45 = vadd.f32 %v927_v41, %v1737_v47  ;;  %v1060_v48 = vadd.f32 %v1059_v42, %v997_v8 }
 0x1ad   :  { %v929_v49 = vadd.f32 %v928_v45, %v1746_v56  ;;  %v1061_v51 = vadd.f32 %v1060_v48, %v998_v14 }
 0x1af   :  { %v930_v52 = vadd.f32 %v929_v49, %v1755_v63  ;;  %v1062_v55 = vadd.f32 %v1061_v51, %v999_v24 }
 0x1b1   :  { %v931_v40 = vadd.f32 %v930_v52, %v1764_v9  ;;  %v1063_v59 = vadd.f32 %v1062_v55, %v1000_v31 }
 0x1b3   :  { %v1064_v47 = vadd.f32 %v1063_v59, %v1001_v57  ;;  %v932_v60 = vadd.f32 %v931_v40, %v1773_v16 }
 0x1b5   :  { %v1065_v56 = vadd.f32 %v1064_v47, %v1002_v61  ;;  %v933_v62 = vadd.f32 %v932_v60, %v1782_v27 }
 0x1b7   :  { %v1066_v63 = vadd.f32 %v1065_v56, %v1003_v1  ;;  %v934_v4 = vadd.f32 %v933_v62, %v1791_v35 }
 0x1b9   :  { %v1067_v9 = vadd.f32 %v1066_v63, %v1004_v5  ;;  %v935_v18 = vadd.f32 %v934_v4, %v1800_v46 }
 0x1bb   :  { %v1068_v7 = vadd.f32 %v1067_v9, %v1005_v6  ;;  %v936_v16 = vadd.f32 %v935_v18, %v1809_v54 }
 0x1bd   :  { %v1069_v11 = vadd.f32 %v1068_v7, %v1006_v22  ;;  %v937_v27 = vadd.f32 %v936_v16, %v1818_v2 }
 0x1bf   :  { %v1070_v30 = vadd.f32 %v1069_v11, %v1007_v13  ;;  %v938_v35 = vadd.f32 %v937_v27, %v1827_v10 }
 0x1c1   :  { %v1071_v17 = vadd.f32 %v1070_v30, %v1008_v15  ;;  %v939_v46 = vadd.f32 %v938_v35, %v1836_v21 }
 0x1c3   :  { %v1072_v19 = vadd.f32 %v1071_v17, %v1009_v36  ;;  %v940_v54 = vadd.f32 %v939_v46, %v1845_v32 }
 0x1c5   :  { %v1073_v44 = vadd.f32 %v1072_v19, %v1010_v20  ;;  %v941_v2 = vadd.f32 %v940_v54, %v1854_v43  ;;  %v1015_v43 = vmul.f32 %v1890_v26, %v1890_v26 }
 0x1c7   :  { %v1074_v25 = vadd.f32 %v1073_v44, %v1011_v23  ;;  %v942_v10 = vadd.f32 %v941_v2, %v1863_v53 }
 0x1c9   :  { %v1075_v28 = vadd.f32 %v1074_v25, %v1012_v50  ;;  %v943_v21 = vadd.f32 %v942_v10, %v1872_v3 }
 0x1cb   :  { %v1076_v58 = vadd.f32 %v1075_v28, %v1013_v29  ;;  %v944_v32 = vadd.f32 %v943_v21, %v1881_v12 }
 0x1cd   :  { %v1077_v34 = vadd.f32 %v1076_v58, %v1014_v33  ;;  %v945_v0 = vadd.f32 %v944_v32, %v1890_v26 }
 0x1cf   :  { %v1078_v37 = vadd.f32 %v1077_v34, %v1015_v43  ;;  %v946_v53 = vadd.f32 %v945_v0, %v1899_v38 }
 0x1d1   :  { %v947_v8 = vrot.slane %v946_v53, 4  ;;  %v1079_v3 = vadd.f32 %v1078_v37, %v1016_v39 }
 0x1d3   :  { %v948_v41 = vadd.f32 %v947_v8, %v946_v53  ;;  %v1080_v42 = vrot.slane %v1079_v3, 4 }
 0x1d5   :  { %v949_v14 = vrot.slane %v948_v41, 2  ;;  %v1081_v45 = vadd.f32 %v1080_v42, %v1079_v3 }
 0x1d7   :  { %v950_v48 = vadd.f32 %v949_v14, %v948_v41  ;;  %v1082_v12 = vrot.slane %v1081_v45, 2 }
 0x1d9   :  { %v951_v24 = vrot.slane %v950_v48, 1  ;;  %v1083_v49 = vadd.f32 %v1082_v12, %v1081_v45 }
 0x1db   :  { %v1084_v51 = vrot.slane %v1083_v49, 1  ;;  %v952_v31 = vadd.f32 %v951_v24, %v950_v48 }
 0x1dd   :  { %v1085_v26 = vadd.f32 %v1084_v51, %v1083_v49 }
 0x1df   :  { %v1087_v52 = vsel %vm1086_vm0, %v952_v31, %v1085_v26 }
 0x1e0   :  { %v1089_v55 = vsel %vm1088_vm1, %v1087_v52, 0.0 }
 0x1e1   :  { %1092 = vst [vmem:[%s2010_s3] sm:$0xff] %v1089_v55 }

// kernel: albedo_resnet_generator.22
= control target key start
LH: loop header
LB: loop body
LE: loop exit
PB: predicated region body
PF: predicated region fallthrough
CT: control target
= control target key end

     0   :  { %vm318_vm0 = vcmask 1040384   ;;  %vm320_vm1 = vcmask 1041408   ;;  %s549_s1 = inlined_call_operand.vmem [shape: bf16[128,128], index: 1, kind: input, shape index: {}]   ;;  %s550_s0 = inlined_call_operand.vmem [shape: bf16[128,128], index: 0, kind: input, shape index: {}]   ;;  %s551_s2 = inlined_call_operand.vmem [shape: f32[128,128], index: 2, kind: output, shape index: {0}]   ;;  %s552_s3 = inlined_call_operand.vmem [shape: f32[8,128], index: 3, kind: output, shape index: {1}]  }
   0x1   :  { %v414_v0 = vld [vmem:[%s549_s1] sm:$0xff]   ;;  %v415_v1 = vld [vmem:[%s549_s1 + $0x8] sm:$0xff]   ;;  %v416_v2 = vld [vmem:[%s549_s1 + $0x10] sm:$0xff]  }
   0x2   :  { %365 = vmatprep.subr.bf16.mxu0 %v414_v0  ;;  %397 = vmatprep.subr.bf16.mxu1 %v414_v0  ;;  %v417_v3 = vld [vmem:[%s549_s1 + $0x18] sm:$0xff]   ;;  %v422_v4 = vld [vmem:[%s550_s0] sm:$0xff]   ;;  %v419_v7 = vld [vmem:[%s549_s1 + $0x28] sm:$0xff]  }
   0x3   :  { %366 = vmatpush3.bf16.msra.mxu0 %v414_v0  ;;  %405 = vmatpush3.bf16.msra.mxu1 %v414_v0  ;;  %v418_v5 = vld [vmem:[%s549_s1 + $0x20] sm:$0xff]   ;;  %v420_v8 = vld [vmem:[%s549_s1 + $0x30] sm:$0xff]   ;;  %v421_v9 = vld [vmem:[%s549_s1 + $0x38] sm:$0xff]  }
   0x4   :  { %367 = vmatprep.subr.bf16.mxu0 %v415_v1  ;;  %398 = vmatprep.subr.bf16.mxu1 %v415_v1  ;;  %v426_v6 = vld [vmem:[%s550_s0 + $0x20] sm:$0xff]   ;;  %v423_v10 = vld [vmem:[%s550_s0 + $0x8] sm:$0xff]   ;;  %v424_v12 = vld [vmem:[%s550_s0 + $0x10] sm:$0xff]  }
   0x5   :  { %381 = vmatprep.mubr.bf16.mxu0 %v422_v4  ;;  %389 = vmatprep.mubr.bf16.mxu1 %v426_v6  ;;  %v427_v11 = vld [vmem:[%s550_s0 + $0x28] sm:$0xff]   ;;  %v428_v13 = vld [vmem:[%s550_s0 + $0x30] sm:$0xff]   ;;  %v425_v14 = vld [vmem:[%s550_s0 + $0x18] sm:$0xff]  }
   0x6   :  { %v429_v15 = vld [vmem:[%s550_s0 + $0x38] sm:$0xff]  }
   0x7   :  { %368 = vmatpush3.bf16.msra.mxu0 %v415_v1  ;;  %406 = vmatpush3.bf16.msra.mxu1 %v415_v1 }
   0x8   :  { %369 = vmatprep.subr.bf16.mxu0 %v416_v2  ;;  %399 = vmatprep.subr.bf16.mxu1 %v416_v2 }
   0xb   :  { %370 = vmatpush3.bf16.msra.mxu0 %v416_v2  ;;  %407 = vmatpush3.bf16.msra.mxu1 %v416_v2 }
   0xc   :  { %371 = vmatprep.subr.bf16.mxu0 %v417_v3  ;;  %400 = vmatprep.subr.bf16.mxu1 %v417_v3 }
   0xf   :  { %372 = vmatpush3.bf16.msra.mxu0 %v417_v3  ;;  %408 = vmatpush3.bf16.msra.mxu1 %v417_v3 }
  0x10   :  { %373 = vmatprep.subr.bf16.mxu0 %v418_v5  ;;  %401 = vmatprep.subr.bf16.mxu1 %v418_v5 }
  0x13   :  { %374 = vmatpush3.bf16.msra.mxu0 %v418_v5  ;;  %409 = vmatpush3.bf16.msra.mxu1 %v418_v5 }
  0x14   :  { %375 = vmatprep.subr.bf16.mxu0 %v419_v7  ;;  %402 = vmatprep.subr.bf16.mxu1 %v419_v7 }
  0x17   :  { %376 = vmatpush3.bf16.msra.mxu0 %v419_v7  ;;  %410 = vmatpush3.bf16.msra.mxu1 %v419_v7 }
  0x18   :  { %377 = vmatprep.subr.bf16.mxu0 %v420_v8  ;;  %403 = vmatprep.subr.bf16.mxu1 %v420_v8 }
  0x1b   :  { %378 = vmatpush3.bf16.msra.mxu0 %v420_v8  ;;  %411 = vmatpush3.bf16.msra.mxu1 %v420_v8 }
  0x1c   :  { %379 = vmatprep.subr.bf16.mxu0 %v421_v9  ;;  %404 = vmatprep.subr.bf16.mxu1 %v421_v9 }
  0x1f   :  { %380 = vmatpush3.bf16.msra.mxu0 %v421_v9  ;;  %412 = vmatpush3.bf16.msra.mxu1 %v421_v9 }
  0x22   :  { %382 = vmatmul.mubr.bf16.vlgmr.msra.gmra.mrb[0].mxu0 %v423_v10  ;;  %390 = vmatmul.mubr.bf16.vlgmr.msra.gmra.mrb[0].mxu1 %v427_v11 }
  0x23   :  { %385 = vmatprep.mubr.bf16.mxu0 %v424_v12  ;;  %393 = vmatprep.mubr.bf16.mxu1 %v428_v13 }
  0x2a   :  { %386 = vmatmul.mubr.bf16.gmra.mrb[4].mxu0 %v425_v14  ;;  %394 = vmatmul.mubr.bf16.gmra.mrb[4].mxu1 %v429_v15 }
  0xf5   :  { %v383_v16 = vpop.f32.mrb[0].mxu0  ;;  %v391_v17 = vpop.f32.mrb[0].mxu1 }
  0xf6   :  { %241 = vst [vmem:[%s551_s2 + $0x10] sm:$0xff] %v383_v16  ;;  %v176_v18 = vpop.f32.mrb[1].mxu0  ;;  %249 = vst [vmem:[%s551_s2 + $0x50] sm:$0xff] %v391_v17  ;;  %v208_v19 = vpop.f32.mrb[1].mxu1  ;;  %v283_v27 = vmul.f32 %v383_v16, %v383_v16  ;;  %v291_v59 = vmul.f32 %v391_v17, %v391_v17 }
  0xf7   :  { %239 = vst [vmem:[%s551_s2] sm:$0xff] %v176_v18  ;;  %v384_v20 = vpop.f32.mrb[2].mxu0  ;;  %247 = vst [vmem:[%s551_s2 + $0x40] sm:$0xff] %v208_v19  ;;  %v392_v21 = vpop.f32.mrb[2].mxu1  ;;  %v281_v24 = vmul.f32 %v176_v18, %v176_v18  ;;  %v289_v53 = vmul.f32 %v208_v19, %v208_v19 }
  0xf8   :  { %242 = vst [vmem:[%s551_s2 + $0x18] sm:$0xff] %v384_v20  ;;  %v179_v22 = vpop.f32.mrb[3].mxu0  ;;  %250 = vst [vmem:[%s551_s2 + $0x58] sm:$0xff] %v392_v21  ;;  %v211_v23 = vpop.f32.mrb[3].mxu1  ;;  %v284_v30 = vmul.f32 %v384_v20, %v384_v20  ;;  %v292_v62 = vmul.f32 %v392_v21, %v392_v21 }
  0xf9   :  { %240 = vst [vmem:[%s551_s2 + $0x8] sm:$0xff] %v179_v22  ;;  %v260_v25 = vadd.f32 %v179_v22, %v176_v18  ;;  %v282_v26 = vmul.f32 %v179_v22, %v179_v22  ;;  %248 = vst [vmem:[%s551_s2 + $0x48] sm:$0xff] %v211_v23  ;;  %v290_v58 = vmul.f32 %v211_v23, %v211_v23 }
  0xfb   :  { %v261_v28 = vadd.f32 %v383_v16, %v260_v25  ;;  %v297_v29 = vadd.f32 %v282_v26, %v281_v24 }
  0xfd   :  { %v298_v31 = vadd.f32 %v297_v29, %v283_v27  ;;  %v387_v32 = vpop.f32.mrb[4].mxu0  ;;  %v262_v33 = vadd.f32 %v384_v20, %v261_v28  ;;  %v395_v34 = vpop.f32.mrb[4].mxu1 }
  0xfe   :  { %245 = vst [vmem:[%s551_s2 + $0x30] sm:$0xff] %v387_v32  ;;  %v192_v35 = vpop.f32.mrb[5].mxu0  ;;  %253 = vst [vmem:[%s551_s2 + $0x70] sm:$0xff] %v395_v34  ;;  %v224_v36 = vpop.f32.mrb[5].mxu1  ;;  %v287_v47 = vmul.f32 %v387_v32, %v387_v32  ;;  %v295_v7 = vmul.f32 %v395_v34, %v395_v34 }
  0xff   :  { %243 = vst [vmem:[%s551_s2 + $0x20] sm:$0xff] %v192_v35  ;;  %v263_v37 = vadd.f32 %v262_v33, %v192_v35  ;;  %v285_v38 = vmul.f32 %v192_v35, %v192_v35  ;;  %v299_v39 = vadd.f32 %v298_v31, %v284_v30  ;;  %v388_v40 = vpop.f32.mrb[6].mxu0  ;;  %251 = vst [vmem:[%s551_s2 + $0x60] sm:$0xff] %v224_v36  ;;  %v396_v41 = vpop.f32.mrb[6].mxu1 }
 0x100   :  { %246 = vst [vmem:[%s551_s2 + $0x38] sm:$0xff] %v388_v40  ;;  %v195_v42 = vpop.f32.mrb[7].mxu0  ;;  %254 = vst [vmem:[%s551_s2 + $0x78] sm:$0xff] %v396_v41  ;;  %v227_v43 = vpop.f32.mrb[7].mxu1  ;;  %v288_v50 = vmul.f32 %v388_v40, %v388_v40  ;;  %v293_v1 = vmul.f32 %v224_v36, %v224_v36  ;;  %v296_v10 = vmul.f32 %v396_v41, %v396_v41 }
 0x101   :  { %v300_v44 = vadd.f32 %v299_v39, %v285_v38  ;;  %244 = vst [vmem:[%s551_s2 + $0x28] sm:$0xff] %v195_v42  ;;  %v264_v45 = vadd.f32 %v263_v37, %v195_v42  ;;  %v286_v46 = vmul.f32 %v195_v42, %v195_v42  ;;  %252 = vst [vmem:[%s551_s2 + $0x68] sm:$0xff] %v227_v43 }
 0x102   :  { %v294_v6 = vmul.f32 %v227_v43, %v227_v43 }
 0x103   :  { %v265_v48 = vadd.f32 %v387_v32, %v264_v45  ;;  %v301_v49 = vadd.f32 %v300_v44, %v286_v46 }
 0x105   :  { %v302_v51 = vadd.f32 %v301_v49, %v287_v47  ;;  %v266_v52 = vadd.f32 %v388_v40, %v265_v48 }
 0x107   :  { %v267_v54 = vadd.f32 %v266_v52, %v208_v19  ;;  %v303_v55 = vadd.f32 %v302_v51, %v288_v50 }
 0x109   :  { %v304_v56 = vadd.f32 %v303_v55, %v289_v53  ;;  %v268_v57 = vadd.f32 %v267_v54, %v211_v23 }
 0x10b   :  { %v269_v60 = vadd.f32 %v391_v17, %v268_v57  ;;  %v305_v61 = vadd.f32 %v304_v56, %v290_v58 }
 0x10d   :  { %v306_v63 = vadd.f32 %v305_v61, %v291_v59  ;;  %v270_v0 = vadd.f32 %v392_v21, %v269_v60 }
 0x10f   :  { %v271_v2 = vadd.f32 %v270_v0, %v224_v36  ;;  %v307_v3 = vadd.f32 %v306_v63, %v292_v62 }
 0x111   :  { %v308_v4 = vadd.f32 %v307_v3, %v293_v1  ;;  %v272_v5 = vadd.f32 %v271_v2, %v227_v43 }
 0x113   :  { %v273_v8 = vadd.f32 %v395_v34, %v272_v5  ;;  %v309_v9 = vadd.f32 %v308_v4, %v294_v6 }
 0x115   :  { %v274_v11 = vadd.f32 %v396_v41, %v273_v8  ;;  %v310_v12 = vadd.f32 %v309_v9, %v295_v7 }
 0x117   :  { %v275_v13 = vrot.slane %v274_v11, 4  ;;  %v311_v14 = vadd.f32 %v310_v12, %v296_v10 }
 0x119   :  { %v276_v15 = vadd.f32 %v275_v13, %v274_v11  ;;  %v312_v16 = vrot.slane %v311_v14, 4 }
 0x11b   :  { %v277_v17 = vrot.slane %v276_v15, 2  ;;  %v313_v18 = vadd.f32 %v312_v16, %v311_v14 }
 0x11d   :  { %v278_v19 = vadd.f32 %v277_v17, %v276_v15  ;;  %v314_v20 = vrot.slane %v313_v18, 2 }
 0x11f   :  { %v279_v21 = vrot.slane %v278_v19, 1  ;;  %v315_v22 = vadd.f32 %v314_v20, %v313_v18 }
 0x121   :  { %v316_v23 = vrot.slane %v315_v22, 1  ;;  %v280_v24 = vadd.f32 %v279_v21, %v278_v19 }
 0x123   :  { %v317_v25 = vadd.f32 %v316_v23, %v315_v22 }
 0x125   :  { %v319_v26 = vsel %vm318_vm0, %v280_v24, %v317_v25 }
 0x126   :  { %v321_v27 = vsel %vm320_vm1, %v319_v26, 0.0 }
 0x127   :  { %324 = vst [vmem:[%s552_s3] sm:$0xff] %v321_v27 }

// kernel: albedo_resnet_generator.23
= control target key start
LH: loop header
LB: loop body
LE: loop exit
PB: predicated region body
PF: predicated region fallthrough
CT: control target
= control target key end

     0   :  { %s254_s0 = inlined_call_operand.vmem [shape: f32[128,128], index: 0, kind: input, shape index: {}]   ;;  %s255_s1 = inlined_call_operand.vmem [shape: f32[1,128], index: 1, kind: input, shape index: {}]   ;;  %s256_s2 = inlined_call_operand.vmem [shape: f32[1,128], index: 2, kind: input, shape index: {}]   ;;  %s257_s3 = inlined_call_operand.vmem [shape: f32[128,128], index: 3, kind: output, shape index: {}]  }
   0x1   :  { %v14_v0 = vld [vmem:[%s254_s0] sm:$0xff]  ;;  %v15_v4 = vld [vmem:[%s254_s0 + $0x8] sm:$0xff]  ;;  %v16_v5 = vld [vmem:[%s254_s0 + $0x10] sm:$0xff] }
   0x2   :  { %v112_v1 = vld [vmem:[%s255_s1] ss:$0 sm:$0xff]  ;;  %v17_v6 = vld [vmem:[%s254_s0 + $0x18] sm:$0xff]  ;;  %v19_v11 = vld [vmem:[%s254_s0 + $0x28] sm:$0xff] }
   0x3   :  { %v143_v2 = vld [vmem:[%s256_s2] ss:$0 sm:$0xff]  ;;  %v37_v3 = vmul.f32 %v112_v1, %v14_v0  ;;  %v38_v7 = vmul.f32 %v112_v1, %v15_v4  ;;  %v39_v8 = vmul.f32 %v112_v1, %v16_v5  ;;  %v40_v9 = vmul.f32 %v112_v1, %v17_v6  ;;  %v20_v12 = vld [vmem:[%s254_s0 + $0x30] sm:$0xff]  ;;  %v21_v17 = vld [vmem:[%s254_s0 + $0x38] sm:$0xff] }
   0x4   :  { %v18_v10 = vld [vmem:[%s254_s0 + $0x20] sm:$0xff]  ;;  %v42_v15 = vmul.f32 %v112_v1, %v19_v11  ;;  %v43_v16 = vmul.f32 %v112_v1, %v20_v12  ;;  %v44_v21 = vmul.f32 %v112_v1, %v21_v17  ;;  %v23_v27 = vld [vmem:[%s254_s0 + $0x48] sm:$0xff]  ;;  %v24_v28 = vld [vmem:[%s254_s0 + $0x50] sm:$0xff] }
   0x5   :  { %v60_v13 = vadd.f32 %v143_v2, %v37_v3  ;;  %v41_v14 = vmul.f32 %v112_v1, %v18_v10  ;;  %v61_v18 = vadd.f32 %v143_v2, %v38_v7  ;;  %v62_v19 = vadd.f32 %v143_v2, %v39_v8  ;;  %v22_v22 = vld [vmem:[%s254_s0 + $0x40] sm:$0xff]  ;;  %v25_v29 = vld [vmem:[%s254_s0 + $0x58] sm:$0xff]  ;;  %v27_v35 = vld [vmem:[%s254_s0 + $0x68] sm:$0xff] }
   0x6   :  { %v63_v20 = vadd.f32 %v143_v2, %v40_v9  ;;  %v65_v25 = vadd.f32 %v143_v2, %v42_v15  ;;  %v66_v26 = vadd.f32 %v143_v2, %v43_v16  ;;  %v67_v33 = vadd.f32 %v143_v2, %v44_v21  ;;  %v26_v34 = vld [vmem:[%s254_s0 + $0x60] sm:$0xff]  ;;  %v28_v36 = vld [vmem:[%s254_s0 + $0x70] sm:$0xff]  ;;  %v29_v41 = vld [vmem:[%s254_s0 + $0x78] sm:$0xff] }
   0x7   :  { %v76_v23 = vmax.f32 %v60_v13, 0.0  ;;  %v64_v24 = vadd.f32 %v143_v2, %v41_v14  ;;  %v77_v30 = vmax.f32 %v61_v18, 0.0  ;;  %v78_v31 = vmax.f32 %v62_v19, 0.0 }
   0x8   :  { %v79_v32 = vmax.f32 %v63_v20, 0.0  ;;  %v81_v38 = vmax.f32 %v65_v25, 0.0  ;;  %v82_v39 = vmax.f32 %v66_v26, 0.0  ;;  %v45_v40 = vmul.f32 %v112_v1, %v22_v22 }
   0x9   :  { %92 = vst [vmem:[%s257_s3] sm:$0xff] %v76_v23  ;;  %v80_v37 = vmax.f32 %v64_v24, 0.0  ;;  %93 = vst [vmem:[%s257_s3 + $0x8] sm:$0xff] %v77_v30  ;;  %v83_v42 = vmax.f32 %v67_v33, 0.0  ;;  %v46_v43 = vmul.f32 %v112_v1, %v23_v27  ;;  %v47_v44 = vmul.f32 %v112_v1, %v24_v28 }
   0xa   :  { %94 = vst [vmem:[%s257_s3 + $0x10] sm:$0xff] %v78_v31  ;;  %95 = vst [vmem:[%s257_s3 + $0x18] sm:$0xff] %v79_v32  ;;  %v48_v45 = vmul.f32 %v112_v1, %v25_v29  ;;  %v68_v46 = vadd.f32 %v143_v2, %v45_v40  ;;  %v49_v47 = vmul.f32 %v112_v1, %v26_v34 }
   0xb   :  { %96 = vst [vmem:[%s257_s3 + $0x20] sm:$0xff] %v80_v37  ;;  %97 = vst [vmem:[%s257_s3 + $0x28] sm:$0xff] %v81_v38  ;;  %v50_v48 = vmul.f32 %v112_v1, %v27_v35  ;;  %v51_v49 = vmul.f32 %v112_v1, %v28_v36  ;;  %v69_v50 = vadd.f32 %v143_v2, %v46_v43 }
   0xc   :  { %98 = vst [vmem:[%s257_s3 + $0x30] sm:$0xff] %v82_v39  ;;  %99 = vst [vmem:[%s257_s3 + $0x38] sm:$0xff] %v83_v42  ;;  %v70_v51 = vadd.f32 %v143_v2, %v47_v44  ;;  %v71_v52 = vadd.f32 %v143_v2, %v48_v45  ;;  %v52_v53 = vmul.f32 %v112_v1, %v29_v41  ;;  %v84_v54 = vmax.f32 %v68_v46, 0.0 }
   0xd   :  { %v72_v55 = vadd.f32 %v143_v2, %v49_v47  ;;  %v73_v56 = vadd.f32 %v143_v2, %v50_v48  ;;  %v74_v57 = vadd.f32 %v143_v2, %v51_v49  ;;  %v85_v58 = vmax.f32 %v69_v50, 0.0 }
   0xe   :  { %v86_v59 = vmax.f32 %v70_v51, 0.0  ;;  %v87_v60 = vmax.f32 %v71_v52, 0.0  ;;  %v75_v61 = vadd.f32 %v143_v2, %v52_v53  ;;  %100 = vst [vmem:[%s257_s3 + $0x40] sm:$0xff] %v84_v54 }
   0xf   :  { %v88_v62 = vmax.f32 %v72_v55, 0.0  ;;  %v89_v63 = vmax.f32 %v73_v56, 0.0  ;;  %v90_v0 = vmax.f32 %v74_v57, 0.0  ;;  %101 = vst [vmem:[%s257_s3 + $0x48] sm:$0xff] %v85_v58 }
  0x10   :  { %102 = vst [vmem:[%s257_s3 + $0x50] sm:$0xff] %v86_v59  ;;  %103 = vst [vmem:[%s257_s3 + $0x58] sm:$0xff] %v87_v60  ;;  %v91_v1 = vmax.f32 %v75_v61, 0.0 }
  0x11   :  { %104 = vst [vmem:[%s257_s3 + $0x60] sm:$0xff] %v88_v62  ;;  %105 = vst [vmem:[%s257_s3 + $0x68] sm:$0xff] %v89_v63 }
  0x12   :  { %106 = vst [vmem:[%s257_s3 + $0x70] sm:$0xff] %v90_v0  ;;  %107 = vst [vmem:[%s257_s3 + $0x78] sm:$0xff] %v91_v1 }

// kernel: albedo_resnet_generator.24
= control target key start
LH: loop header
LB: loop body
LE: loop exit
PB: predicated region body
PF: predicated region fallthrough
CT: control target
= control target key end

     0   :  { %vm246_vm0 = vcmask 1040384   ;;  %vm248_vm1 = vcmask 1041408   ;;  %s443_s1 = inlined_call_operand.vmem [shape: bf16[256,128], index: 1, kind: input, shape index: {}]   ;;  %s444_s0 = inlined_call_operand.vmem [shape: bf16[32,256], index: 0, kind: input, shape index: {}]   ;;  %s445_s2 = inlined_call_operand.vmem [shape: f32[32,128], index: 2, kind: output, shape index: {0}]   ;;  %s446_s3 = inlined_call_operand.vmem [shape: f32[8,128], index: 3, kind: output, shape index: {1}]  }
   0x1   :  { %v326_v0 = vld [vmem:[%s443_s1 + $0x40] sm:$0xff]   ;;  %v328_v2 = vld [vmem:[%s443_s1 + $0x48] sm:$0xff]   ;;  %v330_v4 = vld [vmem:[%s443_s1 + $0x50] sm:$0xff]  }
   0x2   :  { %v327_v1 = vld [vmem:[%s443_s1] sm:$0xff]   ;;  %281 = vmatprep.subr.bf16.mxu0 %v326_v0  ;;  %309 = vmatprep.subr.bf16.mxu1 %v326_v0  ;;  %v329_v3 = vld [vmem:[%s443_s1 + $0x8] sm:$0xff]   ;;  %v331_v5 = vld [vmem:[%s443_s1 + $0x10] sm:$0xff]  }
   0x3   :  { %282 = vmatpush3.bf16.msra.mxu0 %v327_v1  ;;  %317 = vmatpush3.bf16.msra.mxu1 %v327_v1  ;;  %v332_v6 = vld [vmem:[%s443_s1 + $0x58] sm:$0xff]   ;;  %v334_v8 = vld [vmem:[%s443_s1 + $0x60] sm:$0xff]   ;;  %v336_v10 = vld [vmem:[%s443_s1 + $0x68] sm:$0xff]  }
   0x4   :  { %283 = vmatprep.subr.bf16.mxu0 %v328_v2  ;;  %310 = vmatprep.subr.bf16.mxu1 %v328_v2  ;;  %v333_v7 = vld [vmem:[%s443_s1 + $0x18] sm:$0xff]   ;;  %v335_v9 = vld [vmem:[%s443_s1 + $0x20] sm:$0xff]   ;;  %v337_v13 = vld [vmem:[%s443_s1 + $0x28] sm:$0xff]  }
   0x5   :  { %v344_v11 = vld [vmem:[%s444_s0 + $0x4] ss:$8 sps:$4 sm:$0xff]   ;;  %v347_v12 = vld [vmem:[%s444_s0 + $0x14] ss:$8 sps:$4 sm:$0xff]   ;;  %v342_v18 = vld [vmem:[%s444_s0] ss:$8 sps:$4 sm:$0xff]  }
   0x6   :  { %v338_v14 = vld [vmem:[%s443_s1 + $0x70] sm:$0xff]   ;;  %198 = vmatprep.mubr.bf16.mxu0 %v344_v11  ;;  %206 = vmatprep.mubr.bf16.mxu1 %v347_v12  ;;  %v340_v16 = vld [vmem:[%s443_s1 + $0x78] sm:$0xff]  }
   0x7   :  { %284 = vmatpush3.bf16.msra.mxu0 %v329_v3  ;;  %318 = vmatpush3.bf16.msra.mxu1 %v329_v3  ;;  %v339_v15 = vld [vmem:[%s443_s1 + $0x30] sm:$0xff]   ;;  %v341_v17 = vld [vmem:[%s443_s1 + $0x38] sm:$0xff]  }
   0x8   :  { %285 = vmatprep.subr.bf16.mxu0 %v330_v4  ;;  %311 = vmatprep.subr.bf16.mxu1 %v330_v4  ;;  %v345_v19 = vld [vmem:[%s444_s0 + $0x10] ss:$8 sps:$4 sm:$0xff]  }
   0xb   :  { %286 = vmatpush3.bf16.msra.mxu0 %v331_v5  ;;  %319 = vmatpush3.bf16.msra.mxu1 %v331_v5 }
   0xc   :  { %287 = vmatprep.subr.bf16.mxu0 %v332_v6  ;;  %312 = vmatprep.subr.bf16.mxu1 %v332_v6 }
   0xf   :  { %288 = vmatpush3.bf16.msra.mxu0 %v333_v7  ;;  %320 = vmatpush3.bf16.msra.mxu1 %v333_v7 }
  0x10   :  { %289 = vmatprep.subr.bf16.mxu0 %v334_v8  ;;  %313 = vmatprep.subr.bf16.mxu1 %v334_v8 }
  0x13   :  { %290 = vmatpush3.bf16.msra.mxu0 %v335_v9  ;;  %321 = vmatpush3.bf16.msra.mxu1 %v335_v9 }
  0x14   :  { %291 = vmatprep.subr.bf16.mxu0 %v336_v10  ;;  %314 = vmatprep.subr.bf16.mxu1 %v336_v10 }
  0x17   :  { %292 = vmatpush3.bf16.msra.mxu0 %v337_v13  ;;  %322 = vmatpush3.bf16.msra.mxu1 %v337_v13 }
  0x18   :  { %293 = vmatprep.subr.bf16.mxu0 %v338_v14  ;;  %315 = vmatprep.subr.bf16.mxu1 %v338_v14 }
  0x1b   :  { %294 = vmatpush3.bf16.msra.mxu0 %v339_v15  ;;  %323 = vmatpush3.bf16.msra.mxu1 %v339_v15 }
  0x1c   :  { %295 = vmatprep.subr.bf16.mxu0 %v340_v16  ;;  %316 = vmatprep.subr.bf16.mxu1 %v340_v16 }
  0x1f   :  { %296 = vmatpush3.bf16.msra.mxu0 %v341_v17  ;;  %324 = vmatpush3.bf16.msra.mxu1 %v341_v17 }
  0x22   :  { %199 = vmatmul.mubr.bf16.vlgmr.msra.gmra.mrb[0].mxu0 %v342_v18  ;;  %207 = vmatmul.mubr.bf16.vlgmr.msra.gmra.mrb[0].mxu1 %v345_v19 }
  0xf5   :  { %v297_v20 = vpop.f32.mrb[0].mxu0  ;;  %v303_v21 = vpop.f32.mrb[0].mxu1 }
  0xf6   :  { %v298_v22 = vpop.f32.mrb[1].mxu0  ;;  %v304_v23 = vpop.f32.mrb[1].mxu1 }
  0xf7   :  { %v299_v24 = vadd.f32 %v298_v22, %v297_v20  ;;  %v300_v25 = vpop.f32.mrb[2].mxu0  ;;  %v305_v26 = vadd.f32 %v304_v23, %v303_v21  ;;  %v306_v27 = vpop.f32.mrb[2].mxu1 }
  0xf8   :  { %v301_v28 = vpop.f32.mrb[3].mxu0  ;;  %v307_v29 = vpop.f32.mrb[3].mxu1 }
  0xf9   :  { %215 = vst [vmem:[%s445_s2] sm:$0xff] %v299_v24  ;;  %217 = vst [vmem:[%s445_s2 + $0x10] sm:$0xff] %v305_v26  ;;  %v302_v30 = vadd.f32 %v301_v28, %v300_v25  ;;  %v308_v31 = vadd.f32 %v307_v29, %v306_v27  ;;  %v233_v32 = vmul.f32 %v299_v24, %v299_v24 }
  0xfa   :  { %v235_v33 = vmul.f32 %v305_v26, %v305_v26 }
  0xfb   :  { %216 = vst [vmem:[%s445_s2 + $0x8] sm:$0xff] %v302_v30  ;;  %v224_v34 = vadd.f32 %v302_v30, %v299_v24  ;;  %v234_v35 = vmul.f32 %v302_v30, %v302_v30  ;;  %218 = vst [vmem:[%s445_s2 + $0x18] sm:$0xff] %v308_v31  ;;  %v236_v39 = vmul.f32 %v308_v31, %v308_v31 }
  0xfd   :  { %v237_v36 = vadd.f32 %v234_v35, %v233_v32  ;;  %v225_v37 = vadd.f32 %v305_v26, %v224_v34 }
  0xff   :  { %v226_v38 = vadd.f32 %v308_v31, %v225_v37  ;;  %v238_v40 = vadd.f32 %v237_v36, %v235_v33 }
 0x101   :  { %v227_v41 = vrot.slane %v226_v38, 4  ;;  %v239_v42 = vadd.f32 %v238_v40, %v236_v39 }
 0x103   :  { %v228_v43 = vadd.f32 %v227_v41, %v226_v38  ;;  %v240_v44 = vrot.slane %v239_v42, 4 }
 0x105   :  { %v229_v45 = vrot.slane %v228_v43, 2  ;;  %v241_v46 = vadd.f32 %v240_v44, %v239_v42 }
 0x107   :  { %v230_v47 = vadd.f32 %v229_v45, %v228_v43  ;;  %v242_v48 = vrot.slane %v241_v46, 2 }
 0x109   :  { %v231_v49 = vrot.slane %v230_v47, 1  ;;  %v243_v50 = vadd.f32 %v242_v48, %v241_v46 }
 0x10b   :  { %v244_v51 = vrot.slane %v243_v50, 1  ;;  %v232_v52 = vadd.f32 %v231_v49, %v230_v47 }
 0x10d   :  { %v245_v53 = vadd.f32 %v244_v51, %v243_v50 }
 0x10f   :  { %v247_v54 = vsel %vm246_vm0, %v232_v52, %v245_v53 }
 0x110   :  { %v249_v55 = vsel %vm248_vm1, %v247_v54, 0.0 }
 0x111   :  { %252 = vst [vmem:[%s446_s3] sm:$0xff] %v249_v55 }

// kernel: albedo_resnet_generator.25
= control target key start
LH: loop header
LB: loop body
LE: loop exit
PB: predicated region body
PF: predicated region fallthrough
CT: control target
= control target key end

     0   :  { %s104_s0 = inlined_call_operand.vmem [shape: f32[32,128], index: 0, kind: input, shape index: {}]   ;;  %s105_s1 = inlined_call_operand.vmem [shape: f32[1,128], index: 1, kind: input, shape index: {}]   ;;  %s106_s2 = inlined_call_operand.vmem [shape: f32[1,128], index: 2, kind: input, shape index: {}]   ;;  %s107_s3 = inlined_call_operand.vmem [shape: f32[32,128], index: 3, kind: output, shape index: {}]  }
   0x1   :  { %v14_v0 = vld [vmem:[%s104_s0] sm:$0xff]  ;;  %v15_v4 = vld [vmem:[%s104_s0 + $0x8] sm:$0xff]  ;;  %v16_v5 = vld [vmem:[%s104_s0 + $0x10] sm:$0xff] }
   0x2   :  { %v52_v1 = vld [vmem:[%s105_s1] ss:$0 sm:$0xff]  ;;  %v17_v6 = vld [vmem:[%s104_s0 + $0x18] sm:$0xff] }
   0x3   :  { %v53_v2 = vld [vmem:[%s106_s2] ss:$0 sm:$0xff]  ;;  %v25_v3 = vmul.f32 %v52_v1, %v14_v0  ;;  %v26_v7 = vmul.f32 %v52_v1, %v15_v4  ;;  %v27_v8 = vmul.f32 %v52_v1, %v16_v5  ;;  %v28_v9 = vmul.f32 %v52_v1, %v17_v6 }
   0x5   :  { %v36_v10 = vadd.f32 %v53_v2, %v25_v3  ;;  %v37_v11 = vadd.f32 %v53_v2, %v26_v7  ;;  %v38_v12 = vadd.f32 %v53_v2, %v27_v8  ;;  %v39_v13 = vadd.f32 %v53_v2, %v28_v9 }
   0x7   :  { %v40_v14 = vmax.f32 %v36_v10, 0.0  ;;  %v41_v15 = vmax.f32 %v37_v11, 0.0  ;;  %v42_v16 = vmax.f32 %v38_v12, 0.0  ;;  %v43_v17 = vmax.f32 %v39_v13, 0.0 }
   0x9   :  { %44 = vst [vmem:[%s107_s3] sm:$0xff] %v40_v14  ;;  %45 = vst [vmem:[%s107_s3 + $0x8] sm:$0xff] %v41_v15 }
   0xa   :  { %46 = vst [vmem:[%s107_s3 + $0x10] sm:$0xff] %v42_v16  ;;  %47 = vst [vmem:[%s107_s3 + $0x18] sm:$0xff] %v43_v17 }

// kernel: albedo_resnet_generator.29
= control target key start
LH: loop header
LB: loop body
LE: loop exit
PB: predicated region body
PF: predicated region fallthrough
CT: control target
= control target key end

     0   :  { %s128_s0 = inlined_call_operand.vmem [shape: f32[32,128], index: 0, kind: input, shape index: {}]   ;;  %s129_s1 = inlined_call_operand.vmem [shape: f32[1,128], index: 1, kind: input, shape index: {}]   ;;  %s130_s2 = inlined_call_operand.vmem [shape: f32[1,128], index: 2, kind: input, shape index: {}]   ;;  %s131_s3 = inlined_call_operand.vmem [shape: f32[32,128], index: 3, kind: input, shape index: {}]   ;;  %s132_s4 = inlined_call_operand.vmem [shape: f32[32,128], index: 4, kind: output, shape index: {}]  }
   0x1   :  { %v17_v0 = vld [vmem:[%s128_s0] sm:$0xff]  ;;  %v18_v4 = vld [vmem:[%s128_s0 + $0x8] sm:$0xff]  ;;  %v19_v7 = vld [vmem:[%s128_s0 + $0x10] sm:$0xff] }
   0x2   :  { %v59_v1 = vld [vmem:[%s129_s1] ss:$0 sm:$0xff]  ;;  %v20_v8 = vld [vmem:[%s128_s0 + $0x18] sm:$0xff]  ;;  %v44_v10 = vld [vmem:[%s131_s3 + $0x8] sm:$0xff] }
   0x3   :  { %v60_v2 = vld [vmem:[%s130_s2] ss:$0 sm:$0xff]  ;;  %v28_v3 = vmul.f32 %v59_v1, %v17_v0  ;;  %v29_v6 = vmul.f32 %v59_v1, %v18_v4  ;;  %v30_v11 = vmul.f32 %v59_v1, %v19_v7  ;;  %v31_v12 = vmul.f32 %v59_v1, %v20_v8  ;;  %v45_v14 = vld [vmem:[%s131_s3 + $0x10] sm:$0xff]  ;;  %v46_v15 = vld [vmem:[%s131_s3 + $0x18] sm:$0xff] }
   0x4   :  { %v43_v5 = vld [vmem:[%s131_s3] sm:$0xff] }
   0x5   :  { %v39_v9 = vadd.f32 %v60_v2, %v28_v3  ;;  %v40_v13 = vadd.f32 %v60_v2, %v29_v6  ;;  %v41_v17 = vadd.f32 %v60_v2, %v30_v11  ;;  %v42_v18 = vadd.f32 %v60_v2, %v31_v12 }
   0x7   :  { %v47_v16 = vadd.f32 %v43_v5, %v39_v9  ;;  %v48_v19 = vadd.f32 %v44_v10, %v40_v13  ;;  %v49_v20 = vadd.f32 %v45_v14, %v41_v17  ;;  %v50_v21 = vadd.f32 %v46_v15, %v42_v18 }
   0x9   :  { %51 = vst [vmem:[%s132_s4] sm:$0xff] %v47_v16  ;;  %52 = vst [vmem:[%s132_s4 + $0x8] sm:$0xff] %v48_v19 }
   0xa   :  { %53 = vst [vmem:[%s132_s4 + $0x10] sm:$0xff] %v49_v20  ;;  %54 = vst [vmem:[%s132_s4 + $0x18] sm:$0xff] %v50_v21 }

// kernel: albedo_resnet_generator.26
= control target key start
LH: loop header
LB: loop body
LE: loop exit
PB: predicated region body
PF: predicated region fallthrough
CT: control target
= control target key end

     0   :  { %vm375_vm0 = vcmask 1040384   ;;  %vm377_vm1 = vcmask 1041408   ;;  %s636_s1 = inlined_call_operand.vmem [shape: bf16[384,128], index: 1, kind: input, shape index: {}]   ;;  %s637_s0 = inlined_call_operand.vmem [shape: bf16[32,384], index: 0, kind: input, shape index: {}]   ;;  %s638_s2 = inlined_call_operand.vmem [shape: f32[32,128], index: 2, kind: output, shape index: {0}]   ;;  %s639_s3 = inlined_call_operand.vmem [shape: f32[8,128], index: 3, kind: output, shape index: {1}]  }
   0x1   :  { %v479_v0 = vld [vmem:[%s636_s1 + $0x40] sm:$0xff]   ;;  %v482_v3 = vld [vmem:[%s636_s1 + $0x48] sm:$0xff]   ;;  %v485_v6 = vld [vmem:[%s636_s1 + $0x50] sm:$0xff]  }
   0x2   :  { %v480_v1 = vld [vmem:[%s636_s1] sm:$0xff]   ;;  %420 = vmatprep.subr.bf16.mxu0 %v479_v0  ;;  %v483_v4 = vld [vmem:[%s636_s1 + $0x8] sm:$0xff]   ;;  %v486_v7 = vld [vmem:[%s636_s1 + $0x10] sm:$0xff]  }
   0x3   :  { %v481_v2 = vld [vmem:[%s636_s1 + $0x80] sm:$0xff]   ;;  %421 = vmatpush3.bf16.msra.mxu0 %v480_v1  ;;  %v484_v5 = vld [vmem:[%s636_s1 + $0x88] sm:$0xff]   ;;  %v487_v8 = vld [vmem:[%s636_s1 + $0x90] sm:$0xff]  }
   0x4   :  { %458 = vmatprep.subr.bf16.mxu1 %v481_v2  ;;  %422 = vmatprep.subr.bf16.mxu0 %v482_v3  ;;  %v488_v9 = vld [vmem:[%s636_s1 + $0x58] sm:$0xff]   ;;  %v491_v12 = vld [vmem:[%s636_s1 + $0x60] sm:$0xff]   ;;  %v494_v15 = vld [vmem:[%s636_s1 + $0x68] sm:$0xff]  }
   0x5   :  { %459 = vmatpush3.bf16.msra.mxu1 %v481_v2  ;;  %v489_v10 = vld [vmem:[%s636_s1 + $0x18] sm:$0xff]   ;;  %v493_v13 = vld [vmem:[%s636_s1 + $0xa0] sm:$0xff]   ;;  %v496_v16 = vld [vmem:[%s636_s1 + $0xa8] sm:$0xff]  }
   0x6   :  { %460 = vmatprep.subr.bf16.mxu1 %v484_v5  ;;  %v490_v11 = vld [vmem:[%s636_s1 + $0x98] sm:$0xff]   ;;  %v492_v14 = vld [vmem:[%s636_s1 + $0x20] sm:$0xff]   ;;  %v495_v17 = vld [vmem:[%s636_s1 + $0x28] sm:$0xff]  }
   0x7   :  { %423 = vmatpush3.bf16.msra.mxu0 %v483_v4  ;;  %v497_v18 = vld [vmem:[%s636_s1 + $0x70] sm:$0xff]   ;;  %v500_v21 = vld [vmem:[%s636_s1 + $0x78] sm:$0xff]   ;;  %v503_v26 = vld [vmem:[%s637_s0] ss:$12 sps:$4 sm:$0xff]  }
   0x8   :  { %424 = vmatprep.subr.bf16.mxu0 %v485_v6  ;;  %v498_v19 = vld [vmem:[%s636_s1 + $0x30] sm:$0xff]   ;;  %v502_v22 = vld [vmem:[%s636_s1 + $0xb8] sm:$0xff]   ;;  %v507_v28 = vld [vmem:[%s637_s0 + $0x20] ss:$12 sps:$4 sm:$0xff]  }
   0x9   :  { %461 = vmatpush3.bf16.msra.mxu1 %v484_v5  ;;  %v499_v20 = vld [vmem:[%s636_s1 + $0xb0] sm:$0xff]   ;;  %v501_v25 = vld [vmem:[%s636_s1 + $0x38] sm:$0xff]  }
   0xa   :  { %462 = vmatprep.subr.bf16.mxu1 %v487_v8  ;;  %v505_v23 = vld [vmem:[%s637_s0 + $0x4] ss:$12 sps:$4 sm:$0xff]   ;;  %v506_v24 = vld [vmem:[%s637_s0 + $0x8] ss:$12 sps:$4 sm:$0xff]  }
   0xb   :  { %425 = vmatpush3.bf16.msra.mxu0 %v486_v7  ;;  %278 = vmatprep.mubr.bf16.mxu0 %v505_v23  ;;  %v508_v27 = vld [vmem:[%s637_s0 + $0x1c] ss:$12 sps:$4 sm:$0xff]   ;;  %v510_v29 = vld [vmem:[%s637_s0 + $0x18] ss:$12 sps:$4 sm:$0xff]  }
   0xc   :  { %426 = vmatprep.subr.bf16.mxu0 %v488_v9  ;;  %474 = vmatprep.mubr.bf16.mxu1 %v506_v24 }
   0xd   :  { %463 = vmatpush3.bf16.msra.mxu1 %v487_v8 }
   0xe   :  { %464 = vmatprep.subr.bf16.mxu1 %v490_v11 }
   0xf   :  { %427 = vmatpush3.bf16.msra.mxu0 %v489_v10 }
  0x10   :  { %428 = vmatprep.subr.bf16.mxu0 %v491_v12 }
  0x11   :  { %465 = vmatpush3.bf16.msra.mxu1 %v490_v11 }
  0x12   :  { %466 = vmatprep.subr.bf16.mxu1 %v493_v13 }
  0x13   :  { %429 = vmatpush3.bf16.msra.mxu0 %v492_v14 }
  0x14   :  { %430 = vmatprep.subr.bf16.mxu0 %v494_v15 }
  0x15   :  { %467 = vmatpush3.bf16.msra.mxu1 %v493_v13 }
  0x16   :  { %468 = vmatprep.subr.bf16.mxu1 %v496_v16 }
  0x17   :  { %431 = vmatpush3.bf16.msra.mxu0 %v495_v17 }
  0x18   :  { %432 = vmatprep.subr.bf16.mxu0 %v497_v18 }
  0x19   :  { %469 = vmatpush3.bf16.msra.mxu1 %v496_v16 }
  0x1a   :  { %470 = vmatprep.subr.bf16.mxu1 %v499_v20 }
  0x1b   :  { %433 = vmatpush3.bf16.msra.mxu0 %v498_v19 }
  0x1c   :  { %434 = vmatprep.subr.bf16.mxu0 %v500_v21 }
  0x1d   :  { %471 = vmatpush3.bf16.msra.mxu1 %v499_v20 }
  0x1e   :  { %472 = vmatprep.subr.bf16.mxu1 %v502_v22 }
  0x1f   :  { %435 = vmatpush3.bf16.msra.mxu0 %v501_v25 }
  0x21   :  { %473 = vmatpush3.bf16.msra.mxu1 %v502_v22 }
  0x22   :  { %279 = vmatmul.mubr.bf16.vlgmr.msra.gmra.mrb[0].mxu0 %v503_v26 }
  0x23   :  { %286 = vmatprep.mubr.bf16.mxu0 %v508_v27 }
  0x24   :  { %475 = vmatmul.mubr.bf16.vlgmr.msra.gmra.mrb[0].mxu1 %v507_v28 }
  0x2a   :  { %287 = vmatmul.mubr.bf16.gmra.mrb[4].mxu0 %v510_v29 }
  0xf5   :  { %v436_v30 = vpop.f32.mrb[0].mxu0 }
  0xf6   :  { %v437_v31 = vpop.f32.mrb[1].mxu0 }
  0xf7   :  { %v438_v32 = vadd.f32 %v437_v31, %v436_v30  ;;  %v439_v33 = vpop.f32.mrb[2].mxu0  ;;  %v476_v34 = vpop.f32.mrb[0].mxu1 }
  0xf8   :  { %v440_v35 = vpop.f32.mrb[3].mxu0  ;;  %v329_v36 = vpop.f32.mrb[1].mxu1 }
  0xf9   :  { %v441_v37 = vadd.f32 %v440_v35, %v439_v33  ;;  %v330_v38 = vadd.f32 %v438_v32, %v329_v36  ;;  %v477_v39 = vpop.f32.mrb[2].mxu1 }
  0xfa   :  { %v332_v40 = vpop.f32.mrb[3].mxu1 }
  0xfb   :  { %344 = vst [vmem:[%s638_s2] sm:$0xff] %v330_v38  ;;  %v333_v41 = vadd.f32 %v441_v37, %v332_v40  ;;  %v362_v42 = vmul.f32 %v330_v38, %v330_v38 }
  0xfd   :  { %345 = vst [vmem:[%s638_s2 + $0x8] sm:$0xff] %v333_v41  ;;  %v353_v43 = vadd.f32 %v333_v41, %v330_v38  ;;  %v363_v44 = vmul.f32 %v333_v41, %v333_v41  ;;  %v442_v45 = vpop.f32.mrb[4].mxu0 }
  0xfe   :  { %v443_v46 = vpop.f32.mrb[5].mxu0 }
  0xff   :  { %v366_v47 = vadd.f32 %v363_v44, %v362_v42  ;;  %v444_v48 = vadd.f32 %v443_v46, %v442_v45  ;;  %v445_v49 = vpop.f32.mrb[6].mxu0 }
 0x100   :  { %v446_v50 = vpop.f32.mrb[7].mxu0 }
 0x101   :  { %v338_v51 = vadd.f32 %v476_v34, %v444_v48  ;;  %v447_v52 = vadd.f32 %v446_v50, %v445_v49 }
 0x103   :  { %346 = vst [vmem:[%s638_s2 + $0x10] sm:$0xff] %v338_v51  ;;  %v354_v53 = vadd.f32 %v353_v43, %v338_v51  ;;  %v364_v54 = vmul.f32 %v338_v51, %v338_v51  ;;  %v341_v55 = vadd.f32 %v477_v39, %v447_v52 }
 0x105   :  { %v367_v56 = vadd.f32 %v366_v47, %v364_v54  ;;  %347 = vst [vmem:[%s638_s2 + $0x18] sm:$0xff] %v341_v55  ;;  %v355_v57 = vadd.f32 %v354_v53, %v341_v55  ;;  %v365_v58 = vmul.f32 %v341_v55, %v341_v55 }
 0x107   :  { %v356_v59 = vrot.slane %v355_v57, 4  ;;  %v368_v60 = vadd.f32 %v367_v56, %v365_v58 }
 0x109   :  { %v357_v61 = vadd.f32 %v356_v59, %v355_v57  ;;  %v369_v62 = vrot.slane %v368_v60, 4 }
 0x10b   :  { %v358_v63 = vrot.slane %v357_v61, 2  ;;  %v370_v0 = vadd.f32 %v369_v62, %v368_v60 }
 0x10d   :  { %v359_v1 = vadd.f32 %v358_v63, %v357_v61  ;;  %v371_v2 = vrot.slane %v370_v0, 2 }
 0x10f   :  { %v360_v3 = vrot.slane %v359_v1, 1  ;;  %v372_v4 = vadd.f32 %v371_v2, %v370_v0 }
 0x111   :  { %v373_v5 = vrot.slane %v372_v4, 1  ;;  %v361_v6 = vadd.f32 %v360_v3, %v359_v1 }
 0x113   :  { %v374_v7 = vadd.f32 %v373_v5, %v372_v4 }
 0x115   :  { %v376_v8 = vsel %vm375_vm0, %v361_v6, %v374_v7 }
 0x116   :  { %v378_v9 = vsel %vm377_vm1, %v376_v8, 0.0 }
 0x117   :  { %381 = vst [vmem:[%s639_s3] sm:$0xff] %v378_v9 }

// kernel: albedo_resnet_generator.34
= control target key start
LH: loop header
LB: loop body
LE: loop exit
PB: predicated region body
PF: predicated region fallthrough
CT: control target
= control target key end

     0   :  { %vm639_vm0 = vcmask 1040384   ;;  %vm641_vm1 = vcmask 1041408   ;;  %s1092_s1 = inlined_call_operand.vmem [shape: bf16[384,128], index: 1, kind: input, shape index: {}]   ;;  %s1093_s0 = inlined_call_operand.vmem [shape: bf16[128,384], index: 0, kind: input, shape index: {}]   ;;  %s1094_s2 = inlined_call_operand.vmem [shape: f32[128,128], index: 2, kind: output, shape index: {0}]   ;;  %s1095_s3 = inlined_call_operand.vmem [shape: f32[8,128], index: 3, kind: output, shape index: {1}]  }
   0x1   :  { %v815_v0 = vld [vmem:[%s1092_s1 + $0x40] sm:$0xff]   ;;  %v818_v3 = vld [vmem:[%s1092_s1 + $0x48] sm:$0xff]   ;;  %v821_v6 = vld [vmem:[%s1092_s1 + $0x50] sm:$0xff]  }
   0x2   :  { %v816_v1 = vld [vmem:[%s1092_s1] sm:$0xff]   ;;  %702 = vmatprep.subr.bf16.mxu0 %v815_v0  ;;  %v819_v4 = vld [vmem:[%s1092_s1 + $0x8] sm:$0xff]   ;;  %v822_v7 = vld [vmem:[%s1092_s1 + $0x10] sm:$0xff]  }
   0x3   :  { %v817_v2 = vld [vmem:[%s1092_s1 + $0x80] sm:$0xff]   ;;  %703 = vmatpush3.bf16.msra.mxu0 %v816_v1  ;;  %v820_v5 = vld [vmem:[%s1092_s1 + $0x88] sm:$0xff]   ;;  %v823_v8 = vld [vmem:[%s1092_s1 + $0x90] sm:$0xff]  }
   0x4   :  { %782 = vmatprep.subr.bf16.mxu1 %v817_v2  ;;  %704 = vmatprep.subr.bf16.mxu0 %v818_v3  ;;  %v824_v9 = vld [vmem:[%s1092_s1 + $0x58] sm:$0xff]   ;;  %v827_v12 = vld [vmem:[%s1092_s1 + $0x60] sm:$0xff]   ;;  %v830_v15 = vld [vmem:[%s1092_s1 + $0x68] sm:$0xff]  }
   0x5   :  { %783 = vmatpush3.bf16.msra.mxu1 %v817_v2  ;;  %v825_v10 = vld [vmem:[%s1092_s1 + $0x18] sm:$0xff]   ;;  %v829_v13 = vld [vmem:[%s1092_s1 + $0xa0] sm:$0xff]   ;;  %v832_v16 = vld [vmem:[%s1092_s1 + $0xa8] sm:$0xff]  }
   0x6   :  { %784 = vmatprep.subr.bf16.mxu1 %v820_v5  ;;  %v826_v11 = vld [vmem:[%s1092_s1 + $0x98] sm:$0xff]   ;;  %v828_v14 = vld [vmem:[%s1092_s1 + $0x20] sm:$0xff]   ;;  %v831_v17 = vld [vmem:[%s1092_s1 + $0x28] sm:$0xff]  }
   0x7   :  { %705 = vmatpush3.bf16.msra.mxu0 %v819_v4  ;;  %v833_v18 = vld [vmem:[%s1092_s1 + $0x70] sm:$0xff]   ;;  %v836_v21 = vld [vmem:[%s1092_s1 + $0x78] sm:$0xff]   ;;  %v839_v26 = vld [vmem:[%s1093_s0] ss:$12 sps:$4 sm:$0xff]  }
   0x8   :  { %706 = vmatprep.subr.bf16.mxu0 %v821_v6  ;;  %v834_v19 = vld [vmem:[%s1092_s1 + $0x30] sm:$0xff]   ;;  %v838_v22 = vld [vmem:[%s1092_s1 + $0xb8] sm:$0xff]   ;;  %v843_v28 = vld [vmem:[%s1093_s0 + $0x20] ss:$12 sps:$4 sm:$0xff]  }
   0x9   :  { %785 = vmatpush3.bf16.msra.mxu1 %v820_v5  ;;  %v835_v20 = vld [vmem:[%s1092_s1 + $0xb0] sm:$0xff]   ;;  %v837_v25 = vld [vmem:[%s1092_s1 + $0x38] sm:$0xff]   ;;  %v859_v36 = vld [vmem:[%s1093_s0 + $0x80] ss:$12 sps:$4 sm:$0xff]  }
   0xa   :  { %786 = vmatprep.subr.bf16.mxu1 %v823_v8  ;;  %v841_v23 = vld [vmem:[%s1093_s0 + $0x4] ss:$12 sps:$4 sm:$0xff]   ;;  %v842_v24 = vld [vmem:[%s1093_s0 + $0x8] ss:$12 sps:$4 sm:$0xff]   ;;  %v852_v35 = vld [vmem:[%s1093_s0 + $0x4c] ss:$12 sps:$4 sm:$0xff]  }
   0xb   :  { %707 = vmatpush3.bf16.msra.mxu0 %v822_v7  ;;  %398 = vmatprep.mubr.bf16.mxu0 %v841_v23  ;;  %v844_v27 = vld [vmem:[%s1093_s0 + $0x1c] ss:$12 sps:$4 sm:$0xff]   ;;  %v850_v29 = vld [vmem:[%s1093_s0 + $0x38] ss:$12 sps:$4 sm:$0xff]   ;;  %v847_v31 = vld [vmem:[%s1093_s0 + $0x34] ss:$12 sps:$4 sm:$0xff]  }
   0xc   :  { %708 = vmatprep.subr.bf16.mxu0 %v824_v9  ;;  %798 = vmatprep.mubr.bf16.mxu1 %v842_v24  ;;  %v846_v30 = vld [vmem:[%s1093_s0 + $0x18] ss:$12 sps:$4 sm:$0xff]   ;;  %v851_v32 = vld [vmem:[%s1093_s0 + $0x50] ss:$12 sps:$4 sm:$0xff]   ;;  %v858_v33 = vld [vmem:[%s1093_s0 + $0x68] ss:$12 sps:$4 sm:$0xff]  }
   0xd   :  { %787 = vmatpush3.bf16.msra.mxu1 %v823_v8  ;;  %v849_v34 = vld [vmem:[%s1093_s0 + $0x30] ss:$12 sps:$4 sm:$0xff]   ;;  %v866_v37 = vld [vmem:[%s1093_s0 + $0x98] ss:$12 sps:$4 sm:$0xff]   ;;  %v854_v38 = vld [vmem:[%s1093_s0 + $0x48] ss:$12 sps:$4 sm:$0xff]  }
   0xe   :  { %788 = vmatprep.subr.bf16.mxu1 %v826_v11  ;;  %v855_v39 = vld [vmem:[%s1093_s0 + $0x64] ss:$12 sps:$4 sm:$0xff]   ;;  %v857_v41 = vld [vmem:[%s1093_s0 + $0x60] ss:$12 sps:$4 sm:$0xff]   ;;  %v860_v42 = vld [vmem:[%s1093_s0 + $0x7c] ss:$12 sps:$4 sm:$0xff]  }
   0xf   :  { %709 = vmatpush3.bf16.msra.mxu0 %v825_v10  ;;  %v867_v40 = vld [vmem:[%s1093_s0 + $0xb0] ss:$12 sps:$4 sm:$0xff]   ;;  %v862_v43 = vld [vmem:[%s1093_s0 + $0x78] ss:$12 sps:$4 sm:$0xff]   ;;  %v863_v44 = vld [vmem:[%s1093_s0 + $0x94] ss:$12 sps:$4 sm:$0xff]  }
  0x10   :  { %710 = vmatprep.subr.bf16.mxu0 %v827_v12  ;;  %v865_v45 = vld [vmem:[%s1093_s0 + $0x90] ss:$12 sps:$4 sm:$0xff]   ;;  %v868_v46 = vld [vmem:[%s1093_s0 + $0xac] ss:$12 sps:$4 sm:$0xff]   ;;  %v870_v47 = vld [vmem:[%s1093_s0 + $0xa8] ss:$12 sps:$4 sm:$0xff]  }
  0x11   :  { %789 = vmatpush3.bf16.msra.mxu1 %v826_v11 }
  0x12   :  { %790 = vmatprep.subr.bf16.mxu1 %v829_v13 }
  0x13   :  { %711 = vmatpush3.bf16.msra.mxu0 %v828_v14 }
  0x14   :  { %712 = vmatprep.subr.bf16.mxu0 %v830_v15 }
  0x15   :  { %791 = vmatpush3.bf16.msra.mxu1 %v829_v13 }
  0x16   :  { %792 = vmatprep.subr.bf16.mxu1 %v832_v16 }
  0x17   :  { %713 = vmatpush3.bf16.msra.mxu0 %v831_v17 }
  0x18   :  { %714 = vmatprep.subr.bf16.mxu0 %v833_v18 }
  0x19   :  { %793 = vmatpush3.bf16.msra.mxu1 %v832_v16 }
  0x1a   :  { %794 = vmatprep.subr.bf16.mxu1 %v835_v20 }
  0x1b   :  { %715 = vmatpush3.bf16.msra.mxu0 %v834_v19 }
  0x1c   :  { %716 = vmatprep.subr.bf16.mxu0 %v836_v21 }
  0x1d   :  { %795 = vmatpush3.bf16.msra.mxu1 %v835_v20 }
  0x1e   :  { %796 = vmatprep.subr.bf16.mxu1 %v838_v22 }
  0x1f   :  { %717 = vmatpush3.bf16.msra.mxu0 %v837_v25 }
  0x21   :  { %797 = vmatpush3.bf16.msra.mxu1 %v838_v22 }
  0x22   :  { %399 = vmatmul.mubr.bf16.vlgmr.msra.gmra.mrb[0].mxu0 %v839_v26 }
  0x23   :  { %406 = vmatprep.mubr.bf16.mxu0 %v844_v27 }
  0x24   :  { %799 = vmatmul.mubr.bf16.vlgmr.msra.gmra.mrb[0].mxu1 %v843_v28 }
  0x25   :  { %802 = vmatprep.mubr.bf16.mxu1 %v850_v29 }
  0x2a   :  { %407 = vmatmul.mubr.bf16.gmra.mrb[4].mxu0 %v846_v30 }
  0x2b   :  { %414 = vmatprep.mubr.bf16.mxu0 %v847_v31 }
  0x2c   :  { %803 = vmatmul.mubr.bf16.gmra.mrb[4].mxu1 %v851_v32 }
  0x2d   :  { %806 = vmatprep.mubr.bf16.mxu1 %v858_v33 }
  0x32   :  { %415 = vmatmul.mubr.bf16.gmra.mrb[8].mxu0 %v849_v34 }
  0x33   :  { %422 = vmatprep.mubr.bf16.mxu0 %v852_v35 }
  0x34   :  { %807 = vmatmul.mubr.bf16.gmra.mrb[8].mxu1 %v859_v36 }
  0x35   :  { %810 = vmatprep.mubr.bf16.mxu1 %v866_v37 }
  0x3a   :  { %423 = vmatmul.mubr.bf16.gmra.mrb[12].mxu0 %v854_v38 }
  0x3b   :  { %430 = vmatprep.mubr.bf16.mxu0 %v855_v39 }
  0x3c   :  { %811 = vmatmul.mubr.bf16.gmra.mrb[12].mxu1 %v867_v40 }
  0x42   :  { %431 = vmatmul.mubr.bf16.gmra.mrb[16].mxu0 %v857_v41 }
  0x43   :  { %438 = vmatprep.mubr.bf16.mxu0 %v860_v42 }
  0x4a   :  { %439 = vmatmul.mubr.bf16.gmra.mrb[20].mxu0 %v862_v43 }
  0x4b   :  { %446 = vmatprep.mubr.bf16.mxu0 %v863_v44 }
  0x52   :  { %447 = vmatmul.mubr.bf16.gmra.mrb[24].mxu0 %v865_v45 }
  0x53   :  { %454 = vmatprep.mubr.bf16.mxu0 %v868_v46 }
  0x5a   :  { %455 = vmatmul.mubr.bf16.gmra.mrb[28].mxu0 %v870_v47 }
  0xf5   :  { %v718_v48 = vpop.f32.mrb[0].mxu0 }
  0xf6   :  { %v719_v49 = vpop.f32.mrb[1].mxu0 }
  0xf7   :  { %v720_v50 = vadd.f32 %v719_v49, %v718_v48  ;;  %v721_v51 = vpop.f32.mrb[2].mxu0  ;;  %v800_v52 = vpop.f32.mrb[0].mxu1 }
  0xf8   :  { %v722_v53 = vpop.f32.mrb[3].mxu0  ;;  %v497_v54 = vpop.f32.mrb[1].mxu1 }
  0xf9   :  { %v723_v55 = vadd.f32 %v722_v53, %v721_v51  ;;  %v498_v56 = vadd.f32 %v720_v50, %v497_v54  ;;  %v801_v57 = vpop.f32.mrb[2].mxu1 }
  0xfa   :  { %v500_v58 = vpop.f32.mrb[3].mxu1 }
  0xfb   :  { %560 = vst [vmem:[%s1094_s2] sm:$0xff] %v498_v56  ;;  %v501_v59 = vadd.f32 %v723_v55, %v500_v58  ;;  %v602_v60 = vmul.f32 %v498_v56, %v498_v56 }
  0xfd   :  { %561 = vst [vmem:[%s1094_s2 + $0x8] sm:$0xff] %v501_v59  ;;  %v581_v61 = vadd.f32 %v501_v59, %v498_v56  ;;  %v603_v62 = vmul.f32 %v501_v59, %v501_v59  ;;  %v724_v63 = vpop.f32.mrb[4].mxu0 }
  0xfe   :  { %v725_v0 = vpop.f32.mrb[5].mxu0 }
  0xff   :  { %v618_v1 = vadd.f32 %v603_v62, %v602_v60  ;;  %v726_v2 = vadd.f32 %v725_v0, %v724_v63  ;;  %v727_v3 = vpop.f32.mrb[6].mxu0  ;;  %v804_v4 = vpop.f32.mrb[4].mxu1 }
 0x100   :  { %v728_v5 = vpop.f32.mrb[7].mxu0  ;;  %v513_v6 = vpop.f32.mrb[5].mxu1 }
 0x101   :  { %v506_v7 = vadd.f32 %v800_v52, %v726_v2  ;;  %v729_v8 = vadd.f32 %v728_v5, %v727_v3  ;;  %v805_v9 = vpop.f32.mrb[6].mxu1 }
 0x102   :  { %v516_v10 = vpop.f32.mrb[7].mxu1 }
 0x103   :  { %562 = vst [vmem:[%s1094_s2 + $0x10] sm:$0xff] %v506_v7  ;;  %v582_v11 = vadd.f32 %v581_v61, %v506_v7  ;;  %v604_v12 = vmul.f32 %v506_v7, %v506_v7  ;;  %v509_v13 = vadd.f32 %v801_v57, %v729_v8 }
 0x105   :  { %v619_v14 = vadd.f32 %v618_v1, %v604_v12  ;;  %563 = vst [vmem:[%s1094_s2 + $0x18] sm:$0xff] %v509_v13  ;;  %v605_v15 = vmul.f32 %v509_v13, %v509_v13  ;;  %v730_v16 = vpop.f32.mrb[8].mxu0  ;;  %v583_v17 = vadd.f32 %v582_v11, %v509_v13 }
 0x106   :  { %v731_v18 = vpop.f32.mrb[9].mxu0 }
 0x107   :  { %v732_v19 = vadd.f32 %v731_v18, %v730_v16  ;;  %v733_v20 = vpop.f32.mrb[10].mxu0  ;;  %v620_v21 = vadd.f32 %v619_v14, %v605_v15  ;;  %v808_v22 = vpop.f32.mrb[8].mxu1 }
 0x108   :  { %v734_v23 = vpop.f32.mrb[11].mxu0  ;;  %v529_v24 = vpop.f32.mrb[9].mxu1 }
 0x109   :  { %v735_v25 = vadd.f32 %v734_v23, %v733_v20  ;;  %v514_v26 = vadd.f32 %v732_v19, %v513_v6  ;;  %v809_v27 = vpop.f32.mrb[10].mxu1 }
 0x10a   :  { %v532_v28 = vpop.f32.mrb[11].mxu1 }
 0x10b   :  { %564 = vst [vmem:[%s1094_s2 + $0x20] sm:$0xff] %v514_v26  ;;  %v584_v29 = vadd.f32 %v583_v17, %v514_v26  ;;  %v606_v30 = vmul.f32 %v514_v26, %v514_v26  ;;  %v517_v31 = vadd.f32 %v735_v25, %v516_v10 }
 0x10d   :  { %v621_v32 = vadd.f32 %v620_v21, %v606_v30  ;;  %565 = vst [vmem:[%s1094_s2 + $0x28] sm:$0xff] %v517_v31  ;;  %v585_v33 = vadd.f32 %v584_v29, %v517_v31  ;;  %v607_v34 = vmul.f32 %v517_v31, %v517_v31  ;;  %v736_v35 = vpop.f32.mrb[12].mxu0 }
 0x10e   :  { %v737_v36 = vpop.f32.mrb[13].mxu0 }
 0x10f   :  { %v622_v37 = vadd.f32 %v621_v32, %v607_v34  ;;  %v738_v38 = vadd.f32 %v737_v36, %v736_v35  ;;  %v739_v39 = vpop.f32.mrb[14].mxu0  ;;  %v1053_v40 = vpop.f32.mrb[12].mxu1 }
 0x110   :  { %v740_v41 = vpop.f32.mrb[15].mxu0  ;;  %v545_v42 = vpop.f32.mrb[13].mxu1 }
 0x111   :  { %v522_v43 = vadd.f32 %v804_v4, %v738_v38  ;;  %v741_v44 = vadd.f32 %v740_v41, %v739_v39  ;;  %v1055_v45 = vpop.f32.mrb[14].mxu1 }
 0x112   :  { %v548_v46 = vpop.f32.mrb[15].mxu1 }
 0x113   :  { %566 = vst [vmem:[%s1094_s2 + $0x30] sm:$0xff] %v522_v43  ;;  %v586_v47 = vadd.f32 %v585_v33, %v522_v43  ;;  %v608_v48 = vmul.f32 %v522_v43, %v522_v43  ;;  %v525_v49 = vadd.f32 %v805_v9, %v741_v44 }
 0x115   :  { %v623_v50 = vadd.f32 %v622_v37, %v608_v48  ;;  %567 = vst [vmem:[%s1094_s2 + $0x38] sm:$0xff] %v525_v49  ;;  %v609_v51 = vmul.f32 %v525_v49, %v525_v49  ;;  %v742_v52 = vpop.f32.mrb[16].mxu0  ;;  %v587_v53 = vadd.f32 %v586_v47, %v525_v49 }
 0x116   :  { %v743_v54 = vpop.f32.mrb[17].mxu0 }
 0x117   :  { %v744_v55 = vadd.f32 %v743_v54, %v742_v52  ;;  %v745_v56 = vpop.f32.mrb[18].mxu0  ;;  %v624_v57 = vadd.f32 %v623_v50, %v609_v51 }
 0x118   :  { %v746_v58 = vpop.f32.mrb[19].mxu0 }
 0x119   :  { %v747_v59 = vadd.f32 %v746_v58, %v745_v56  ;;  %v530_v60 = vadd.f32 %v744_v55, %v529_v24 }
 0x11b   :  { %568 = vst [vmem:[%s1094_s2 + $0x40] sm:$0xff] %v530_v60  ;;  %v588_v61 = vadd.f32 %v587_v53, %v530_v60  ;;  %v610_v62 = vmul.f32 %v530_v60, %v530_v60  ;;  %v533_v63 = vadd.f32 %v747_v59, %v532_v28 }
 0x11d   :  { %v625_v0 = vadd.f32 %v624_v57, %v610_v62  ;;  %569 = vst [vmem:[%s1094_s2 + $0x48] sm:$0xff] %v533_v63  ;;  %v589_v1 = vadd.f32 %v588_v61, %v533_v63  ;;  %v611_v2 = vmul.f32 %v533_v63, %v533_v63  ;;  %v748_v3 = vpop.f32.mrb[20].mxu0 }
 0x11e   :  { %v749_v4 = vpop.f32.mrb[21].mxu0 }
 0x11f   :  { %v626_v5 = vadd.f32 %v625_v0, %v611_v2  ;;  %v750_v6 = vadd.f32 %v749_v4, %v748_v3  ;;  %v751_v7 = vpop.f32.mrb[22].mxu0 }
 0x120   :  { %v752_v8 = vpop.f32.mrb[23].mxu0 }
 0x121   :  { %v538_v9 = vadd.f32 %v808_v22, %v750_v6  ;;  %v753_v10 = vadd.f32 %v752_v8, %v751_v7 }
 0x123   :  { %570 = vst [vmem:[%s1094_s2 + $0x50] sm:$0xff] %v538_v9  ;;  %v590_v11 = vadd.f32 %v589_v1, %v538_v9  ;;  %v612_v12 = vmul.f32 %v538_v9, %v538_v9  ;;  %v541_v13 = vadd.f32 %v809_v27, %v753_v10 }
 0x125   :  { %v627_v14 = vadd.f32 %v626_v5, %v612_v12  ;;  %571 = vst [vmem:[%s1094_s2 + $0x58] sm:$0xff] %v541_v13  ;;  %v613_v15 = vmul.f32 %v541_v13, %v541_v13  ;;  %v754_v16 = vpop.f32.mrb[24].mxu0  ;;  %v591_v17 = vadd.f32 %v590_v11, %v541_v13 }
 0x126   :  { %v755_v18 = vpop.f32.mrb[25].mxu0 }
 0x127   :  { %v756_v19 = vadd.f32 %v755_v18, %v754_v16  ;;  %v757_v20 = vpop.f32.mrb[26].mxu0  ;;  %v628_v21 = vadd.f32 %v627_v14, %v613_v15 }
 0x128   :  { %v758_v22 = vpop.f32.mrb[27].mxu0 }
 0x129   :  { %v759_v23 = vadd.f32 %v758_v22, %v757_v20  ;;  %v546_v24 = vadd.f32 %v756_v19, %v545_v42 }
 0x12b   :  { %572 = vst [vmem:[%s1094_s2 + $0x60] sm:$0xff] %v546_v24  ;;  %v592_v25 = vadd.f32 %v591_v17, %v546_v24  ;;  %v614_v26 = vmul.f32 %v546_v24, %v546_v24  ;;  %v549_v27 = vadd.f32 %v759_v23, %v548_v46 }
 0x12d   :  { %v629_v28 = vadd.f32 %v628_v21, %v614_v26  ;;  %573 = vst [vmem:[%s1094_s2 + $0x68] sm:$0xff] %v549_v27  ;;  %v593_v29 = vadd.f32 %v592_v25, %v549_v27  ;;  %v615_v30 = vmul.f32 %v549_v27, %v549_v27  ;;  %v760_v31 = vpop.f32.mrb[28].mxu0 }
 0x12e   :  { %v761_v32 = vpop.f32.mrb[29].mxu0 }
 0x12f   :  { %v630_v33 = vadd.f32 %v629_v28, %v615_v30  ;;  %v762_v34 = vadd.f32 %v761_v32, %v760_v31  ;;  %v763_v35 = vpop.f32.mrb[30].mxu0 }
 0x130   :  { %v764_v36 = vpop.f32.mrb[31].mxu0 }
 0x131   :  { %v554_v37 = vadd.f32 %v1053_v40, %v762_v34  ;;  %v765_v38 = vadd.f32 %v764_v36, %v763_v35 }
 0x133   :  { %574 = vst [vmem:[%s1094_s2 + $0x70] sm:$0xff] %v554_v37  ;;  %v594_v39 = vadd.f32 %v593_v29, %v554_v37  ;;  %v616_v41 = vmul.f32 %v554_v37, %v554_v37  ;;  %v557_v42 = vadd.f32 %v1055_v45, %v765_v38 }
 0x135   :  { %v631_v43 = vadd.f32 %v630_v33, %v616_v41  ;;  %575 = vst [vmem:[%s1094_s2 + $0x78] sm:$0xff] %v557_v42  ;;  %v595_v44 = vadd.f32 %v594_v39, %v557_v42  ;;  %v617_v46 = vmul.f32 %v557_v42, %v557_v42 }
 0x137   :  { %v596_v47 = vrot.slane %v595_v44, 4  ;;  %v632_v48 = vadd.f32 %v631_v43, %v617_v46 }
 0x139   :  { %v597_v49 = vadd.f32 %v596_v47, %v595_v44  ;;  %v633_v40 = vrot.slane %v632_v48, 4 }
 0x13b   :  { %v598_v50 = vrot.slane %v597_v49, 2  ;;  %v634_v51 = vadd.f32 %v633_v40, %v632_v48 }
 0x13d   :  { %v599_v52 = vadd.f32 %v598_v50, %v597_v49  ;;  %v635_v53 = vrot.slane %v634_v51, 2 }
 0x13f   :  { %v600_v54 = vrot.slane %v599_v52, 1  ;;  %v636_v55 = vadd.f32 %v635_v53, %v634_v51 }
 0x141   :  { %v637_v56 = vrot.slane %v636_v55, 1  ;;  %v601_v45 = vadd.f32 %v600_v54, %v599_v52 }
 0x143   :  { %v638_v57 = vadd.f32 %v637_v56, %v636_v55 }
 0x145   :  { %v640_v58 = vsel %vm639_vm0, %v601_v45, %v638_v57 }
 0x146   :  { %v642_v59 = vsel %vm641_vm1, %v640_v58, 0.0 }
 0x147   :  { %645 = vst [vmem:[%s1095_s3] sm:$0xff] %v642_v59 }

// kernel: albedo_resnet_generator.38
= control target key start
LH: loop header
LB: loop body
LE: loop exit
PB: predicated region body
PF: predicated region fallthrough
CT: control target
= control target key end

     0   :  { %v2131_v0 = vmov 0   ;;  %s2851_s1 = inlined_call_operand.vmem [shape: bf16[512,128], index: 1, kind: input, shape index: {}]   ;;  %s2852_s0 = inlined_call_operand.vmem [shape: bf16[512,512], index: 0, kind: input, shape index: {}]   ;;  %s2853_s2 = inlined_call_operand.vmem [shape: f32[512,128], index: 2, kind: output, shape index: {}]  }
   0x1   :  { %1036 = vmatprep.subr.bf16.mxu1 %v2131_v0  ;;  %1325 = vmatprep.subr.bf16.mxu0 %v2131_v0  ;;  %v1907_v1 = vld [vmem:[%s2851_s1] sm:$0xff]   ;;  %v1909_v3 = vld [vmem:[%s2851_s1 + $0x8] sm:$0xff]   ;;  %v1911_v5 = vld [vmem:[%s2851_s1 + $0x10] sm:$0xff]  }
   0x2   :  { %v1908_v2 = vld [vmem:[%s2851_s1 + $0x80] sm:$0xff]   ;;  %1037 = vmatpush1.bf16.msra.mxu1 %v1907_v1  ;;  %v1910_v4 = vld [vmem:[%s2851_s1 + $0x88] sm:$0xff]   ;;  %v1912_v6 = vld [vmem:[%s2851_s1 + $0x90] sm:$0xff]  }
   0x3   :  { %1326 = vmatpush1.bf16.msra.mxu0 %v1908_v2  ;;  %1038 = vmatprep.subr.bf16.mxu1 %v2131_v0  ;;  %v1913_v7 = vld [vmem:[%s2851_s1 + $0x18] sm:$0xff]   ;;  %v1915_v9 = vld [vmem:[%s2851_s1 + $0x20] sm:$0xff]   ;;  %v1917_v11 = vld [vmem:[%s2851_s1 + $0x28] sm:$0xff]  }
   0x4   :  { %1327 = vmatprep.subr.bf16.mxu0 %v2131_v0  ;;  %v1914_v8 = vld [vmem:[%s2851_s1 + $0x98] sm:$0xff]   ;;  %v1916_v10 = vld [vmem:[%s2851_s1 + $0xa0] sm:$0xff]   ;;  %v1918_v12 = vld [vmem:[%s2851_s1 + $0xa8] sm:$0xff]  }
   0x5   :  { %v1919_v13 = vld [vmem:[%s2851_s1 + $0x30] sm:$0xff]   ;;  %v1921_v15 = vld [vmem:[%s2851_s1 + $0x38] sm:$0xff]   ;;  %v1923_v17 = vld [vmem:[%s2851_s1 + $0x40] sm:$0xff]  }
   0x6   :  { %1039 = vmatpush1.bf16.msra.mxu1 %v1909_v3  ;;  %v1920_v14 = vld [vmem:[%s2851_s1 + $0xb0] sm:$0xff]   ;;  %v1922_v16 = vld [vmem:[%s2851_s1 + $0xb8] sm:$0xff]   ;;  %v1924_v18 = vld [vmem:[%s2851_s1 + $0xc0] sm:$0xff]  }
   0x7   :  { %1328 = vmatpush1.bf16.msra.mxu0 %v1910_v4  ;;  %1040 = vmatprep.subr.bf16.mxu1 %v2131_v0  ;;  %v1941_v19 = vld [vmem:[%s2852_s0 + $0x4] ss:$16 sps:$4 sm:$0xff]   ;;  %v1925_v20 = vld [vmem:[%s2851_s1 + $0x48] sm:$0xff]   ;;  %v1929_v25 = vld [vmem:[%s2851_s1 + $0x58] sm:$0xff]  }
   0x8   :  { %1329 = vmatprep.subr.bf16.mxu0 %v2131_v0  ;;  %v1944_v21 = vld [vmem:[%s2852_s0 + $0xc] ss:$16 sps:$4 sm:$0xff]   ;;  %1068 = vmatprep.mubr.bf16.mxu1 %v1941_v19  ;;  %v1927_v23 = vld [vmem:[%s2851_s1 + $0x50] sm:$0xff]   ;;  %v1931_v27 = vld [vmem:[%s2851_s1 + $0x60] sm:$0xff]  }
   0x9   :  { %v1926_v22 = vld [vmem:[%s2851_s1 + $0xc8] sm:$0xff]   ;;  %1357 = vmatprep.mubr.bf16.mxu0 %v1944_v21  ;;  %v1928_v24 = vld [vmem:[%s2851_s1 + $0xd0] sm:$0xff]   ;;  %v1930_v26 = vld [vmem:[%s2851_s1 + $0xd8] sm:$0xff]  }
   0xa   :  { %1041 = vmatpush1.bf16.msra.mxu1 %v1911_v5  ;;  %v1932_v28 = vld [vmem:[%s2851_s1 + $0xe0] sm:$0xff]   ;;  %v1933_v29 = vld [vmem:[%s2851_s1 + $0x68] sm:$0xff]   ;;  %v1935_v31 = vld [vmem:[%s2851_s1 + $0x70] sm:$0xff]  }
   0xb   :  { %1330 = vmatpush1.bf16.msra.mxu0 %v1912_v6  ;;  %1042 = vmatprep.subr.bf16.mxu1 %v2131_v0  ;;  %v1934_v30 = vld [vmem:[%s2851_s1 + $0xe8] sm:$0xff]   ;;  %v1936_v32 = vld [vmem:[%s2851_s1 + $0xf0] sm:$0xff]   ;;  %v1937_v33 = vld [vmem:[%s2851_s1 + $0x78] sm:$0xff]  }
   0xc   :  { %1331 = vmatprep.subr.bf16.mxu0 %v2131_v0  ;;  %v1938_v34 = vld [vmem:[%s2851_s1 + $0xf8] sm:$0xff]   ;;  %v1939_v35 = vld [vmem:[%s2852_s0] ss:$16 sps:$4 sm:$0xff]   ;;  %v1945_v37 = vld [vmem:[%s2852_s0 + $0x24] ss:$16 sps:$4 sm:$0xff]  }
   0xd   :  { %v1942_v36 = vld [vmem:[%s2852_s0 + $0x8] ss:$16 sps:$4 sm:$0xff]   ;;  %v1947_v38 = vld [vmem:[%s2852_s0 + $0x2c] ss:$16 sps:$4 sm:$0xff]   ;;  %v1949_v39 = vld [vmem:[%s2852_s0 + $0x20] ss:$16 sps:$4 sm:$0xff]  }
   0xe   :  { %1043 = vmatpush1.bf16.msra.mxu1 %v1913_v7  ;;  %v1950_v40 = vld [vmem:[%s2852_s0 + $0x28] ss:$16 sps:$4 sm:$0xff]   ;;  %v1951_v41 = vld [vmem:[%s2852_s0 + $0x44] ss:$16 sps:$4 sm:$0xff]   ;;  %v1953_v42 = vld [vmem:[%s2852_s0 + $0x4c] ss:$16 sps:$4 sm:$0xff]  }
   0xf   :  { %1332 = vmatpush1.bf16.msra.mxu0 %v1914_v8  ;;  %1044 = vmatprep.subr.bf16.mxu1 %v2131_v0  ;;  %v1955_v43 = vld [vmem:[%s2852_s0 + $0x40] ss:$16 sps:$4 sm:$0xff]   ;;  %v1956_v44 = vld [vmem:[%s2852_s0 + $0x48] ss:$16 sps:$4 sm:$0xff]   ;;  %v1957_v45 = vld [vmem:[%s2852_s0 + $0x64] ss:$16 sps:$4 sm:$0xff]  }
  0x10   :  { %1333 = vmatprep.subr.bf16.mxu0 %v2131_v0  ;;  %v1959_v46 = vld [vmem:[%s2852_s0 + $0x6c] ss:$16 sps:$4 sm:$0xff]   ;;  %v1961_v47 = vld [vmem:[%s2852_s0 + $0x60] ss:$16 sps:$4 sm:$0xff]   ;;  %v1962_v48 = vld [vmem:[%s2852_s0 + $0x68] ss:$16 sps:$4 sm:$0xff]  }
  0x11   :  { %v1963_v49 = vld [vmem:[%s2852_s0 + $0x84] ss:$16 sps:$4 sm:$0xff]   ;;  %v1965_v50 = vld [vmem:[%s2852_s0 + $0x8c] ss:$16 sps:$4 sm:$0xff]   ;;  %v1967_v51 = vld [vmem:[%s2852_s0 + $0x80] ss:$16 sps:$4 sm:$0xff]  }
  0x12   :  { %1045 = vmatpush1.bf16.msra.mxu1 %v1915_v9  ;;  %v1968_v52 = vld [vmem:[%s2852_s0 + $0x88] ss:$16 sps:$4 sm:$0xff]   ;;  %v1969_v53 = vld [vmem:[%s2852_s0 + $0xa4] ss:$16 sps:$4 sm:$0xff]   ;;  %v1971_v54 = vld [vmem:[%s2852_s0 + $0xac] ss:$16 sps:$4 sm:$0xff]  }
  0x13   :  { %1334 = vmatpush1.bf16.msra.mxu0 %v1916_v10  ;;  %1046 = vmatprep.subr.bf16.mxu1 %v2131_v0  ;;  %v1973_v55 = vld [vmem:[%s2852_s0 + $0xa0] ss:$16 sps:$4 sm:$0xff]   ;;  %v1974_v56 = vld [vmem:[%s2852_s0 + $0xa8] ss:$16 sps:$4 sm:$0xff]   ;;  %v1975_v57 = vld [vmem:[%s2852_s0 + $0xc4] ss:$16 sps:$4 sm:$0xff]  }
  0x14   :  { %1335 = vmatprep.subr.bf16.mxu0 %v2131_v0  ;;  %v1977_v58 = vld [vmem:[%s2852_s0 + $0xcc] ss:$16 sps:$4 sm:$0xff]   ;;  %v1979_v59 = vld [vmem:[%s2852_s0 + $0xc0] ss:$16 sps:$4 sm:$0xff]   ;;  %v1980_v60 = vld [vmem:[%s2852_s0 + $0xc8] ss:$16 sps:$4 sm:$0xff]  }
  0x15   :  { %v1981_v61 = vld [vmem:[%s2852_s0 + $0xe4] ss:$16 sps:$4 sm:$0xff]   ;;  %v1983_v62 = vld [vmem:[%s2852_s0 + $0xec] ss:$16 sps:$4 sm:$0xff]   ;;  %v1985_v63 = vld [vmem:[%s2852_s0 + $0xe0] ss:$16 sps:$4 sm:$0xff]  }
  0x16   :  { %1047 = vmatpush1.bf16.msra.mxu1 %v1917_v11  ;;  %v1987_v1 = vld [vmem:[%s2852_s0 + $0x104] ss:$16 sps:$4 sm:$0xff]   ;;  %v1989_v2 = vld [vmem:[%s2852_s0 + $0x10c] ss:$16 sps:$4 sm:$0xff]   ;;  %v1991_v3 = vld [vmem:[%s2852_s0 + $0x100] ss:$16 sps:$4 sm:$0xff]  }
  0x17   :  { %1336 = vmatpush1.bf16.msra.mxu0 %v1918_v12  ;;  %1048 = vmatprep.subr.bf16.mxu1 %v2131_v0  ;;  %v1992_v4 = vld [vmem:[%s2852_s0 + $0x108] ss:$16 sps:$4 sm:$0xff]   ;;  %v1993_v5 = vld [vmem:[%s2852_s0 + $0x124] ss:$16 sps:$4 sm:$0xff]   ;;  %v1995_v6 = vld [vmem:[%s2852_s0 + $0x12c] ss:$16 sps:$4 sm:$0xff]  }
  0x18   :  { %1337 = vmatprep.subr.bf16.mxu0 %v2131_v0  ;;  %v1997_v7 = vld [vmem:[%s2852_s0 + $0x120] ss:$16 sps:$4 sm:$0xff]   ;;  %v1998_v8 = vld [vmem:[%s2852_s0 + $0x128] ss:$16 sps:$4 sm:$0xff]   ;;  %v1999_v9 = vld [vmem:[%s2852_s0 + $0x144] ss:$16 sps:$4 sm:$0xff]  }
  0x19   :  { %v2001_v10 = vld [vmem:[%s2852_s0 + $0x14c] ss:$16 sps:$4 sm:$0xff]   ;;  %v2003_v11 = vld [vmem:[%s2852_s0 + $0x140] ss:$16 sps:$4 sm:$0xff]   ;;  %v2004_v12 = vld [vmem:[%s2852_s0 + $0x148] ss:$16 sps:$4 sm:$0xff]  }
  0x1a   :  { %1049 = vmatpush1.bf16.msra.mxu1 %v1919_v13  ;;  %v2005_v13 = vld [vmem:[%s2852_s0 + $0x164] ss:$16 sps:$4 sm:$0xff]   ;;  %v2015_v19 = vld [vmem:[%s2852_s0 + $0x180] ss:$16 sps:$4 sm:$0xff]  }
  0x1b   :  { %1338 = vmatpush1.bf16.msra.mxu0 %v1920_v14  ;;  %1050 = vmatprep.subr.bf16.mxu1 %v2131_v0  ;;  %v2007_v14 = vld [vmem:[%s2852_s0 + $0x16c] ss:$16 sps:$4 sm:$0xff]   ;;  %v2017_v21 = vld [vmem:[%s2852_s0 + $0x1a4] ss:$16 sps:$4 sm:$0xff]  }
  0x1c   :  { %1339 = vmatprep.subr.bf16.mxu0 %v2131_v0 }
  0x1e   :  { %1051 = vmatpush1.bf16.msra.mxu1 %v1921_v15  ;;  %v2009_v15 = vld [vmem:[%s2852_s0 + $0x160] ss:$16 sps:$4 sm:$0xff]  }
  0x1f   :  { %1340 = vmatpush1.bf16.msra.mxu0 %v1922_v16  ;;  %1052 = vmatprep.subr.bf16.mxu1 %v2131_v0  ;;  %v2010_v16 = vld [vmem:[%s2852_s0 + $0x168] ss:$16 sps:$4 sm:$0xff]  }
  0x20   :  { %1341 = vmatprep.subr.bf16.mxu0 %v2131_v0 }
  0x22   :  { %1053 = vmatpush1.bf16.msra.mxu1 %v1923_v17  ;;  %v2011_v17 = vld [vmem:[%s2852_s0 + $0x184] ss:$16 sps:$4 sm:$0xff]  }
  0x23   :  { %1342 = vmatpush1.bf16.msra.mxu0 %v1924_v18  ;;  %1054 = vmatprep.subr.bf16.mxu1 %v2131_v0  ;;  %v2013_v18 = vld [vmem:[%s2852_s0 + $0x18c] ss:$16 sps:$4 sm:$0xff]  }
  0x24   :  { %1343 = vmatprep.subr.bf16.mxu0 %v2131_v0 }
  0x26   :  { %1055 = vmatpush1.bf16.msra.mxu1 %v1925_v20  ;;  %v2016_v20 = vld [vmem:[%s2852_s0 + $0x188] ss:$16 sps:$4 sm:$0xff]  }
  0x27   :  { %1344 = vmatpush1.bf16.msra.mxu0 %v1926_v22  ;;  %1056 = vmatprep.subr.bf16.mxu1 %v2131_v0  ;;  %v2019_v22 = vld [vmem:[%s2852_s0 + $0x1ac] ss:$16 sps:$4 sm:$0xff]  }
  0x28   :  { %1345 = vmatprep.subr.bf16.mxu0 %v2131_v0 }
  0x2a   :  { %1057 = vmatpush1.bf16.msra.mxu1 %v1927_v23  ;;  %v2021_v23 = vld [vmem:[%s2852_s0 + $0x1a0] ss:$16 sps:$4 sm:$0xff]  }
  0x2b   :  { %1346 = vmatpush1.bf16.msra.mxu0 %v1928_v24  ;;  %1058 = vmatprep.subr.bf16.mxu1 %v2131_v0  ;;  %v2022_v24 = vld [vmem:[%s2852_s0 + $0x1a8] ss:$16 sps:$4 sm:$0xff]  }
  0x2c   :  { %1347 = vmatprep.subr.bf16.mxu0 %v2131_v0 }
  0x2e   :  { %1059 = vmatpush1.bf16.msra.mxu1 %v1929_v25  ;;  %v2023_v25 = vld [vmem:[%s2852_s0 + $0x1c4] ss:$16 sps:$4 sm:$0xff]  }
  0x2f   :  { %1348 = vmatpush1.bf16.msra.mxu0 %v1930_v26  ;;  %1060 = vmatprep.subr.bf16.mxu1 %v2131_v0  ;;  %v2025_v26 = vld [vmem:[%s2852_s0 + $0x1cc] ss:$16 sps:$4 sm:$0xff]  }
  0x30   :  { %1349 = vmatprep.subr.bf16.mxu0 %v2131_v0 }
  0x32   :  { %1061 = vmatpush1.bf16.msra.mxu1 %v1931_v27  ;;  %v2027_v27 = vld [vmem:[%s2852_s0 + $0x1c0] ss:$16 sps:$4 sm:$0xff]  }
  0x33   :  { %1350 = vmatpush1.bf16.msra.mxu0 %v1932_v28  ;;  %1062 = vmatprep.subr.bf16.mxu1 %v2131_v0  ;;  %v2028_v28 = vld [vmem:[%s2852_s0 + $0x1c8] ss:$16 sps:$4 sm:$0xff]  }
  0x34   :  { %1351 = vmatprep.subr.bf16.mxu0 %v2131_v0 }
  0x36   :  { %1063 = vmatpush1.bf16.msra.mxu1 %v1933_v29  ;;  %v2029_v29 = vld [vmem:[%s2852_s0 + $0x1e4] ss:$16 sps:$4 sm:$0xff]  }
  0x37   :  { %1352 = vmatpush1.bf16.msra.mxu0 %v1934_v30  ;;  %1064 = vmatprep.subr.bf16.mxu1 %v2131_v0  ;;  %v2031_v30 = vld [vmem:[%s2852_s0 + $0x1ec] ss:$16 sps:$4 sm:$0xff]  }
  0x38   :  { %1353 = vmatprep.subr.bf16.mxu0 %v2131_v0 }
  0x3a   :  { %1065 = vmatpush1.bf16.msra.mxu1 %v1935_v31  ;;  %v2033_v31 = vld [vmem:[%s2852_s0 + $0x1e0] ss:$16 sps:$4 sm:$0xff]  }
  0x3b   :  { %1354 = vmatpush1.bf16.msra.mxu0 %v1936_v32  ;;  %1066 = vmatprep.subr.bf16.mxu1 %v2131_v0  ;;  %v2034_v32 = vld [vmem:[%s2852_s0 + $0x1e8] ss:$16 sps:$4 sm:$0xff]  }
  0x3c   :  { %1355 = vmatprep.subr.bf16.mxu0 %v2131_v0  ;;  %v1986_v0 = vld [vmem:[%s2852_s0 + $0xe8] ss:$16 sps:$4 sm:$0xff]  }
  0x3e   :  { %1067 = vmatpush1.bf16.msra.mxu1 %v1937_v33  ;;  %v2035_v33 = vld [vmem:[%s2852_s0 + $0x204] ss:$16 sps:$4 sm:$0xff]  }
  0x3f   :  { %1356 = vmatpush1.bf16.msra.mxu0 %v1938_v34  ;;  %v2037_v34 = vld [vmem:[%s2852_s0 + $0x20c] ss:$16 sps:$4 sm:$0xff]  }
  0x41   :  { %1069 = vmatmul.mubr.bf16.vlgmr.msra.gmra.mrb[0].mxu1 %v1939_v35  ;;  %v2039_v35 = vld [vmem:[%s2852_s0 + $0x200] ss:$16 sps:$4 sm:$0xff]  }
  0x42   :  { %1358 = vmatmul.mubr.bf16.vlgmr.msra.gmra.mrb[0].mxu0 %v1942_v36  ;;  %1076 = vmatprep.mubr.bf16.mxu1 %v1945_v37  ;;  %v2040_v36 = vld [vmem:[%s2852_s0 + $0x208] ss:$16 sps:$4 sm:$0xff]   ;;  %v2041_v37 = vld [vmem:[%s2852_s0 + $0x224] ss:$16 sps:$4 sm:$0xff]  }
  0x43   :  { %1365 = vmatprep.mubr.bf16.mxu0 %v1947_v38  ;;  %v2043_v38 = vld [vmem:[%s2852_s0 + $0x22c] ss:$16 sps:$4 sm:$0xff]  }
  0x49   :  { %1077 = vmatmul.mubr.bf16.gmra.mrb[4].mxu1 %v1949_v39  ;;  %v2045_v39 = vld [vmem:[%s2852_s0 + $0x220] ss:$16 sps:$4 sm:$0xff]  }
  0x4a   :  { %1366 = vmatmul.mubr.bf16.gmra.mrb[4].mxu0 %v1950_v40  ;;  %1084 = vmatprep.mubr.bf16.mxu1 %v1951_v41  ;;  %v2046_v40 = vld [vmem:[%s2852_s0 + $0x228] ss:$16 sps:$4 sm:$0xff]   ;;  %v2047_v41 = vld [vmem:[%s2852_s0 + $0x244] ss:$16 sps:$4 sm:$0xff]  }
  0x4b   :  { %1373 = vmatprep.mubr.bf16.mxu0 %v1953_v42  ;;  %v2049_v42 = vld [vmem:[%s2852_s0 + $0x24c] ss:$16 sps:$4 sm:$0xff]  }
  0x51   :  { %1085 = vmatmul.mubr.bf16.gmra.mrb[8].mxu1 %v1955_v43  ;;  %v2051_v43 = vld [vmem:[%s2852_s0 + $0x240] ss:$16 sps:$4 sm:$0xff]  }
  0x52   :  { %1374 = vmatmul.mubr.bf16.gmra.mrb[8].mxu0 %v1956_v44  ;;  %1092 = vmatprep.mubr.bf16.mxu1 %v1957_v45  ;;  %v2052_v44 = vld [vmem:[%s2852_s0 + $0x248] ss:$16 sps:$4 sm:$0xff]   ;;  %v2053_v45 = vld [vmem:[%s2852_s0 + $0x264] ss:$16 sps:$4 sm:$0xff]  }
  0x53   :  { %1381 = vmatprep.mubr.bf16.mxu0 %v1959_v46  ;;  %v2055_v46 = vld [vmem:[%s2852_s0 + $0x26c] ss:$16 sps:$4 sm:$0xff]  }
  0x59   :  { %1093 = vmatmul.mubr.bf16.gmra.mrb[12].mxu1 %v1961_v47  ;;  %v2057_v47 = vld [vmem:[%s2852_s0 + $0x260] ss:$16 sps:$4 sm:$0xff]  }
  0x5a   :  { %1382 = vmatmul.mubr.bf16.gmra.mrb[12].mxu0 %v1962_v48  ;;  %1100 = vmatprep.mubr.bf16.mxu1 %v1963_v49  ;;  %v2058_v48 = vld [vmem:[%s2852_s0 + $0x268] ss:$16 sps:$4 sm:$0xff]   ;;  %v2059_v49 = vld [vmem:[%s2852_s0 + $0x284] ss:$16 sps:$4 sm:$0xff]  }
  0x5b   :  { %1389 = vmatprep.mubr.bf16.mxu0 %v1965_v50  ;;  %v2061_v50 = vld [vmem:[%s2852_s0 + $0x28c] ss:$16 sps:$4 sm:$0xff]  }
  0x61   :  { %1101 = vmatmul.mubr.bf16.gmra.mrb[16].mxu1 %v1967_v51  ;;  %v2063_v51 = vld [vmem:[%s2852_s0 + $0x280] ss:$16 sps:$4 sm:$0xff]  }
  0x62   :  { %1390 = vmatmul.mubr.bf16.gmra.mrb[16].mxu0 %v1968_v52  ;;  %1108 = vmatprep.mubr.bf16.mxu1 %v1969_v53  ;;  %v2064_v52 = vld [vmem:[%s2852_s0 + $0x288] ss:$16 sps:$4 sm:$0xff]   ;;  %v2065_v53 = vld [vmem:[%s2852_s0 + $0x2a4] ss:$16 sps:$4 sm:$0xff]  }
  0x63   :  { %1397 = vmatprep.mubr.bf16.mxu0 %v1971_v54  ;;  %v2067_v54 = vld [vmem:[%s2852_s0 + $0x2ac] ss:$16 sps:$4 sm:$0xff]  }
  0x69   :  { %1109 = vmatmul.mubr.bf16.gmra.mrb[20].mxu1 %v1973_v55  ;;  %v2069_v55 = vld [vmem:[%s2852_s0 + $0x2a0] ss:$16 sps:$4 sm:$0xff]  }
  0x6a   :  { %1398 = vmatmul.mubr.bf16.gmra.mrb[20].mxu0 %v1974_v56  ;;  %1116 = vmatprep.mubr.bf16.mxu1 %v1975_v57  ;;  %v2070_v56 = vld [vmem:[%s2852_s0 + $0x2a8] ss:$16 sps:$4 sm:$0xff]   ;;  %v2071_v57 = vld [vmem:[%s2852_s0 + $0x2c4] ss:$16 sps:$4 sm:$0xff]  }
  0x6b   :  { %1405 = vmatprep.mubr.bf16.mxu0 %v1977_v58  ;;  %v2073_v58 = vld [vmem:[%s2852_s0 + $0x2cc] ss:$16 sps:$4 sm:$0xff]  }
  0x71   :  { %1117 = vmatmul.mubr.bf16.gmra.mrb[24].mxu1 %v1979_v59  ;;  %v2075_v59 = vld [vmem:[%s2852_s0 + $0x2c0] ss:$16 sps:$4 sm:$0xff]  }
  0x72   :  { %1406 = vmatmul.mubr.bf16.gmra.mrb[24].mxu0 %v1980_v60  ;;  %1124 = vmatprep.mubr.bf16.mxu1 %v1981_v61  ;;  %v2076_v60 = vld [vmem:[%s2852_s0 + $0x2c8] ss:$16 sps:$4 sm:$0xff]   ;;  %v2077_v61 = vld [vmem:[%s2852_s0 + $0x2e4] ss:$16 sps:$4 sm:$0xff]  }
  0x73   :  { %1413 = vmatprep.mubr.bf16.mxu0 %v1983_v62  ;;  %v2079_v62 = vld [vmem:[%s2852_s0 + $0x2ec] ss:$16 sps:$4 sm:$0xff]  }
  0x79   :  { %1125 = vmatmul.mubr.bf16.gmra.mrb[28].mxu1 %v1985_v63  ;;  %v2081_v63 = vld [vmem:[%s2852_s0 + $0x2e0] ss:$16 sps:$4 sm:$0xff]  }
  0x7a   :  { %1414 = vmatmul.mubr.bf16.gmra.mrb[28].mxu0 %v1986_v0  ;;  %1132 = vmatprep.mubr.bf16.mxu1 %v1987_v1  ;;  %v2082_v0 = vld [vmem:[%s2852_s0 + $0x2e8] ss:$16 sps:$4 sm:$0xff]   ;;  %v2083_v1 = vld [vmem:[%s2852_s0 + $0x304] ss:$16 sps:$4 sm:$0xff]  }
  0x7b   :  { %1421 = vmatprep.mubr.bf16.mxu0 %v1989_v2  ;;  %v2085_v2 = vld [vmem:[%s2852_s0 + $0x30c] ss:$16 sps:$4 sm:$0xff]  }
  0x81   :  { %1133 = vmatmul.mubr.bf16.gmra.mrb[32].mxu1 %v1991_v3  ;;  %v2087_v3 = vld [vmem:[%s2852_s0 + $0x300] ss:$16 sps:$4 sm:$0xff]  }
  0x82   :  { %1422 = vmatmul.mubr.bf16.gmra.mrb[32].mxu0 %v1992_v4  ;;  %1140 = vmatprep.mubr.bf16.mxu1 %v1993_v5  ;;  %v2088_v4 = vld [vmem:[%s2852_s0 + $0x308] ss:$16 sps:$4 sm:$0xff]   ;;  %v2089_v5 = vld [vmem:[%s2852_s0 + $0x324] ss:$16 sps:$4 sm:$0xff]  }
  0x83   :  { %1429 = vmatprep.mubr.bf16.mxu0 %v1995_v6  ;;  %v2091_v6 = vld [vmem:[%s2852_s0 + $0x32c] ss:$16 sps:$4 sm:$0xff]  }
  0x89   :  { %1141 = vmatmul.mubr.bf16.gmra.mrb[36].mxu1 %v1997_v7  ;;  %v2093_v7 = vld [vmem:[%s2852_s0 + $0x320] ss:$16 sps:$4 sm:$0xff]  }
  0x8a   :  { %1430 = vmatmul.mubr.bf16.gmra.mrb[36].mxu0 %v1998_v8  ;;  %1148 = vmatprep.mubr.bf16.mxu1 %v1999_v9  ;;  %v2094_v8 = vld [vmem:[%s2852_s0 + $0x328] ss:$16 sps:$4 sm:$0xff]   ;;  %v2095_v9 = vld [vmem:[%s2852_s0 + $0x344] ss:$16 sps:$4 sm:$0xff]  }
  0x8b   :  { %1437 = vmatprep.mubr.bf16.mxu0 %v2001_v10  ;;  %v2097_v10 = vld [vmem:[%s2852_s0 + $0x34c] ss:$16 sps:$4 sm:$0xff]  }
  0x91   :  { %1149 = vmatmul.mubr.bf16.gmra.mrb[40].mxu1 %v2003_v11  ;;  %v2099_v11 = vld [vmem:[%s2852_s0 + $0x340] ss:$16 sps:$4 sm:$0xff]  }
  0x92   :  { %1438 = vmatmul.mubr.bf16.gmra.mrb[40].mxu0 %v2004_v12  ;;  %1156 = vmatprep.mubr.bf16.mxu1 %v2005_v13  ;;  %v2100_v12 = vld [vmem:[%s2852_s0 + $0x348] ss:$16 sps:$4 sm:$0xff]   ;;  %v2101_v13 = vld [vmem:[%s2852_s0 + $0x364] ss:$16 sps:$4 sm:$0xff]  }
  0x93   :  { %1445 = vmatprep.mubr.bf16.mxu0 %v2007_v14  ;;  %v2103_v14 = vld [vmem:[%s2852_s0 + $0x36c] ss:$16 sps:$4 sm:$0xff]  }
  0x99   :  { %1157 = vmatmul.mubr.bf16.gmra.mrb[44].mxu1 %v2009_v15 }
  0x9a   :  { %1446 = vmatmul.mubr.bf16.gmra.mrb[44].mxu0 %v2010_v16  ;;  %1164 = vmatprep.mubr.bf16.mxu1 %v2011_v17 }
  0x9b   :  { %1453 = vmatprep.mubr.bf16.mxu0 %v2013_v18  ;;  %v2105_v18 = vld [vmem:[%s2852_s0 + $0x360] ss:$16 sps:$4 sm:$0xff]  }
  0xa1   :  { %1165 = vmatmul.mubr.bf16.gmra.mrb[48].mxu1 %v2015_v19 }
  0xa2   :  { %1454 = vmatmul.mubr.bf16.gmra.mrb[48].mxu0 %v2016_v20  ;;  %1172 = vmatprep.mubr.bf16.mxu1 %v2017_v21 }
  0xa3   :  { %1461 = vmatprep.mubr.bf16.mxu0 %v2019_v22  ;;  %v2106_v22 = vld [vmem:[%s2852_s0 + $0x368] ss:$16 sps:$4 sm:$0xff]  }
  0xa9   :  { %1173 = vmatmul.mubr.bf16.gmra.mrb[52].mxu1 %v2021_v23  ;;  %v2107_v23 = vld [vmem:[%s2852_s0 + $0x384] ss:$16 sps:$4 sm:$0xff]  }
  0xaa   :  { %1462 = vmatmul.mubr.bf16.gmra.mrb[52].mxu0 %v2022_v24  ;;  %1180 = vmatprep.mubr.bf16.mxu1 %v2023_v25 }
  0xab   :  { %1469 = vmatprep.mubr.bf16.mxu0 %v2025_v26  ;;  %v2109_v26 = vld [vmem:[%s2852_s0 + $0x38c] ss:$16 sps:$4 sm:$0xff]  }
  0xb1   :  { %1181 = vmatmul.mubr.bf16.gmra.mrb[56].mxu1 %v2027_v27 }
  0xb2   :  { %1470 = vmatmul.mubr.bf16.gmra.mrb[56].mxu0 %v2028_v28  ;;  %1188 = vmatprep.mubr.bf16.mxu1 %v2029_v29 }
  0xb3   :  { %1477 = vmatprep.mubr.bf16.mxu0 %v2031_v30 }
  0xb9   :  { %1189 = vmatmul.mubr.bf16.gmra.mrb[60].mxu1 %v2033_v31 }
  0xba   :  { %1478 = vmatmul.mubr.bf16.gmra.mrb[60].mxu0 %v2034_v32  ;;  %1196 = vmatprep.mubr.bf16.mxu1 %v2035_v33  ;;  %v2111_v32 = vld [vmem:[%s2852_s0 + $0x380] ss:$16 sps:$4 sm:$0xff]  }
  0xbb   :  { %1485 = vmatprep.mubr.bf16.mxu0 %v2037_v34 }
  0xc1   :  { %1197 = vmatmul.mubr.bf16.gmra.mrb[64].mxu1 %v2039_v35 }
  0xc2   :  { %1486 = vmatmul.mubr.bf16.gmra.mrb[64].mxu0 %v2040_v36  ;;  %1204 = vmatprep.mubr.bf16.mxu1 %v2041_v37  ;;  %v2112_v36 = vld [vmem:[%s2852_s0 + $0x388] ss:$16 sps:$4 sm:$0xff]   ;;  %v2113_v37 = vld [vmem:[%s2852_s0 + $0x3a4] ss:$16 sps:$4 sm:$0xff]  }
  0xc3   :  { %1493 = vmatprep.mubr.bf16.mxu0 %v2043_v38 }
  0xc9   :  { %1205 = vmatmul.mubr.bf16.gmra.mrb[68].mxu1 %v2045_v39 }
  0xca   :  { %1494 = vmatmul.mubr.bf16.gmra.mrb[68].mxu0 %v2046_v40  ;;  %1212 = vmatprep.mubr.bf16.mxu1 %v2047_v41  ;;  %v2115_v40 = vld [vmem:[%s2852_s0 + $0x3ac] ss:$16 sps:$4 sm:$0xff]  }
  0xcb   :  { %1501 = vmatprep.mubr.bf16.mxu0 %v2049_v42 }
  0xd1   :  { %1213 = vmatmul.mubr.bf16.gmra.mrb[72].mxu1 %v2051_v43 }
  0xd2   :  { %1502 = vmatmul.mubr.bf16.gmra.mrb[72].mxu0 %v2052_v44  ;;  %1220 = vmatprep.mubr.bf16.mxu1 %v2053_v45 }
  0xd3   :  { %1509 = vmatprep.mubr.bf16.mxu0 %v2055_v46  ;;  %v2117_v46 = vld [vmem:[%s2852_s0 + $0x3a0] ss:$16 sps:$4 sm:$0xff]  }
  0xd9   :  { %1221 = vmatmul.mubr.bf16.gmra.mrb[76].mxu1 %v2057_v47 }
  0xda   :  { %1510 = vmatmul.mubr.bf16.gmra.mrb[76].mxu0 %v2058_v48  ;;  %1228 = vmatprep.mubr.bf16.mxu1 %v2059_v49 }
  0xdb   :  { %1517 = vmatprep.mubr.bf16.mxu0 %v2061_v50  ;;  %v2118_v50 = vld [vmem:[%s2852_s0 + $0x3a8] ss:$16 sps:$4 sm:$0xff]  }
  0xe1   :  { %1229 = vmatmul.mubr.bf16.gmra.mrb[80].mxu1 %v2063_v51  ;;  %v2119_v51 = vld [vmem:[%s2852_s0 + $0x3c4] ss:$16 sps:$4 sm:$0xff]  }
  0xe2   :  { %1518 = vmatmul.mubr.bf16.gmra.mrb[80].mxu0 %v2064_v52  ;;  %1236 = vmatprep.mubr.bf16.mxu1 %v2065_v53 }
  0xe3   :  { %1525 = vmatprep.mubr.bf16.mxu0 %v2067_v54  ;;  %v2121_v54 = vld [vmem:[%s2852_s0 + $0x3cc] ss:$16 sps:$4 sm:$0xff]  }
  0xe9   :  { %1237 = vmatmul.mubr.bf16.gmra.mrb[84].mxu1 %v2069_v55 }
  0xea   :  { %1526 = vmatmul.mubr.bf16.gmra.mrb[84].mxu0 %v2070_v56  ;;  %1244 = vmatprep.mubr.bf16.mxu1 %v2071_v57 }
  0xeb   :  { %1533 = vmatprep.mubr.bf16.mxu0 %v2073_v58 }
  0xf1   :  { %1245 = vmatmul.mubr.bf16.gmra.mrb[88].mxu1 %v2075_v59 }
  0xf2   :  { %1534 = vmatmul.mubr.bf16.gmra.mrb[88].mxu0 %v2076_v60  ;;  %1252 = vmatprep.mubr.bf16.mxu1 %v2077_v61  ;;  %v2123_v60 = vld [vmem:[%s2852_s0 + $0x3c0] ss:$16 sps:$4 sm:$0xff]  }
  0xf3   :  { %1541 = vmatprep.mubr.bf16.mxu0 %v2079_v62 }
  0xf9   :  { %1253 = vmatmul.mubr.bf16.gmra.mrb[92].mxu1 %v2081_v63 }
  0xfa   :  { %1542 = vmatmul.mubr.bf16.gmra.mrb[92].mxu0 %v2082_v0  ;;  %1260 = vmatprep.mubr.bf16.mxu1 %v2083_v1  ;;  %v2124_v0 = vld [vmem:[%s2852_s0 + $0x3c8] ss:$16 sps:$4 sm:$0xff]   ;;  %v2125_v1 = vld [vmem:[%s2852_s0 + $0x3e4] ss:$16 sps:$4 sm:$0xff]  }
  0xfb   :  { %1549 = vmatprep.mubr.bf16.mxu0 %v2085_v2 }
 0x101   :  { %1261 = vmatmul.mubr.bf16.gmra.mrb[96].mxu1 %v2087_v3 }
 0x102   :  { %1550 = vmatmul.mubr.bf16.gmra.mrb[96].mxu0 %v2088_v4  ;;  %1268 = vmatprep.mubr.bf16.mxu1 %v2089_v5  ;;  %v2127_v4 = vld [vmem:[%s2852_s0 + $0x3ec] ss:$16 sps:$4 sm:$0xff]  }
 0x103   :  { %1557 = vmatprep.mubr.bf16.mxu0 %v2091_v6 }
 0x109   :  { %1269 = vmatmul.mubr.bf16.gmra.mrb[100].mxu1 %v2093_v7 }
 0x10a   :  { %1558 = vmatmul.mubr.bf16.gmra.mrb[100].mxu0 %v2094_v8  ;;  %1276 = vmatprep.mubr.bf16.mxu1 %v2095_v9 }
 0x10b   :  { %1565 = vmatprep.mubr.bf16.mxu0 %v2097_v10  ;;  %v2129_v10 = vld [vmem:[%s2852_s0 + $0x3e0] ss:$16 sps:$4 sm:$0xff]  }
 0x111   :  { %1277 = vmatmul.mubr.bf16.gmra.mrb[104].mxu1 %v2099_v11 }
 0x112   :  { %1566 = vmatmul.mubr.bf16.gmra.mrb[104].mxu0 %v2100_v12  ;;  %1284 = vmatprep.mubr.bf16.mxu1 %v2101_v13 }
 0x113   :  { %1573 = vmatprep.mubr.bf16.mxu0 %v2103_v14  ;;  %v2130_v14 = vld [vmem:[%s2852_s0 + $0x3e8] ss:$16 sps:$4 sm:$0xff]  }
 0x114   :  { %v1070_v15 = vpop.f32.mrb[0].mxu1 }
 0x115   :  { %v1359_v16 = vpop.f32.mrb[0].mxu0  ;;  %v1072_v17 = vpop.f32.mrb[1].mxu1 }
 0x116   :  { %v1360_v19 = vadd.f32 %v1359_v16, %v1070_v15  ;;  %v1361_v20 = vpop.f32.mrb[1].mxu0  ;;  %v1073_v21 = vpop.f32.mrb[2].mxu1 }
 0x117   :  { %v1362_v24 = vpop.f32.mrb[2].mxu0  ;;  %v1075_v25 = vpop.f32.mrb[3].mxu1 }
 0x118   :  { %1614 = vst [vmem:[%s2853_s2] sm:$0xff] %v1360_v19  ;;  %v1363_v27 = vadd.f32 %v1362_v24, %v1073_v21  ;;  %v1364_v28 = vpop.f32.mrb[3].mxu0 }
 0x119   :  { %1285 = vmatmul.mubr.bf16.gmra.mrb[108].mxu1 %v2105_v18 }
 0x11a   :  { %1615 = vst [vmem:[%s2853_s2 + $0x8] sm:$0xff] %v1363_v27  ;;  %1574 = vmatmul.mubr.bf16.gmra.mrb[108].mxu0 %v2106_v22  ;;  %1292 = vmatprep.mubr.bf16.mxu1 %v2107_v23 }
 0x11b   :  { %1581 = vmatprep.mubr.bf16.mxu0 %v2109_v26 }
 0x11c   :  { %v1078_v29 = vpop.f32.mrb[4].mxu1 }
 0x11d   :  { %v1367_v30 = vpop.f32.mrb[4].mxu0  ;;  %v1080_v31 = vpop.f32.mrb[5].mxu1 }
 0x11e   :  { %v1368_v33 = vadd.f32 %v1367_v30, %v1078_v29  ;;  %v1369_v34 = vpop.f32.mrb[5].mxu0  ;;  %v1081_v35 = vpop.f32.mrb[6].mxu1 }
 0x11f   :  { %v1370_v38 = vpop.f32.mrb[6].mxu0  ;;  %v1083_v39 = vpop.f32.mrb[7].mxu1 }
 0x120   :  { %1616 = vst [vmem:[%s2853_s2 + $0x10] sm:$0xff] %v1368_v33  ;;  %v1371_v41 = vadd.f32 %v1370_v38, %v1081_v35  ;;  %v1372_v42 = vpop.f32.mrb[7].mxu0 }
 0x121   :  { %1293 = vmatmul.mubr.bf16.gmra.mrb[112].mxu1 %v2111_v32 }
 0x122   :  { %1617 = vst [vmem:[%s2853_s2 + $0x18] sm:$0xff] %v1371_v41  ;;  %1582 = vmatmul.mubr.bf16.gmra.mrb[112].mxu0 %v2112_v36  ;;  %1300 = vmatprep.mubr.bf16.mxu1 %v2113_v37 }
 0x123   :  { %1589 = vmatprep.mubr.bf16.mxu0 %v2115_v40 }
 0x124   :  { %v1086_v43 = vpop.f32.mrb[8].mxu1 }
 0x125   :  { %v1375_v44 = vpop.f32.mrb[8].mxu0  ;;  %v1088_v45 = vpop.f32.mrb[9].mxu1 }
 0x126   :  { %v1376_v47 = vadd.f32 %v1375_v44, %v1086_v43  ;;  %v1377_v48 = vpop.f32.mrb[9].mxu0  ;;  %v1089_v49 = vpop.f32.mrb[10].mxu1 }
 0x127   :  { %v1378_v52 = vpop.f32.mrb[10].mxu0  ;;  %v1091_v53 = vpop.f32.mrb[11].mxu1 }
 0x128   :  { %1618 = vst [vmem:[%s2853_s2 + $0x20] sm:$0xff] %v1376_v47  ;;  %v1379_v55 = vadd.f32 %v1378_v52, %v1089_v49  ;;  %v1380_v56 = vpop.f32.mrb[11].mxu0 }
 0x129   :  { %1301 = vmatmul.mubr.bf16.gmra.mrb[116].mxu1 %v2117_v46 }
 0x12a   :  { %1619 = vst [vmem:[%s2853_s2 + $0x28] sm:$0xff] %v1379_v55  ;;  %1590 = vmatmul.mubr.bf16.gmra.mrb[116].mxu0 %v2118_v50  ;;  %1308 = vmatprep.mubr.bf16.mxu1 %v2119_v51 }
 0x12b   :  { %1597 = vmatprep.mubr.bf16.mxu0 %v2121_v54 }
 0x12c   :  { %v1094_v57 = vpop.f32.mrb[12].mxu1 }
 0x12d   :  { %v1383_v58 = vpop.f32.mrb[12].mxu0  ;;  %v1096_v59 = vpop.f32.mrb[13].mxu1 }
 0x12e   :  { %v1384_v61 = vadd.f32 %v1383_v58, %v1094_v57  ;;  %v1385_v62 = vpop.f32.mrb[13].mxu0  ;;  %v1097_v63 = vpop.f32.mrb[14].mxu1 }
 0x12f   :  { %v1386_v2 = vpop.f32.mrb[14].mxu0  ;;  %v1099_v3 = vpop.f32.mrb[15].mxu1 }
 0x130   :  { %1620 = vst [vmem:[%s2853_s2 + $0x30] sm:$0xff] %v1384_v61  ;;  %v1387_v5 = vadd.f32 %v1386_v2, %v1097_v63  ;;  %v1388_v6 = vpop.f32.mrb[15].mxu0 }
 0x131   :  { %1309 = vmatmul.mubr.bf16.gmra.mrb[120].mxu1 %v2123_v60 }
 0x132   :  { %1621 = vst [vmem:[%s2853_s2 + $0x38] sm:$0xff] %v1387_v5  ;;  %1598 = vmatmul.mubr.bf16.gmra.mrb[120].mxu0 %v2124_v0  ;;  %1316 = vmatprep.mubr.bf16.mxu1 %v2125_v1 }
 0x133   :  { %1605 = vmatprep.mubr.bf16.mxu0 %v2127_v4 }
 0x134   :  { %v1102_v7 = vpop.f32.mrb[16].mxu1 }
 0x135   :  { %v1391_v8 = vpop.f32.mrb[16].mxu0  ;;  %v1104_v9 = vpop.f32.mrb[17].mxu1 }
 0x136   :  { %v1392_v11 = vadd.f32 %v1391_v8, %v1102_v7  ;;  %v1393_v12 = vpop.f32.mrb[17].mxu0  ;;  %v1105_v13 = vpop.f32.mrb[18].mxu1 }
 0x137   :  { %v1394_v15 = vpop.f32.mrb[18].mxu0  ;;  %v1107_v16 = vpop.f32.mrb[19].mxu1 }
 0x138   :  { %1622 = vst [vmem:[%s2853_s2 + $0x40] sm:$0xff] %v1392_v11  ;;  %v1395_v17 = vadd.f32 %v1394_v15, %v1105_v13  ;;  %v1396_v18 = vpop.f32.mrb[19].mxu0 }
 0x139   :  { %1317 = vmatmul.mubr.bf16.gmra.mrb[124].mxu1 %v2129_v10 }
 0x13a   :  { %1623 = vst [vmem:[%s2853_s2 + $0x48] sm:$0xff] %v1395_v17  ;;  %1606 = vmatmul.mubr.bf16.gmra.mrb[124].mxu0 %v2130_v14 }
 0x13c   :  { %v1110_v19 = vpop.f32.mrb[20].mxu1 }
 0x13d   :  { %v1399_v20 = vpop.f32.mrb[20].mxu0  ;;  %v1112_v21 = vpop.f32.mrb[21].mxu1 }
 0x13e   :  { %v1400_v22 = vadd.f32 %v1399_v20, %v1110_v19  ;;  %v1401_v23 = vpop.f32.mrb[21].mxu0  ;;  %v1113_v24 = vpop.f32.mrb[22].mxu1 }
 0x13f   :  { %v1402_v25 = vpop.f32.mrb[22].mxu0  ;;  %v1115_v26 = vpop.f32.mrb[23].mxu1 }
 0x140   :  { %1624 = vst [vmem:[%s2853_s2 + $0x50] sm:$0xff] %v1400_v22  ;;  %v1403_v27 = vadd.f32 %v1402_v25, %v1113_v24  ;;  %v1404_v28 = vpop.f32.mrb[23].mxu0 }
 0x142   :  { %1625 = vst [vmem:[%s2853_s2 + $0x58] sm:$0xff] %v1403_v27 }
 0x144   :  { %v1118_v29 = vpop.f32.mrb[24].mxu1 }
 0x145   :  { %v1407_v30 = vpop.f32.mrb[24].mxu0  ;;  %v1120_v31 = vpop.f32.mrb[25].mxu1 }
 0x146   :  { %v1408_v32 = vadd.f32 %v1407_v30, %v1118_v29  ;;  %v1409_v33 = vpop.f32.mrb[25].mxu0  ;;  %v1121_v34 = vpop.f32.mrb[26].mxu1 }
 0x147   :  { %v1410_v35 = vpop.f32.mrb[26].mxu0  ;;  %v1123_v36 = vpop.f32.mrb[27].mxu1 }
 0x148   :  { %1626 = vst [vmem:[%s2853_s2 + $0x60] sm:$0xff] %v1408_v32  ;;  %v1411_v37 = vadd.f32 %v1410_v35, %v1121_v34  ;;  %v1412_v38 = vpop.f32.mrb[27].mxu0 }
 0x14a   :  { %1627 = vst [vmem:[%s2853_s2 + $0x68] sm:$0xff] %v1411_v37 }
 0x14c   :  { %v1126_v39 = vpop.f32.mrb[28].mxu1 }
 0x14d   :  { %v1415_v40 = vpop.f32.mrb[28].mxu0  ;;  %v1128_v41 = vpop.f32.mrb[29].mxu1 }
 0x14e   :  { %v1416_v42 = vadd.f32 %v1415_v40, %v1126_v39  ;;  %v1417_v43 = vpop.f32.mrb[29].mxu0  ;;  %v1129_v44 = vpop.f32.mrb[30].mxu1 }
 0x14f   :  { %v1418_v45 = vpop.f32.mrb[30].mxu0  ;;  %v1131_v46 = vpop.f32.mrb[31].mxu1 }
 0x150   :  { %1628 = vst [vmem:[%s2853_s2 + $0x70] sm:$0xff] %v1416_v42  ;;  %v1419_v47 = vadd.f32 %v1418_v45, %v1129_v44  ;;  %v1420_v48 = vpop.f32.mrb[31].mxu0 }
 0x152   :  { %1629 = vst [vmem:[%s2853_s2 + $0x78] sm:$0xff] %v1419_v47 }
 0x154   :  { %v1134_v49 = vpop.f32.mrb[32].mxu1 }
 0x155   :  { %v1423_v50 = vpop.f32.mrb[32].mxu0  ;;  %v1136_v51 = vpop.f32.mrb[33].mxu1 }
 0x156   :  { %v1424_v52 = vadd.f32 %v1423_v50, %v1134_v49  ;;  %v1425_v53 = vpop.f32.mrb[33].mxu0  ;;  %v1137_v54 = vpop.f32.mrb[34].mxu1 }
 0x157   :  { %v1426_v55 = vpop.f32.mrb[34].mxu0  ;;  %v1139_v56 = vpop.f32.mrb[35].mxu1 }
 0x158   :  { %1630 = vst [vmem:[%s2853_s2 + $0x80] sm:$0xff] %v1424_v52  ;;  %v1427_v57 = vadd.f32 %v1426_v55, %v1137_v54  ;;  %v1428_v58 = vpop.f32.mrb[35].mxu0 }
 0x15a   :  { %1631 = vst [vmem:[%s2853_s2 + $0x88] sm:$0xff] %v1427_v57 }
 0x15c   :  { %v1142_v59 = vpop.f32.mrb[36].mxu1 }
 0x15d   :  { %v1431_v60 = vpop.f32.mrb[36].mxu0  ;;  %v1144_v61 = vpop.f32.mrb[37].mxu1 }
 0x15e   :  { %v1432_v62 = vadd.f32 %v1431_v60, %v1142_v59  ;;  %v1433_v63 = vpop.f32.mrb[37].mxu0  ;;  %v1145_v0 = vpop.f32.mrb[38].mxu1 }
 0x15f   :  { %v1434_v1 = vpop.f32.mrb[38].mxu0  ;;  %v1147_v2 = vpop.f32.mrb[39].mxu1 }
 0x160   :  { %1632 = vst [vmem:[%s2853_s2 + $0x90] sm:$0xff] %v1432_v62  ;;  %v1435_v3 = vadd.f32 %v1434_v1, %v1145_v0  ;;  %v1436_v4 = vpop.f32.mrb[39].mxu0 }
 0x162   :  { %1633 = vst [vmem:[%s2853_s2 + $0x98] sm:$0xff] %v1435_v3 }
 0x164   :  { %v1150_v5 = vpop.f32.mrb[40].mxu1 }
 0x165   :  { %v1439_v6 = vpop.f32.mrb[40].mxu0  ;;  %v1152_v7 = vpop.f32.mrb[41].mxu1 }
 0x166   :  { %v1440_v8 = vadd.f32 %v1439_v6, %v1150_v5  ;;  %v1441_v9 = vpop.f32.mrb[41].mxu0  ;;  %v1153_v10 = vpop.f32.mrb[42].mxu1 }
 0x167   :  { %v1442_v11 = vpop.f32.mrb[42].mxu0  ;;  %v1155_v12 = vpop.f32.mrb[43].mxu1 }
 0x168   :  { %1634 = vst [vmem:[%s2853_s2 + $0xa0] sm:$0xff] %v1440_v8  ;;  %v1443_v13 = vadd.f32 %v1442_v11, %v1153_v10  ;;  %v1444_v14 = vpop.f32.mrb[43].mxu0 }
 0x16a   :  { %1635 = vst [vmem:[%s2853_s2 + $0xa8] sm:$0xff] %v1443_v13 }
 0x16c   :  { %v1158_v15 = vpop.f32.mrb[44].mxu1 }
 0x16d   :  { %v1447_v16 = vpop.f32.mrb[44].mxu0  ;;  %v1160_v17 = vpop.f32.mrb[45].mxu1 }
 0x16e   :  { %v1448_v18 = vadd.f32 %v1447_v16, %v1158_v15  ;;  %v1449_v19 = vpop.f32.mrb[45].mxu0  ;;  %v1161_v20 = vpop.f32.mrb[46].mxu1 }
 0x16f   :  { %v1450_v21 = vpop.f32.mrb[46].mxu0  ;;  %v1163_v22 = vpop.f32.mrb[47].mxu1 }
 0x170   :  { %1636 = vst [vmem:[%s2853_s2 + $0xb0] sm:$0xff] %v1448_v18  ;;  %v1451_v23 = vadd.f32 %v1450_v21, %v1161_v20  ;;  %v1452_v24 = vpop.f32.mrb[47].mxu0 }
 0x172   :  { %1637 = vst [vmem:[%s2853_s2 + $0xb8] sm:$0xff] %v1451_v23 }
 0x174   :  { %v1166_v25 = vpop.f32.mrb[48].mxu1 }
 0x175   :  { %v1455_v26 = vpop.f32.mrb[48].mxu0  ;;  %v1168_v27 = vpop.f32.mrb[49].mxu1 }
 0x176   :  { %v1456_v28 = vadd.f32 %v1455_v26, %v1166_v25  ;;  %v1457_v29 = vpop.f32.mrb[49].mxu0  ;;  %v1169_v30 = vpop.f32.mrb[50].mxu1 }
 0x177   :  { %v1458_v31 = vpop.f32.mrb[50].mxu0  ;;  %v1171_v32 = vpop.f32.mrb[51].mxu1 }
 0x178   :  { %1638 = vst [vmem:[%s2853_s2 + $0xc0] sm:$0xff] %v1456_v28  ;;  %v1459_v33 = vadd.f32 %v1458_v31, %v1169_v30  ;;  %v1460_v34 = vpop.f32.mrb[51].mxu0 }
 0x17a   :  { %1639 = vst [vmem:[%s2853_s2 + $0xc8] sm:$0xff] %v1459_v33 }
 0x17c   :  { %v1174_v35 = vpop.f32.mrb[52].mxu1 }
 0x17d   :  { %v1463_v36 = vpop.f32.mrb[52].mxu0  ;;  %v1176_v37 = vpop.f32.mrb[53].mxu1 }
 0x17e   :  { %v1464_v38 = vadd.f32 %v1463_v36, %v1174_v35  ;;  %v1465_v39 = vpop.f32.mrb[53].mxu0  ;;  %v1177_v40 = vpop.f32.mrb[54].mxu1 }
 0x17f   :  { %v1466_v41 = vpop.f32.mrb[54].mxu0  ;;  %v1179_v42 = vpop.f32.mrb[55].mxu1 }
 0x180   :  { %1640 = vst [vmem:[%s2853_s2 + $0xd0] sm:$0xff] %v1464_v38  ;;  %v1467_v43 = vadd.f32 %v1466_v41, %v1177_v40  ;;  %v1468_v44 = vpop.f32.mrb[55].mxu0 }
 0x182   :  { %1641 = vst [vmem:[%s2853_s2 + $0xd8] sm:$0xff] %v1467_v43 }
 0x184   :  { %v1182_v45 = vpop.f32.mrb[56].mxu1 }
 0x185   :  { %v1471_v46 = vpop.f32.mrb[56].mxu0  ;;  %v1184_v47 = vpop.f32.mrb[57].mxu1 }
 0x186   :  { %v1472_v48 = vadd.f32 %v1471_v46, %v1182_v45  ;;  %v1473_v49 = vpop.f32.mrb[57].mxu0  ;;  %v1185_v50 = vpop.f32.mrb[58].mxu1 }
 0x187   :  { %v1474_v51 = vpop.f32.mrb[58].mxu0  ;;  %v1187_v52 = vpop.f32.mrb[59].mxu1 }
 0x188   :  { %1642 = vst [vmem:[%s2853_s2 + $0xe0] sm:$0xff] %v1472_v48  ;;  %v1475_v53 = vadd.f32 %v1474_v51, %v1185_v50  ;;  %v1476_v54 = vpop.f32.mrb[59].mxu0 }
 0x18a   :  { %1643 = vst [vmem:[%s2853_s2 + $0xe8] sm:$0xff] %v1475_v53 }
 0x18c   :  { %v1190_v55 = vpop.f32.mrb[60].mxu1 }
 0x18d   :  { %v1479_v56 = vpop.f32.mrb[60].mxu0  ;;  %v1192_v57 = vpop.f32.mrb[61].mxu1 }
 0x18e   :  { %v1480_v58 = vadd.f32 %v1479_v56, %v1190_v55  ;;  %v1481_v59 = vpop.f32.mrb[61].mxu0  ;;  %v1193_v60 = vpop.f32.mrb[62].mxu1 }
 0x18f   :  { %v1482_v61 = vpop.f32.mrb[62].mxu0  ;;  %v1195_v62 = vpop.f32.mrb[63].mxu1 }
 0x190   :  { %1644 = vst [vmem:[%s2853_s2 + $0xf0] sm:$0xff] %v1480_v58  ;;  %v1483_v63 = vadd.f32 %v1482_v61, %v1193_v60  ;;  %v1484_v0 = vpop.f32.mrb[63].mxu0 }
 0x192   :  { %1645 = vst [vmem:[%s2853_s2 + $0xf8] sm:$0xff] %v1483_v63 }
 0x194   :  { %v1198_v1 = vpop.f32.mrb[64].mxu1 }
 0x195   :  { %v1487_v2 = vpop.f32.mrb[64].mxu0  ;;  %v1200_v3 = vpop.f32.mrb[65].mxu1 }
 0x196   :  { %v1488_v4 = vadd.f32 %v1487_v2, %v1198_v1  ;;  %v1489_v5 = vpop.f32.mrb[65].mxu0  ;;  %v1201_v6 = vpop.f32.mrb[66].mxu1 }
 0x197   :  { %v1490_v7 = vpop.f32.mrb[66].mxu0  ;;  %v1203_v8 = vpop.f32.mrb[67].mxu1 }
 0x198   :  { %1646 = vst [vmem:[%s2853_s2 + $0x100] sm:$0xff] %v1488_v4  ;;  %v1491_v9 = vadd.f32 %v1490_v7, %v1201_v6  ;;  %v1492_v10 = vpop.f32.mrb[67].mxu0 }
 0x19a   :  { %1647 = vst [vmem:[%s2853_s2 + $0x108] sm:$0xff] %v1491_v9 }
 0x19c   :  { %v1206_v11 = vpop.f32.mrb[68].mxu1 }
 0x19d   :  { %v1495_v12 = vpop.f32.mrb[68].mxu0  ;;  %v1208_v13 = vpop.f32.mrb[69].mxu1 }
 0x19e   :  { %v1496_v14 = vadd.f32 %v1495_v12, %v1206_v11  ;;  %v1497_v15 = vpop.f32.mrb[69].mxu0  ;;  %v1209_v16 = vpop.f32.mrb[70].mxu1 }
 0x19f   :  { %v1498_v17 = vpop.f32.mrb[70].mxu0  ;;  %v1211_v18 = vpop.f32.mrb[71].mxu1 }
 0x1a0   :  { %1648 = vst [vmem:[%s2853_s2 + $0x110] sm:$0xff] %v1496_v14  ;;  %v1499_v19 = vadd.f32 %v1498_v17, %v1209_v16  ;;  %v1500_v20 = vpop.f32.mrb[71].mxu0 }
 0x1a2   :  { %1649 = vst [vmem:[%s2853_s2 + $0x118] sm:$0xff] %v1499_v19 }
 0x1a4   :  { %v1214_v21 = vpop.f32.mrb[72].mxu1 }
 0x1a5   :  { %v1503_v22 = vpop.f32.mrb[72].mxu0  ;;  %v1216_v23 = vpop.f32.mrb[73].mxu1 }
 0x1a6   :  { %v1504_v24 = vadd.f32 %v1503_v22, %v1214_v21  ;;  %v1505_v25 = vpop.f32.mrb[73].mxu0  ;;  %v1217_v26 = vpop.f32.mrb[74].mxu1 }
 0x1a7   :  { %v1506_v27 = vpop.f32.mrb[74].mxu0  ;;  %v1219_v28 = vpop.f32.mrb[75].mxu1 }
 0x1a8   :  { %1650 = vst [vmem:[%s2853_s2 + $0x120] sm:$0xff] %v1504_v24  ;;  %v1507_v29 = vadd.f32 %v1506_v27, %v1217_v26  ;;  %v1508_v30 = vpop.f32.mrb[75].mxu0 }
 0x1aa   :  { %1651 = vst [vmem:[%s2853_s2 + $0x128] sm:$0xff] %v1507_v29 }
 0x1ac   :  { %v1222_v31 = vpop.f32.mrb[76].mxu1 }
 0x1ad   :  { %v1511_v32 = vpop.f32.mrb[76].mxu0  ;;  %v1224_v33 = vpop.f32.mrb[77].mxu1 }
 0x1ae   :  { %v1512_v34 = vadd.f32 %v1511_v32, %v1222_v31  ;;  %v1513_v35 = vpop.f32.mrb[77].mxu0  ;;  %v1225_v36 = vpop.f32.mrb[78].mxu1 }
 0x1af   :  { %v1514_v37 = vpop.f32.mrb[78].mxu0  ;;  %v1227_v38 = vpop.f32.mrb[79].mxu1 }
 0x1b0   :  { %1652 = vst [vmem:[%s2853_s2 + $0x130] sm:$0xff] %v1512_v34  ;;  %v1515_v39 = vadd.f32 %v1514_v37, %v1225_v36  ;;  %v1516_v40 = vpop.f32.mrb[79].mxu0 }
 0x1b2   :  { %1653 = vst [vmem:[%s2853_s2 + $0x138] sm:$0xff] %v1515_v39 }
 0x1b4   :  { %v1230_v41 = vpop.f32.mrb[80].mxu1 }
 0x1b5   :  { %v1519_v42 = vpop.f32.mrb[80].mxu0  ;;  %v1232_v43 = vpop.f32.mrb[81].mxu1 }
 0x1b6   :  { %v1520_v44 = vadd.f32 %v1519_v42, %v1230_v41  ;;  %v1521_v45 = vpop.f32.mrb[81].mxu0  ;;  %v1233_v46 = vpop.f32.mrb[82].mxu1 }
 0x1b7   :  { %v1522_v47 = vpop.f32.mrb[82].mxu0  ;;  %v1235_v48 = vpop.f32.mrb[83].mxu1 }
 0x1b8   :  { %1654 = vst [vmem:[%s2853_s2 + $0x140] sm:$0xff] %v1520_v44  ;;  %v1523_v49 = vadd.f32 %v1522_v47, %v1233_v46  ;;  %v1524_v50 = vpop.f32.mrb[83].mxu0 }
 0x1ba   :  { %1655 = vst [vmem:[%s2853_s2 + $0x148] sm:$0xff] %v1523_v49 }
 0x1bc   :  { %v1238_v51 = vpop.f32.mrb[84].mxu1 }
 0x1bd   :  { %v1527_v52 = vpop.f32.mrb[84].mxu0  ;;  %v1240_v53 = vpop.f32.mrb[85].mxu1 }
 0x1be   :  { %v1528_v54 = vadd.f32 %v1527_v52, %v1238_v51  ;;  %v1529_v55 = vpop.f32.mrb[85].mxu0  ;;  %v1241_v56 = vpop.f32.mrb[86].mxu1 }
 0x1bf   :  { %v1530_v57 = vpop.f32.mrb[86].mxu0  ;;  %v1243_v58 = vpop.f32.mrb[87].mxu1 }
 0x1c0   :  { %1656 = vst [vmem:[%s2853_s2 + $0x150] sm:$0xff] %v1528_v54  ;;  %v1531_v59 = vadd.f32 %v1530_v57, %v1241_v56  ;;  %v1532_v60 = vpop.f32.mrb[87].mxu0 }
 0x1c2   :  { %1657 = vst [vmem:[%s2853_s2 + $0x158] sm:$0xff] %v1531_v59 }
 0x1c4   :  { %v1246_v61 = vpop.f32.mrb[88].mxu1 }
 0x1c5   :  { %v1535_v62 = vpop.f32.mrb[88].mxu0  ;;  %v1248_v63 = vpop.f32.mrb[89].mxu1 }
 0x1c6   :  { %v1536_v0 = vadd.f32 %v1535_v62, %v1246_v61  ;;  %v1537_v1 = vpop.f32.mrb[89].mxu0  ;;  %v1249_v2 = vpop.f32.mrb[90].mxu1 }
 0x1c7   :  { %v1538_v3 = vpop.f32.mrb[90].mxu0  ;;  %v1251_v4 = vpop.f32.mrb[91].mxu1 }
 0x1c8   :  { %1658 = vst [vmem:[%s2853_s2 + $0x160] sm:$0xff] %v1536_v0  ;;  %v1539_v5 = vadd.f32 %v1538_v3, %v1249_v2  ;;  %v1540_v6 = vpop.f32.mrb[91].mxu0 }
 0x1ca   :  { %1659 = vst [vmem:[%s2853_s2 + $0x168] sm:$0xff] %v1539_v5 }
 0x1cc   :  { %v1254_v7 = vpop.f32.mrb[92].mxu1 }
 0x1cd   :  { %v1543_v8 = vpop.f32.mrb[92].mxu0  ;;  %v1256_v9 = vpop.f32.mrb[93].mxu1 }
 0x1ce   :  { %v1544_v10 = vadd.f32 %v1543_v8, %v1254_v7  ;;  %v1545_v11 = vpop.f32.mrb[93].mxu0  ;;  %v1257_v12 = vpop.f32.mrb[94].mxu1 }
 0x1cf   :  { %v1546_v13 = vpop.f32.mrb[94].mxu0  ;;  %v1259_v14 = vpop.f32.mrb[95].mxu1 }
 0x1d0   :  { %1660 = vst [vmem:[%s2853_s2 + $0x170] sm:$0xff] %v1544_v10  ;;  %v1547_v15 = vadd.f32 %v1546_v13, %v1257_v12  ;;  %v1548_v16 = vpop.f32.mrb[95].mxu0 }
 0x1d2   :  { %1661 = vst [vmem:[%s2853_s2 + $0x178] sm:$0xff] %v1547_v15 }
 0x1d4   :  { %v1262_v17 = vpop.f32.mrb[96].mxu1 }
 0x1d5   :  { %v1551_v18 = vpop.f32.mrb[96].mxu0  ;;  %v1264_v19 = vpop.f32.mrb[97].mxu1 }
 0x1d6   :  { %v1552_v20 = vadd.f32 %v1551_v18, %v1262_v17  ;;  %v1553_v21 = vpop.f32.mrb[97].mxu0  ;;  %v1265_v22 = vpop.f32.mrb[98].mxu1 }
 0x1d7   :  { %v1554_v23 = vpop.f32.mrb[98].mxu0  ;;  %v1267_v24 = vpop.f32.mrb[99].mxu1 }
 0x1d8   :  { %1662 = vst [vmem:[%s2853_s2 + $0x180] sm:$0xff] %v1552_v20  ;;  %v1555_v25 = vadd.f32 %v1554_v23, %v1265_v22  ;;  %v1556_v26 = vpop.f32.mrb[99].mxu0 }
 0x1da   :  { %1663 = vst [vmem:[%s2853_s2 + $0x188] sm:$0xff] %v1555_v25 }
 0x1dc   :  { %v1270_v27 = vpop.f32.mrb[100].mxu1 }
 0x1dd   :  { %v1559_v28 = vpop.f32.mrb[100].mxu0  ;;  %v1272_v29 = vpop.f32.mrb[101].mxu1 }
 0x1de   :  { %v1560_v30 = vadd.f32 %v1559_v28, %v1270_v27  ;;  %v1561_v31 = vpop.f32.mrb[101].mxu0  ;;  %v1273_v32 = vpop.f32.mrb[102].mxu1 }
 0x1df   :  { %v1562_v33 = vpop.f32.mrb[102].mxu0  ;;  %v1275_v34 = vpop.f32.mrb[103].mxu1 }
 0x1e0   :  { %1664 = vst [vmem:[%s2853_s2 + $0x190] sm:$0xff] %v1560_v30  ;;  %v1563_v35 = vadd.f32 %v1562_v33, %v1273_v32  ;;  %v1564_v36 = vpop.f32.mrb[103].mxu0 }
 0x1e2   :  { %1665 = vst [vmem:[%s2853_s2 + $0x198] sm:$0xff] %v1563_v35 }
 0x1e4   :  { %v1278_v37 = vpop.f32.mrb[104].mxu1 }
 0x1e5   :  { %v1567_v38 = vpop.f32.mrb[104].mxu0  ;;  %v1280_v39 = vpop.f32.mrb[105].mxu1 }
 0x1e6   :  { %v1568_v40 = vadd.f32 %v1567_v38, %v1278_v37  ;;  %v1569_v41 = vpop.f32.mrb[105].mxu0  ;;  %v1281_v42 = vpop.f32.mrb[106].mxu1 }
 0x1e7   :  { %v1570_v43 = vpop.f32.mrb[106].mxu0  ;;  %v1283_v44 = vpop.f32.mrb[107].mxu1 }
 0x1e8   :  { %1666 = vst [vmem:[%s2853_s2 + $0x1a0] sm:$0xff] %v1568_v40  ;;  %v1571_v45 = vadd.f32 %v1570_v43, %v1281_v42  ;;  %v1572_v46 = vpop.f32.mrb[107].mxu0 }
 0x1ea   :  { %1667 = vst [vmem:[%s2853_s2 + $0x1a8] sm:$0xff] %v1571_v45 }
 0x1ec   :  { %v1286_v47 = vpop.f32.mrb[108].mxu1 }
 0x1ed   :  { %v1575_v48 = vpop.f32.mrb[108].mxu0  ;;  %v1288_v49 = vpop.f32.mrb[109].mxu1 }
 0x1ee   :  { %v1576_v50 = vadd.f32 %v1575_v48, %v1286_v47  ;;  %v1577_v51 = vpop.f32.mrb[109].mxu0  ;;  %v1289_v52 = vpop.f32.mrb[110].mxu1 }
 0x1ef   :  { %v1578_v53 = vpop.f32.mrb[110].mxu0  ;;  %v1291_v54 = vpop.f32.mrb[111].mxu1 }
 0x1f0   :  { %1668 = vst [vmem:[%s2853_s2 + $0x1b0] sm:$0xff] %v1576_v50  ;;  %v1579_v55 = vadd.f32 %v1578_v53, %v1289_v52  ;;  %v1580_v56 = vpop.f32.mrb[111].mxu0 }
 0x1f2   :  { %1669 = vst [vmem:[%s2853_s2 + $0x1b8] sm:$0xff] %v1579_v55 }
 0x1f4   :  { %v1294_v57 = vpop.f32.mrb[112].mxu1 }
 0x1f5   :  { %v1583_v58 = vpop.f32.mrb[112].mxu0  ;;  %v1296_v59 = vpop.f32.mrb[113].mxu1 }
 0x1f6   :  { %v1584_v60 = vadd.f32 %v1583_v58, %v1294_v57  ;;  %v1585_v61 = vpop.f32.mrb[113].mxu0  ;;  %v1297_v62 = vpop.f32.mrb[114].mxu1 }
 0x1f7   :  { %v1586_v63 = vpop.f32.mrb[114].mxu0  ;;  %v1299_v0 = vpop.f32.mrb[115].mxu1 }
 0x1f8   :  { %1670 = vst [vmem:[%s2853_s2 + $0x1c0] sm:$0xff] %v1584_v60  ;;  %v1587_v1 = vadd.f32 %v1586_v63, %v1297_v62  ;;  %v1588_v2 = vpop.f32.mrb[115].mxu0 }
 0x1fa   :  { %1671 = vst [vmem:[%s2853_s2 + $0x1c8] sm:$0xff] %v1587_v1 }
 0x1fc   :  { %v1302_v3 = vpop.f32.mrb[116].mxu1 }
 0x1fd   :  { %v1591_v4 = vpop.f32.mrb[116].mxu0  ;;  %v1304_v5 = vpop.f32.mrb[117].mxu1 }
 0x1fe   :  { %v1592_v6 = vadd.f32 %v1591_v4, %v1302_v3  ;;  %v1593_v7 = vpop.f32.mrb[117].mxu0  ;;  %v1305_v8 = vpop.f32.mrb[118].mxu1 }
 0x1ff   :  { %v1594_v9 = vpop.f32.mrb[118].mxu0  ;;  %v1307_v10 = vpop.f32.mrb[119].mxu1 }
 0x200   :  { %1672 = vst [vmem:[%s2853_s2 + $0x1d0] sm:$0xff] %v1592_v6  ;;  %v1595_v11 = vadd.f32 %v1594_v9, %v1305_v8  ;;  %v1596_v12 = vpop.f32.mrb[119].mxu0 }
 0x202   :  { %1673 = vst [vmem:[%s2853_s2 + $0x1d8] sm:$0xff] %v1595_v11 }
 0x204   :  { %v1310_v13 = vpop.f32.mrb[120].mxu1 }
 0x205   :  { %v1599_v14 = vpop.f32.mrb[120].mxu0  ;;  %v1312_v15 = vpop.f32.mrb[121].mxu1 }
 0x206   :  { %v1600_v16 = vadd.f32 %v1599_v14, %v1310_v13  ;;  %v1601_v17 = vpop.f32.mrb[121].mxu0  ;;  %v1313_v18 = vpop.f32.mrb[122].mxu1 }
 0x207   :  { %v1602_v19 = vpop.f32.mrb[122].mxu0  ;;  %v1315_v20 = vpop.f32.mrb[123].mxu1 }
 0x208   :  { %1674 = vst [vmem:[%s2853_s2 + $0x1e0] sm:$0xff] %v1600_v16  ;;  %v1603_v21 = vadd.f32 %v1602_v19, %v1313_v18  ;;  %v1604_v22 = vpop.f32.mrb[123].mxu0 }
 0x20a   :  { %1675 = vst [vmem:[%s2853_s2 + $0x1e8] sm:$0xff] %v1603_v21 }
 0x20c   :  { %v1318_v23 = vpop.f32.mrb[124].mxu1 }
 0x20d   :  { %v1607_v24 = vpop.f32.mrb[124].mxu0  ;;  %v1320_v25 = vpop.f32.mrb[125].mxu1 }
 0x20e   :  { %v1608_v26 = vadd.f32 %v1607_v24, %v1318_v23  ;;  %v1609_v27 = vpop.f32.mrb[125].mxu0  ;;  %v1321_v28 = vpop.f32.mrb[126].mxu1 }
 0x20f   :  { %v1610_v29 = vpop.f32.mrb[126].mxu0  ;;  %v1323_v30 = vpop.f32.mrb[127].mxu1 }
 0x210   :  { %1676 = vst [vmem:[%s2853_s2 + $0x1f0] sm:$0xff] %v1608_v26  ;;  %v1611_v31 = vadd.f32 %v1610_v29, %v1321_v28  ;;  %v1612_v32 = vpop.f32.mrb[127].mxu0 }
 0x212   :  { %1677 = vst [vmem:[%s2853_s2 + $0x1f8] sm:$0xff] %v1611_v31 }

// kernel: albedo_resnet_generator.39
= control target key start
LH: loop header
LB: loop body
LE: loop exit
PB: predicated region body
PF: predicated region fallthrough
CT: control target
= control target key end

     0   :  { %s1158_s0 = inlined_call_operand.vmem [shape: f32[512,128], index: 0, kind: input, shape index: {}]   ;;  %s1159_s1 = inlined_call_operand.vmem [shape: f32[1,128], index: 1, kind: input, shape index: {}]   ;;  %s1160_s2 = inlined_call_operand.vmem [shape: f32[1,128], index: 2, kind: input, shape index: {}]   ;;  %s1161_s3 = inlined_call_operand.vmem [shape: f32[512,128], index: 3, kind: output, shape index: {}]  }
   0x1   :  { %v14_v0 = vld [vmem:[%s1158_s0] sm:$0xff]  ;;  %v15_v4 = vld [vmem:[%s1158_s0 + $0x8] sm:$0xff]  ;;  %v16_v5 = vld [vmem:[%s1158_s0 + $0x10] sm:$0xff] }
   0x2   :  { %v636_v1 = vld [vmem:[%s1159_s1] ss:$0 sm:$0xff]  ;;  %v17_v6 = vld [vmem:[%s1158_s0 + $0x18] sm:$0xff]  ;;  %v19_v11 = vld [vmem:[%s1158_s0 + $0x28] sm:$0xff] }
   0x3   :  { %v641_v2 = vld [vmem:[%s1160_s2] ss:$0 sm:$0xff]  ;;  %v85_v3 = vmul.f32 %v636_v1, %v14_v0  ;;  %v86_v7 = vmul.f32 %v636_v1, %v15_v4  ;;  %v87_v8 = vmul.f32 %v636_v1, %v16_v5  ;;  %v88_v9 = vmul.f32 %v636_v1, %v17_v6  ;;  %v20_v12 = vld [vmem:[%s1158_s0 + $0x30] sm:$0xff]  ;;  %v21_v17 = vld [vmem:[%s1158_s0 + $0x38] sm:$0xff] }
   0x4   :  { %v18_v10 = vld [vmem:[%s1158_s0 + $0x20] sm:$0xff]  ;;  %v90_v15 = vmul.f32 %v636_v1, %v19_v11  ;;  %v91_v16 = vmul.f32 %v636_v1, %v20_v12  ;;  %v23_v19 = vld [vmem:[%s1158_s0 + $0x48] sm:$0xff]  ;;  %v92_v23 = vmul.f32 %v636_v1, %v21_v17  ;;  %v24_v24 = vld [vmem:[%s1158_s0 + $0x50] sm:$0xff] }
   0x5   :  { %v156_v13 = vadd.f32 %v641_v2, %v85_v3  ;;  %v89_v14 = vmul.f32 %v636_v1, %v18_v10  ;;  %v22_v18 = vld [vmem:[%s1158_s0 + $0x40] sm:$0xff]  ;;  %v157_v20 = vadd.f32 %v641_v2, %v86_v7  ;;  %v158_v21 = vadd.f32 %v641_v2, %v87_v8  ;;  %v25_v25 = vld [vmem:[%s1158_s0 + $0x58] sm:$0xff]  ;;  %v27_v30 = vld [vmem:[%s1158_s0 + $0x68] sm:$0xff] }
   0x6   :  { %v159_v22 = vadd.f32 %v641_v2, %v88_v9  ;;  %v26_v26 = vld [vmem:[%s1158_s0 + $0x60] sm:$0xff]  ;;  %v161_v28 = vadd.f32 %v641_v2, %v90_v15  ;;  %v162_v29 = vadd.f32 %v641_v2, %v91_v16  ;;  %v163_v31 = vadd.f32 %v641_v2, %v92_v23  ;;  %v28_v37 = vld [vmem:[%s1158_s0 + $0x70] sm:$0xff]  ;;  %v29_v38 = vld [vmem:[%s1158_s0 + $0x78] sm:$0xff] }
   0x7   :  { %482 = vtanh.f32 %v156_v13  ;;  %v160_v27 = vadd.f32 %v641_v2, %v89_v14  ;;  %v93_v32 = vmul.f32 %v636_v1, %v22_v18  ;;  %v94_v33 = vmul.f32 %v636_v1, %v23_v19  ;;  %v30_v42 = vld [vmem:[%s1158_s0 + $0x80] sm:$0xff]  ;;  %v31_v43 = vld [vmem:[%s1158_s0 + $0x88] sm:$0xff]  ;;  %v32_v44 = vld [vmem:[%s1158_s0 + $0x90] sm:$0xff] }
   0x8   :  { %484 = vtanh.f32 %v157_v20  ;;  %v95_v34 = vmul.f32 %v636_v1, %v24_v24  ;;  %v96_v35 = vmul.f32 %v636_v1, %v25_v25  ;;  %v97_v36 = vmul.f32 %v636_v1, %v26_v26  ;;  %v33_v48 = vld [vmem:[%s1158_s0 + $0x98] sm:$0xff]  ;;  %v34_v55 = vld [vmem:[%s1158_s0 + $0xa0] sm:$0xff]  ;;  %v35_v56 = vld [vmem:[%s1158_s0 + $0xa8] sm:$0xff] }
   0x9   :  { %486 = vtanh.f32 %v158_v21  ;;  %v164_v39 = vadd.f32 %v641_v2, %v93_v32  ;;  %v165_v40 = vadd.f32 %v641_v2, %v94_v33  ;;  %v98_v41 = vmul.f32 %v636_v1, %v27_v30  ;;  %v36_v60 = vld [vmem:[%s1158_s0 + $0xb0] sm:$0xff]  ;;  %v37_v61 = vld [vmem:[%s1158_s0 + $0xb8] sm:$0xff]  ;;  %v38_v62 = vld [vmem:[%s1158_s0 + $0xc0] sm:$0xff] }
   0xa   :  { %488 = vtanh.f32 %v159_v22  ;;  %v166_v45 = vadd.f32 %v641_v2, %v95_v34  ;;  %v167_v46 = vadd.f32 %v641_v2, %v96_v35  ;;  %v168_v47 = vadd.f32 %v641_v2, %v97_v36  ;;  %v39_v15 = vld [vmem:[%s1158_s0 + $0xc8] sm:$0xff]  ;;  %v40_v20 = vld [vmem:[%s1158_s0 + $0xd0] sm:$0xff]  ;;  %v41_v33 = vld [vmem:[%s1158_s0 + $0xd8] sm:$0xff] }
   0xb   :  { %490 = vtanh.f32 %v160_v27  ;;  %v169_v49 = vadd.f32 %v641_v2, %v98_v41  ;;  %v99_v50 = vmul.f32 %v636_v1, %v28_v37  ;;  %v100_v51 = vmul.f32 %v636_v1, %v29_v38  ;;  %v42_v38 = vld [vmem:[%s1158_s0 + $0xe0] sm:$0xff] }
   0xc   :  { %492 = vtanh.f32 %v161_v28  ;;  %v101_v52 = vmul.f32 %v636_v1, %v30_v42  ;;  %v102_v53 = vmul.f32 %v636_v1, %v31_v43  ;;  %v103_v54 = vmul.f32 %v636_v1, %v32_v44 }
   0xd   :  { %494 = vtanh.f32 %v162_v29  ;;  %v170_v57 = vadd.f32 %v641_v2, %v99_v50  ;;  %v171_v58 = vadd.f32 %v641_v2, %v100_v51  ;;  %v104_v59 = vmul.f32 %v636_v1, %v33_v48  ;;  %v43_v51 = vld [vmem:[%s1158_s0 + $0xe8] sm:$0xff] }
   0xe   :  { %496 = vtanh.f32 %v163_v31  ;;  %v172_v63 = vadd.f32 %v641_v2, %v101_v52  ;;  %v173_v0 = vadd.f32 %v641_v2, %v102_v53  ;;  %v174_v3 = vadd.f32 %v641_v2, %v103_v54 }
   0xf   :  { %498 = vtanh.f32 %v164_v39  ;;  %v175_v4 = vadd.f32 %v641_v2, %v104_v59  ;;  %v105_v5 = vmul.f32 %v636_v1, %v34_v55  ;;  %v106_v6 = vmul.f32 %v636_v1, %v35_v56  ;;  %v44_v56 = vld [vmem:[%s1158_s0 + $0xf0] sm:$0xff] }
  0x10   :  { %500 = vtanh.f32 %v165_v40  ;;  %v107_v8 = vmul.f32 %v636_v1, %v36_v60  ;;  %v108_v9 = vmul.f32 %v636_v1, %v37_v61  ;;  %v109_v10 = vmul.f32 %v636_v1, %v38_v62 }
  0x11   :  { %v483_v7 = vpop.eup %482  ;;  %502 = vtanh.f32 %v166_v45  ;;  %v176_v13 = vadd.f32 %v641_v2, %v105_v5  ;;  %v177_v14 = vadd.f32 %v641_v2, %v106_v6  ;;  %v110_v28 = vmul.f32 %v636_v1, %v39_v15 }
  0x12   :  { %v485_v11 = vpop.eup %484  ;;  %v284_v12 = vmul.f32 0.5, %v483_v7  ;;  %504 = vtanh.f32 %v167_v46  ;;  %v178_v18 = vadd.f32 %v641_v2, %v107_v8  ;;  %v767_v19 = vadd.f32 %v641_v2, %v108_v9  ;;  %v45_v7 = vld [vmem:[%s1158_s0 + $0xf8] sm:$0xff] }
  0x13   :  { %v487_v16 = vpop.eup %486  ;;  %v285_v17 = vmul.f32 0.5, %v485_v11  ;;  %506 = vtanh.f32 %v168_v47  ;;  %v773_v24 = vadd.f32 %v641_v2, %v109_v10  ;;  %v111_v32 = vmul.f32 %v636_v1, %v40_v20 }
  0x14   :  { %v489_v21 = vpop.eup %488  ;;  %v348_v22 = vadd.f32 0.5, %v284_v12  ;;  %v286_v23 = vmul.f32 0.5, %v487_v16  ;;  %508 = vtanh.f32 %v169_v49  ;;  %v181_v37 = vadd.f32 %v641_v2, %v110_v28  ;;  %v46_v12 = vld [vmem:[%s1158_s0 + $0x100] sm:$0xff] }
  0x15   :  { %v491_v25 = vpop.eup %490  ;;  %v349_v26 = vadd.f32 0.5, %v285_v17  ;;  %v287_v27 = vmul.f32 0.5, %v489_v21  ;;  %510 = vtanh.f32 %v170_v57  ;;  %v182_v42 = vadd.f32 %v641_v2, %v111_v32 }
  0x16   :  { %v493_v29 = vpop.eup %492  ;;  %412 = vst [vmem:[%s1161_s3] sm:$0xff] %v348_v22  ;;  %v350_v30 = vadd.f32 0.5, %v286_v23  ;;  %v288_v31 = vmul.f32 0.5, %v491_v25  ;;  %512 = vtanh.f32 %v171_v58  ;;  %v112_v46 = vmul.f32 %v636_v1, %v41_v33  ;;  %v47_v25 = vld [vmem:[%s1158_s0 + $0x108] sm:$0xff] }
  0x17   :  { %v495_v34 = vpop.eup %494  ;;  %413 = vst [vmem:[%s1161_s3 + $0x8] sm:$0xff] %v349_v26  ;;  %v351_v35 = vadd.f32 0.5, %v287_v27  ;;  %v289_v36 = vmul.f32 0.5, %v493_v29  ;;  %514 = vtanh.f32 %v172_v63  ;;  %v113_v50 = vmul.f32 %v636_v1, %v42_v38 }
  0x18   :  { %v497_v39 = vpop.eup %496  ;;  %414 = vst [vmem:[%s1161_s3 + $0x10] sm:$0xff] %v350_v30  ;;  %v352_v40 = vadd.f32 0.5, %v288_v31  ;;  %v290_v41 = vmul.f32 0.5, %v495_v34  ;;  %516 = vtanh.f32 %v173_v0  ;;  %v183_v55 = vadd.f32 %v641_v2, %v112_v46  ;;  %v48_v30 = vld [vmem:[%s1158_s0 + $0x110] sm:$0xff] }
  0x19   :  { %v499_v43 = vpop.eup %498  ;;  %415 = vst [vmem:[%s1161_s3 + $0x18] sm:$0xff] %v351_v35  ;;  %v353_v44 = vadd.f32 0.5, %v289_v36  ;;  %v291_v45 = vmul.f32 0.5, %v497_v39  ;;  %518 = vtanh.f32 %v174_v3  ;;  %v184_v60 = vadd.f32 %v641_v2, %v113_v50  ;;  %v49_v39 = vld [vmem:[%s1158_s0 + $0x118] sm:$0xff] }
  0x1a   :  { %v501_v47 = vpop.eup %500  ;;  %416 = vst [vmem:[%s1161_s3 + $0x20] sm:$0xff] %v352_v40  ;;  %v354_v48 = vadd.f32 0.5, %v290_v41  ;;  %v292_v49 = vmul.f32 0.5, %v499_v43  ;;  %520 = vtanh.f32 %v175_v4  ;;  %v114_v0 = vmul.f32 %v636_v1, %v43_v51 }
  0x1b   :  { %v503_v52 = vpop.eup %502  ;;  %417 = vst [vmem:[%s1161_s3 + $0x28] sm:$0xff] %v353_v44  ;;  %v355_v53 = vadd.f32 0.5, %v291_v45  ;;  %v293_v54 = vmul.f32 0.5, %v501_v47  ;;  %522 = vtanh.f32 %v176_v13  ;;  %v115_v6 = vmul.f32 %v636_v1, %v44_v56  ;;  %v50_v44 = vld [vmem:[%s1158_s0 + $0x120] sm:$0xff] }
  0x1c   :  { %v505_v57 = vpop.eup %504  ;;  %418 = vst [vmem:[%s1161_s3 + $0x30] sm:$0xff] %v354_v48  ;;  %v356_v58 = vadd.f32 0.5, %v292_v49  ;;  %v294_v59 = vmul.f32 0.5, %v503_v52  ;;  %524 = vtanh.f32 %v177_v14  ;;  %v185_v11 = vadd.f32 %v641_v2, %v114_v0 }
  0x1d   :  { %v507_v61 = vpop.eup %506  ;;  %419 = vst [vmem:[%s1161_s3 + $0x38] sm:$0xff] %v355_v53  ;;  %v357_v62 = vadd.f32 0.5, %v293_v54  ;;  %v295_v63 = vmul.f32 0.5, %v505_v57  ;;  %526 = vtanh.f32 %v178_v18  ;;  %v186_v16 = vadd.f32 %v641_v2, %v115_v6  ;;  %v51_v54 = vld [vmem:[%s1158_s0 + $0x128] sm:$0xff] }
  0x1e   :  { %v509_v3 = vpop.eup %508  ;;  %420 = vst [vmem:[%s1161_s3 + $0x40] sm:$0xff] %v356_v58  ;;  %v358_v4 = vadd.f32 0.5, %v294_v59  ;;  %v296_v5 = vmul.f32 0.5, %v507_v61  ;;  %528 = vtanh.f32 %v767_v19  ;;  %v116_v20 = vmul.f32 %v636_v1, %v45_v7  ;;  %v52_v59 = vld [vmem:[%s1158_s0 + $0x130] sm:$0xff]  ;;  %v53_v7 = vld [vmem:[%s1158_s0 + $0x138] sm:$0xff] }
  0x1f   :  { %v511_v8 = vpop.eup %510  ;;  %421 = vst [vmem:[%s1161_s3 + $0x48] sm:$0xff] %v357_v62  ;;  %v359_v9 = vadd.f32 0.5, %v295_v63  ;;  %v297_v10 = vmul.f32 0.5, %v509_v3  ;;  %530 = vtanh.f32 %v773_v24  ;;  %v117_v24 = vmul.f32 %v636_v1, %v46_v12  ;;  %v54_v12 = vld [vmem:[%s1158_s0 + $0x140] sm:$0xff] }
  0x20   :  { %v513_v13 = vpop.eup %512  ;;  %422 = vst [vmem:[%s1161_s3 + $0x50] sm:$0xff] %v358_v4  ;;  %v360_v14 = vadd.f32 0.5, %v296_v5  ;;  %v298_v15 = vmul.f32 0.5, %v511_v8  ;;  %532 = vtanh.f32 %v181_v37  ;;  %v187_v29 = vadd.f32 %v641_v2, %v116_v20 }
  0x21   :  { %v515_v17 = vpop.eup %514  ;;  %423 = vst [vmem:[%s1161_s3 + $0x58] sm:$0xff] %v359_v9  ;;  %v361_v18 = vadd.f32 0.5, %v297_v10  ;;  %v299_v19 = vmul.f32 0.5, %v513_v13  ;;  %534 = vtanh.f32 %v182_v42  ;;  %v188_v34 = vadd.f32 %v641_v2, %v117_v24 }
  0x22   :  { %v517_v21 = vpop.eup %516  ;;  %424 = vst [vmem:[%s1161_s3 + $0x60] sm:$0xff] %v360_v14  ;;  %v362_v22 = vadd.f32 0.5, %v298_v15  ;;  %v300_v23 = vmul.f32 0.5, %v515_v17  ;;  %536 = vtanh.f32 %v183_v55  ;;  %v118_v38 = vmul.f32 %v636_v1, %v47_v25 }
  0x23   :  { %v519_v26 = vpop.eup %518  ;;  %425 = vst [vmem:[%s1161_s3 + $0x68] sm:$0xff] %v361_v18  ;;  %v363_v27 = vadd.f32 0.5, %v299_v19  ;;  %v301_v28 = vmul.f32 0.5, %v517_v21  ;;  %538 = vtanh.f32 %v184_v60  ;;  %v119_v43 = vmul.f32 %v636_v1, %v48_v30 }
  0x24   :  { %v521_v31 = vpop.eup %520  ;;  %426 = vst [vmem:[%s1161_s3 + $0x70] sm:$0xff] %v362_v22  ;;  %v364_v32 = vadd.f32 0.5, %v300_v23  ;;  %v302_v33 = vmul.f32 0.5, %v519_v26  ;;  %540 = vtanh.f32 %v185_v11  ;;  %v189_v48 = vadd.f32 %v641_v2, %v118_v38  ;;  %v55_v22 = vld [vmem:[%s1158_s0 + $0x148] sm:$0xff]  ;;  %v58_v38 = vld [vmem:[%s1158_s0 + $0x160] sm:$0xff] }
  0x25   :  { %v523_v35 = vpop.eup %522  ;;  %427 = vst [vmem:[%s1161_s3 + $0x78] sm:$0xff] %v363_v27  ;;  %v365_v36 = vadd.f32 0.5, %v301_v28  ;;  %v303_v37 = vmul.f32 0.5, %v521_v31  ;;  %542 = vtanh.f32 %v186_v16  ;;  %v190_v52 = vadd.f32 %v641_v2, %v119_v43  ;;  %v56_v27 = vld [vmem:[%s1158_s0 + $0x150] sm:$0xff] }
  0x26   :  { %v525_v40 = vpop.eup %524  ;;  %428 = vst [vmem:[%s1161_s3 + $0x80] sm:$0xff] %v364_v32  ;;  %v366_v41 = vadd.f32 0.5, %v302_v33  ;;  %v304_v42 = vmul.f32 0.5, %v523_v35  ;;  %544 = vtanh.f32 %v187_v29  ;;  %v120_v53 = vmul.f32 %v636_v1, %v49_v39  ;;  %v57_v32 = vld [vmem:[%s1158_s0 + $0x158] sm:$0xff] }
  0x27   :  { %v527_v45 = vpop.eup %526  ;;  %429 = vst [vmem:[%s1161_s3 + $0x88] sm:$0xff] %v365_v36  ;;  %v367_v46 = vadd.f32 0.5, %v303_v37  ;;  %v305_v47 = vmul.f32 0.5, %v525_v40  ;;  %546 = vtanh.f32 %v188_v34  ;;  %v121_v58 = vmul.f32 %v636_v1, %v50_v44 }
  0x28   :  { %v529_v49 = vpop.eup %528  ;;  %430 = vst [vmem:[%s1161_s3 + $0x90] sm:$0xff] %v366_v41  ;;  %v368_v50 = vadd.f32 0.5, %v304_v42  ;;  %v306_v51 = vmul.f32 0.5, %v527_v45  ;;  %548 = vtanh.f32 %v189_v48  ;;  %v191_v63 = vadd.f32 %v641_v2, %v120_v53  ;;  %v59_v42 = vld [vmem:[%s1158_s0 + $0x168] sm:$0xff] }
  0x29   :  { %v531_v55 = vpop.eup %530  ;;  %431 = vst [vmem:[%s1161_s3 + $0x98] sm:$0xff] %v367_v46  ;;  %v369_v56 = vadd.f32 0.5, %v305_v47  ;;  %v307_v57 = vmul.f32 0.5, %v529_v49  ;;  %550 = vtanh.f32 %v190_v52  ;;  %v192_v5 = vadd.f32 %v641_v2, %v121_v58  ;;  %v60_v47 = vld [vmem:[%s1158_s0 + $0x170] sm:$0xff] }
  0x2a   :  { %v533_v60 = vpop.eup %532  ;;  %432 = vst [vmem:[%s1161_s3 + $0xa0] sm:$0xff] %v368_v50  ;;  %v370_v61 = vadd.f32 0.5, %v306_v51  ;;  %v308_v62 = vmul.f32 0.5, %v531_v55  ;;  %v122_v6 = vmul.f32 %v636_v1, %v51_v54  ;;  %552 = vtanh.f32 %v191_v63 }
  0x2b   :  { %v535_v0 = vpop.eup %534  ;;  %433 = vst [vmem:[%s1161_s3 + $0xa8] sm:$0xff] %v369_v56  ;;  %v371_v3 = vadd.f32 0.5, %v307_v57  ;;  %v309_v4 = vmul.f32 0.5, %v533_v60  ;;  %v123_v11 = vmul.f32 %v636_v1, %v52_v59  ;;  %554 = vtanh.f32 %v192_v5  ;;  %v61_v56 = vld [vmem:[%s1158_s0 + $0x178] sm:$0xff] }
  0x2c   :  { %v537_v8 = vpop.eup %536  ;;  %434 = vst [vmem:[%s1161_s3 + $0xb0] sm:$0xff] %v370_v61  ;;  %v372_v9 = vadd.f32 0.5, %v308_v62  ;;  %v310_v10 = vmul.f32 0.5, %v535_v0  ;;  %v193_v16 = vadd.f32 %v641_v2, %v122_v6  ;;  %v124_v21 = vmul.f32 %v636_v1, %v53_v7  ;;  %v62_v61 = vld [vmem:[%s1158_s0 + $0x180] sm:$0xff]  ;;  %v63_v62 = vld [vmem:[%s1158_s0 + $0x188] sm:$0xff] }
  0x2d   :  { %v539_v13 = vpop.eup %538  ;;  %435 = vst [vmem:[%s1161_s3 + $0xb8] sm:$0xff] %v371_v3  ;;  %v373_v14 = vadd.f32 0.5, %v309_v4  ;;  %v311_v15 = vmul.f32 0.5, %v537_v8  ;;  %v194_v20 = vadd.f32 %v641_v2, %v123_v11  ;;  %v125_v26 = vmul.f32 %v636_v1, %v54_v12  ;;  %v64_v8 = vld [vmem:[%s1158_s0 + $0x190] sm:$0xff] }
  0x2e   :  { %v541_v17 = vpop.eup %540  ;;  %436 = vst [vmem:[%s1161_s3 + $0xc0] sm:$0xff] %v372_v9  ;;  %v374_v18 = vadd.f32 0.5, %v310_v10  ;;  %v312_v19 = vmul.f32 0.5, %v539_v13  ;;  %556 = vtanh.f32 %v193_v16  ;;  %v195_v31 = vadd.f32 %v641_v2, %v124_v21  ;;  %v65_v13 = vld [vmem:[%s1158_s0 + $0x198] sm:$0xff] }
  0x2f   :  { %v543_v23 = vpop.eup %542  ;;  %437 = vst [vmem:[%s1161_s3 + $0xc8] sm:$0xff] %v373_v14  ;;  %v375_v24 = vadd.f32 0.5, %v311_v15  ;;  %v313_v25 = vmul.f32 0.5, %v541_v17  ;;  %558 = vtanh.f32 %v194_v20  ;;  %v196_v36 = vadd.f32 %v641_v2, %v125_v26  ;;  %v66_v14 = vld [vmem:[%s1158_s0 + $0x1a0] sm:$0xff] }
  0x30   :  { %v545_v28 = vpop.eup %544  ;;  %438 = vst [vmem:[%s1161_s3 + $0xd0] sm:$0xff] %v374_v18  ;;  %v376_v29 = vadd.f32 0.5, %v312_v19  ;;  %v314_v30 = vmul.f32 0.5, %v543_v23  ;;  %v126_v37 = vmul.f32 %v636_v1, %v55_v22  ;;  %560 = vtanh.f32 %v195_v31 }
  0x31   :  { %v547_v33 = vpop.eup %546  ;;  %439 = vst [vmem:[%s1161_s3 + $0xd8] sm:$0xff] %v375_v24  ;;  %v377_v34 = vadd.f32 0.5, %v313_v25  ;;  %v315_v35 = vmul.f32 0.5, %v545_v28  ;;  %v127_v41 = vmul.f32 %v636_v1, %v56_v27  ;;  %562 = vtanh.f32 %v196_v36  ;;  %v67_v27 = vld [vmem:[%s1158_s0 + $0x1a8] sm:$0xff]  ;;  %v68_v28 = vld [vmem:[%s1158_s0 + $0x1b0] sm:$0xff] }
  0x32   :  { %440 = vst [vmem:[%s1161_s3 + $0xe0] sm:$0xff] %v376_v29  ;;  %v378_v39 = vadd.f32 0.5, %v314_v30  ;;  %v316_v40 = vmul.f32 0.5, %v547_v33  ;;  %v549_v43 = vpop.eup %548  ;;  %v197_v45 = vadd.f32 %v641_v2, %v126_v37  ;;  %v128_v46 = vmul.f32 %v636_v1, %v57_v32  ;;  %v69_v33 = vld [vmem:[%s1158_s0 + $0x1b8] sm:$0xff] }
  0x33   :  { %441 = vst [vmem:[%s1161_s3 + $0xe8] sm:$0xff] %v377_v34  ;;  %v379_v44 = vadd.f32 0.5, %v315_v35  ;;  %v551_v48 = vpop.eup %550  ;;  %v317_v50 = vmul.f32 0.5, %v549_v43  ;;  %v198_v51 = vadd.f32 %v641_v2, %v127_v41  ;;  %v129_v52 = vmul.f32 %v636_v1, %v58_v38  ;;  %v70_v41 = vld [vmem:[%s1158_s0 + $0x1c0] sm:$0xff] }
  0x34   :  { %442 = vst [vmem:[%s1161_s3 + $0xf0] sm:$0xff] %v378_v39  ;;  %v380_v49 = vadd.f32 0.5, %v316_v40  ;;  %v318_v53 = vmul.f32 0.5, %v551_v48  ;;  %564 = vtanh.f32 %v197_v45  ;;  %v199_v54 = vadd.f32 %v641_v2, %v128_v46  ;;  %v553_v57 = vpop.eup %552  ;;  %v71_v46 = vld [vmem:[%s1158_s0 + $0x1c8] sm:$0xff] }
  0x35   :  { %443 = vst [vmem:[%s1161_s3 + $0xf8] sm:$0xff] %v379_v44  ;;  %v130_v55 = vmul.f32 %v636_v1, %v59_v42  ;;  %v381_v58 = vadd.f32 0.5, %v317_v50  ;;  %566 = vtanh.f32 %v198_v51  ;;  %v200_v59 = vadd.f32 %v641_v2, %v129_v52  ;;  %v555_v63 = vpop.eup %554 }
  0x36   :  { %444 = vst [vmem:[%s1161_s3 + $0x100] sm:$0xff] %v380_v49  ;;  %v131_v60 = vmul.f32 %v636_v1, %v60_v47  ;;  %v382_v0 = vadd.f32 0.5, %v318_v53  ;;  %v319_v3 = vmul.f32 0.5, %v553_v57  ;;  %568 = vtanh.f32 %v199_v54 }
  0x37   :  { %v201_v4 = vadd.f32 %v641_v2, %v130_v55  ;;  %445 = vst [vmem:[%s1161_s3 + $0x108] sm:$0xff] %v381_v58  ;;  %v320_v5 = vmul.f32 0.5, %v555_v63  ;;  %570 = vtanh.f32 %v200_v59  ;;  %v132_v7 = vmul.f32 %v636_v1, %v61_v56 }
  0x38   :  { %v202_v6 = vadd.f32 %v641_v2, %v131_v60  ;;  %v557_v9 = vpop.eup %556  ;;  %446 = vst [vmem:[%s1161_s3 + $0x110] sm:$0xff] %v382_v0  ;;  %v383_v10 = vadd.f32 0.5, %v319_v3  ;;  %v133_v11 = vmul.f32 %v636_v1, %v62_v61  ;;  %v134_v12 = vmul.f32 %v636_v1, %v63_v62  ;;  %v72_v60 = vld [vmem:[%s1158_s0 + $0x1d0] sm:$0xff]  ;;  %v73_v61 = vld [vmem:[%s1158_s0 + $0x1d8] sm:$0xff] }
  0x39   :  { %572 = vtanh.f32 %v201_v4  ;;  %v559_v15 = vpop.eup %558  ;;  %v384_v16 = vadd.f32 0.5, %v320_v5  ;;  %v321_v17 = vmul.f32 0.5, %v557_v9  ;;  %v203_v18 = vadd.f32 %v641_v2, %v132_v7  ;;  %v74_v4 = vld [vmem:[%s1158_s0 + $0x1e0] sm:$0xff] }
  0x3a   :  { %574 = vtanh.f32 %v202_v6  ;;  %447 = vst [vmem:[%s1161_s3 + $0x118] sm:$0xff] %v383_v10  ;;  %v322_v19 = vmul.f32 0.5, %v559_v15  ;;  %v204_v20 = vadd.f32 %v641_v2, %v133_v11  ;;  %v205_v21 = vadd.f32 %v641_v2, %v134_v12  ;;  %v561_v23 = vpop.eup %560 }
  0x3b   :  { %v135_v22 = vmul.f32 %v636_v1, %v64_v8  ;;  %448 = vst [vmem:[%s1161_s3 + $0x120] sm:$0xff] %v384_v16  ;;  %v385_v24 = vadd.f32 0.5, %v321_v17  ;;  %576 = vtanh.f32 %v203_v18  ;;  %v136_v25 = vmul.f32 %v636_v1, %v65_v13  ;;  %v563_v29 = vpop.eup %562  ;;  %v75_v8 = vld [vmem:[%s1158_s0 + $0x1e8] sm:$0xff]  ;;  %v76_v13 = vld [vmem:[%s1158_s0 + $0x1f0] sm:$0xff] }
  0x3c   :  { %v137_v26 = vmul.f32 %v636_v1, %v66_v14  ;;  %v386_v30 = vadd.f32 0.5, %v322_v19  ;;  %v323_v31 = vmul.f32 0.5, %v561_v23  ;;  %578 = vtanh.f32 %v204_v20 }
  0x3d   :  { %v206_v32 = vadd.f32 %v641_v2, %v135_v22  ;;  %449 = vst [vmem:[%s1161_s3 + $0x128] sm:$0xff] %v385_v24  ;;  %v324_v34 = vmul.f32 0.5, %v563_v29  ;;  %580 = vtanh.f32 %v205_v21  ;;  %v207_v35 = vadd.f32 %v641_v2, %v136_v25 }
  0x3e   :  { %v208_v36 = vadd.f32 %v641_v2, %v137_v26  ;;  %v565_v37 = vpop.eup %564  ;;  %450 = vst [vmem:[%s1161_s3 + $0x130] sm:$0xff] %v386_v30  ;;  %v387_v38 = vadd.f32 0.5, %v323_v31  ;;  %v138_v39 = vmul.f32 %v636_v1, %v67_v27  ;;  %v139_v40 = vmul.f32 %v636_v1, %v68_v28  ;;  %v77_v28 = vld [vmem:[%s1158_s0 + $0x1f8] sm:$0xff] }
  0x3f   :  { %582 = vtanh.f32 %v206_v32  ;;  %v567_v42 = vpop.eup %566  ;;  %v388_v43 = vadd.f32 0.5, %v324_v34  ;;  %v325_v44 = vmul.f32 0.5, %v565_v37  ;;  %v140_v45 = vmul.f32 %v636_v1, %v69_v33 }
  0x40   :  { %584 = vtanh.f32 %v207_v35  ;;  %v569_v47 = vpop.eup %568  ;;  %451 = vst [vmem:[%s1161_s3 + $0x138] sm:$0xff] %v387_v38  ;;  %v326_v48 = vmul.f32 0.5, %v567_v42  ;;  %v209_v49 = vadd.f32 %v641_v2, %v138_v39  ;;  %v210_v50 = vadd.f32 %v641_v2, %v139_v40 }
  0x41   :  { %586 = vtanh.f32 %v208_v36  ;;  %v571_v51 = vpop.eup %570  ;;  %452 = vst [vmem:[%s1161_s3 + $0x140] sm:$0xff] %v388_v43  ;;  %v389_v52 = vadd.f32 0.5, %v325_v44  ;;  %v327_v53 = vmul.f32 0.5, %v569_v47  ;;  %v211_v54 = vadd.f32 %v641_v2, %v140_v45 }
  0x42   :  { %v141_v55 = vmul.f32 %v636_v1, %v70_v41  ;;  %v390_v57 = vadd.f32 0.5, %v326_v48  ;;  %v328_v58 = vmul.f32 0.5, %v571_v51  ;;  %588 = vtanh.f32 %v209_v49 }
  0x43   :  { %v573_v56 = vpop.eup %572  ;;  %v142_v59 = vmul.f32 %v636_v1, %v71_v46  ;;  %453 = vst [vmem:[%s1161_s3 + $0x148] sm:$0xff] %v389_v52  ;;  %v391_v63 = vadd.f32 0.5, %v327_v53  ;;  %590 = vtanh.f32 %v210_v50  ;;  %v143_v11 = vmul.f32 %v636_v1, %v72_v60 }
  0x44   :  { %v575_v62 = vpop.eup %574  ;;  %v329_v0 = vmul.f32 0.5, %v573_v56  ;;  %v212_v3 = vadd.f32 %v641_v2, %v141_v55  ;;  %454 = vst [vmem:[%s1161_s3 + $0x150] sm:$0xff] %v390_v57  ;;  %v392_v5 = vadd.f32 0.5, %v328_v58  ;;  %592 = vtanh.f32 %v211_v54 }
  0x45   :  { %v330_v6 = vmul.f32 0.5, %v575_v62  ;;  %v213_v7 = vadd.f32 %v641_v2, %v142_v59  ;;  %v577_v9 = vpop.eup %576  ;;  %455 = vst [vmem:[%s1161_s3 + $0x158] sm:$0xff] %v391_v63  ;;  %v144_v12 = vmul.f32 %v636_v1, %v73_v61  ;;  %v145_v17 = vmul.f32 %v636_v1, %v74_v4 }
  0x46   :  { %v393_v10 = vadd.f32 0.5, %v329_v0  ;;  %594 = vtanh.f32 %v212_v3  ;;  %v579_v14 = vpop.eup %578  ;;  %456 = vst [vmem:[%s1161_s3 + $0x160] sm:$0xff] %v392_v5  ;;  %v331_v16 = vmul.f32 0.5, %v577_v9  ;;  %v214_v20 = vadd.f32 %v641_v2, %v143_v11 }
  0x47   :  { %v394_v15 = vadd.f32 0.5, %v330_v6  ;;  %596 = vtanh.f32 %v213_v7  ;;  %v581_v18 = vpop.eup %580  ;;  %v332_v19 = vmul.f32 0.5, %v579_v14  ;;  %v215_v21 = vadd.f32 %v641_v2, %v144_v12 }
  0x48   :  { %457 = vst [vmem:[%s1161_s3 + $0x168] sm:$0xff] %v393_v10  ;;  %v146_v22 = vmul.f32 %v636_v1, %v75_v8  ;;  %v395_v24 = vadd.f32 0.5, %v331_v16  ;;  %v333_v25 = vmul.f32 0.5, %v581_v18  ;;  %v216_v26 = vadd.f32 %v641_v2, %v145_v17 }
  0x49   :  { %v583_v23 = vpop.eup %582  ;;  %458 = vst [vmem:[%s1161_s3 + $0x170] sm:$0xff] %v394_v15  ;;  %v147_v27 = vmul.f32 %v636_v1, %v76_v13  ;;  %v396_v30 = vadd.f32 0.5, %v332_v19  ;;  %598 = vtanh.f32 %v214_v20  ;;  %v148_v39 = vmul.f32 %v636_v1, %v77_v28 }
  0x4a   :  { %v585_v29 = vpop.eup %584  ;;  %v334_v31 = vmul.f32 0.5, %v583_v23  ;;  %v217_v32 = vadd.f32 %v641_v2, %v146_v22  ;;  %459 = vst [vmem:[%s1161_s3 + $0x178] sm:$0xff] %v395_v24  ;;  %v397_v34 = vadd.f32 0.5, %v333_v25  ;;  %600 = vtanh.f32 %v215_v21 }
  0x4b   :  { %v587_v33 = vpop.eup %586  ;;  %v335_v35 = vmul.f32 0.5, %v585_v29  ;;  %v218_v36 = vadd.f32 %v641_v2, %v147_v27  ;;  %460 = vst [vmem:[%s1161_s3 + $0x180] sm:$0xff] %v396_v30  ;;  %602 = vtanh.f32 %v216_v26  ;;  %v219_v45 = vadd.f32 %v641_v2, %v148_v39 }
  0x4c   :  { %v398_v37 = vadd.f32 0.5, %v334_v31  ;;  %v336_v38 = vmul.f32 0.5, %v587_v33  ;;  %v589_v40 = vpop.eup %588  ;;  %461 = vst [vmem:[%s1161_s3 + $0x188] sm:$0xff] %v397_v34  ;;  %604 = vtanh.f32 %v217_v32 }
  0x4d   :  { %v399_v41 = vadd.f32 0.5, %v335_v35  ;;  %v591_v42 = vpop.eup %590  ;;  %v337_v44 = vmul.f32 0.5, %v589_v40  ;;  %606 = vtanh.f32 %v218_v36 }
  0x4e   :  { %462 = vst [vmem:[%s1161_s3 + $0x190] sm:$0xff] %v398_v37  ;;  %v400_v43 = vadd.f32 0.5, %v336_v38  ;;  %v593_v46 = vpop.eup %592  ;;  %v338_v1 = vmul.f32 0.5, %v591_v42  ;;  %608 = vtanh.f32 %v219_v45 }
  0x4f   :  { %463 = vst [vmem:[%s1161_s3 + $0x198] sm:$0xff] %v399_v41  ;;  %v401_v48 = vadd.f32 0.5, %v337_v44  ;;  %v339_v49 = vmul.f32 0.5, %v593_v46 }
  0x50   :  { %v595_v47 = vpop.eup %594  ;;  %464 = vst [vmem:[%s1161_s3 + $0x1a0] sm:$0xff] %v400_v43  ;;  %v402_v51 = vadd.f32 0.5, %v338_v1 }
  0x51   :  { %v597_v50 = vpop.eup %596  ;;  %v340_v52 = vmul.f32 0.5, %v595_v47  ;;  %465 = vst [vmem:[%s1161_s3 + $0x1a8] sm:$0xff] %v401_v48  ;;  %v403_v2 = vadd.f32 0.5, %v339_v49 }
  0x52   :  { %v341_v53 = vmul.f32 0.5, %v597_v50  ;;  %466 = vst [vmem:[%s1161_s3 + $0x1b0] sm:$0xff] %v402_v51 }
  0x53   :  { %v404_v54 = vadd.f32 0.5, %v340_v52  ;;  %v599_v55 = vpop.eup %598  ;;  %467 = vst [vmem:[%s1161_s3 + $0x1b8] sm:$0xff] %v403_v2 }
  0x54   :  { %v405_v56 = vadd.f32 0.5, %v341_v53  ;;  %v601_v57 = vpop.eup %600  ;;  %v342_v58 = vmul.f32 0.5, %v599_v55 }
  0x55   :  { %468 = vst [vmem:[%s1161_s3 + $0x1c0] sm:$0xff] %v404_v54  ;;  %v603_v59 = vpop.eup %602  ;;  %v343_v60 = vmul.f32 0.5, %v601_v57 }
  0x56   :  { %469 = vst [vmem:[%s1161_s3 + $0x1c8] sm:$0xff] %v405_v56  ;;  %v605_v61 = vpop.eup %604  ;;  %v406_v62 = vadd.f32 0.5, %v342_v58  ;;  %v344_v63 = vmul.f32 0.5, %v603_v59 }
  0x57   :  { %v607_v0 = vpop.eup %606  ;;  %v407_v3 = vadd.f32 0.5, %v343_v60  ;;  %v345_v4 = vmul.f32 0.5, %v605_v61 }
  0x58   :  { %470 = vst [vmem:[%s1161_s3 + $0x1d0] sm:$0xff] %v406_v62  ;;  %v408_v5 = vadd.f32 0.5, %v344_v63  ;;  %v346_v6 = vmul.f32 0.5, %v607_v0  ;;  %v609_v7 = vpop.eup %608 }
  0x59   :  { %471 = vst [vmem:[%s1161_s3 + $0x1d8] sm:$0xff] %v407_v3  ;;  %v409_v8 = vadd.f32 0.5, %v345_v4  ;;  %v347_v10 = vmul.f32 0.5, %v609_v7 }
  0x5a   :  { %472 = vst [vmem:[%s1161_s3 + $0x1e0] sm:$0xff] %v408_v5  ;;  %v410_v9 = vadd.f32 0.5, %v346_v6 }
  0x5b   :  { %473 = vst [vmem:[%s1161_s3 + $0x1e8] sm:$0xff] %v409_v8  ;;  %v411_v11 = vadd.f32 0.5, %v347_v10 }
  0x5c   :  { %474 = vst [vmem:[%s1161_s3 + $0x1f0] sm:$0xff] %v410_v9 }
  0x5d   :  { %475 = vst [vmem:[%s1161_s3 + $0x1f8] sm:$0xff] %v411_v11 }

</bundles_post_ra>
